<compile_context>
chip_gen: v7x
topology: tpu7x:2x2x1
jax: 0.10.0
libtpu: 0.0.40
codegen_flags: <defaults>
</compile_context>

<pallas_src>
import jax
import jax.numpy as jnp
from jax import lax
from jax.experimental import pallas as pl
from jax.experimental.pallas import tpu as pltpu

VMEM = pl.BlockSpec(memory_space=pltpu.MemorySpace.VMEM)
SMEM = pl.BlockSpec(memory_space=pltpu.MemorySpace.SMEM)

# Matmul operand dtype.  Set to jnp.bfloat16 on v6e/v7x for ~2x MXU throughput (the cast
# then belongs on the hoisted weight loads); fp32 default keeps exact parity everywhere.
_MM_DTYPE = jnp.float32


def _mm(a, b):
    return jnp.dot(a.astype(_MM_DTYPE), b.astype(_MM_DTYPE),
                   preferred_element_type=jnp.float32)


def _round_up(x, m):
    return ((x + m - 1) // m) * m


# ----------------------------------------------------------------------------
# Fused encoder: all layers, both directions, one pallas_call.
# ----------------------------------------------------------------------------
def _make_encoder_kernel(T, Bp, He, n_layers, n_mid):
    H2 = 2 * He          # packed hidden width (fwd | bwd lanes)
    G = 8 * He           # packed gate width  [i_f i_b | f_f f_b | g_f g_b | o_f o_b]
    unroll = True if T <= 16 else 4

    def kernel(*refs):
        x_ref = refs[0]
        w = refs[1:1 + 4 * n_layers]
        enc_ref = refs[1 + 4 * n_layers]
        h0_ref = refs[2 + 4 * n_layers]
        scr = refs[3 + 4 * n_layers:]
        mids = scr[:n_mid]
        gif_scr, gib_scr = scr[n_mid], scr[n_mid + 1]

        def run_layer(in_ref, out_ref, wf_ref, wb_ref, bc_ref, whh_ref):
            din = in_ref.shape[-1]
            # Precompute input->gate projections for all timesteps, both directions,
            # as two big matmuls (bias folded into the fwd slab once, outside the loop).
            xf = in_ref[...].reshape(T * Bp, din)
            gif_scr[...] = (_mm(xf, wf_ref[...]) + bc_ref[...]).reshape(T, Bp, G)
            gib_scr[...] = _mm(xf, wb_ref[...]).reshape(T, Bp, G)

            Whh = whh_ref[...]                       # block-diagonal (2He, 8He)
            zeros = jnp.zeros((Bp, H2), jnp.float32)

            def body(t, carry):
                # Merged fwd (time t) + bwd (time T-1-t) cell on lane-packed state.
                h, c = carry                          # (Bp, 2He)
                g = gif_scr[t] + gib_scr[T - 1 - t] + _mm(h, Whh)
                i = jax.nn.sigmoid(g[:, 0 * H2:1 * H2])     # PyTorch gate order i,f,g,o
                f = jax.nn.sigmoid(g[:, 1 * H2:2 * H2])
                gg = jnp.tanh(g[:, 2 * H2:3 * H2])
                o = jax.nn.sigmoid(g[:, 3 * H2:4 * H2])
                c = f * c + i * gg
                h = o * jnp.tanh(c)
                out_ref[t, :, 0:He] = h[:, 0:He]             # fwd hidden at time t
                out_ref[T - 1 - t, :, He:H2] = h[:, He:H2]   # bwd hidden at time T-1-t
                return (h, c)

            h_fin, _ = lax.fori_loop(0, T, body, (zeros, zeros), unroll=unroll)
            return h_fin

        in_ref = x_ref
        h_fin = None
        for l in range(n_layers):
            out_l = enc_ref if l == n_layers - 1 else mids[l % max(1, n_mid)]
            base = 4 * l
            h_fin = run_layer(in_ref, out_l,
                              w[base + 0], w[base + 1], w[base + 2], w[base + 3])
            in_ref = out_l

        # decoder initial hidden = [final fwd hidden | final bwd hidden] of the last
        # layer, which is exactly the packed h after the last merged iteration.
        h0_ref[...] = h_fin

    return kernel


def encoder_forward(params, x_seq):
    # x_seq: (T, Bp, E) float32, seq-first
    T, Bp, _ = x_seq.shape
    He = params["enc"][0]["whh_comb"].shape[0] // 2
    n_layers = len(params["enc"])
    n_mid = 0 if n_layers == 1 else (1 if n_layers == 2 else 2)

    weights = []
    for lp in params["enc"]:
        weights += [lp["wf_big"], lp["wb_big"], lp["b_comb"], lp["whh_comb"]]

    scratch = [pltpu.VMEM((T, Bp, 2 * He), jnp.float32) for _ in range(n_mid)]
    scratch += [pltpu.VMEM((T, Bp, 8 * He), jnp.float32),   # fwd input->gate precompute
                pltpu.VMEM((T, Bp, 8 * He), jnp.float32)]   # bwd input->gate precompute

    enc_out, h0 = pl.pallas_call(
        _make_encoder_kernel(T, Bp, He, n_layers, n_mid),
        out_shape=(jax.ShapeDtypeStruct((T, Bp, 2 * He), jnp.float32),
                   jax.ShapeDtypeStruct((Bp, 2 * He), jnp.float32)),
        in_specs=[VMEM] * (1 + len(weights)),
        out_specs=(VMEM, VMEM),
        scratch_shapes=scratch,
    )(x_seq, *weights)
    return enc_out, h0


# ----------------------------------------------------------------------------
# Fused decoder: the whole decode loop inside one grid-less kernel.
# ----------------------------------------------------------------------------
def _make_decoder_kernel(T, Bp, Hd, Ep, Vp):
    unroll = True if T <= 16 else 4

    def kernel(mask_ref,            # SMEM (T,) int32 teacher-forcing mask
               trg_oh_ref,          # (T, Bp, Vp) one-hot teacher tokens
               h0_ref,              # (Bp, Hd)
               enc_ref,             # (T, Bp, Hd)
               emb_ref,             # (Vp, Ep) padded decoder embedding table
               wa_h_ref, wa_e_ref, ba_ref, v_ref,       # attention
               w_gru_ref, whh_ref, bih_ref, bhh_ref,    # GRU ([emb|ctx] stacked Wih)
               w_out_ref, bout_ref,                     # output ([h|ctx] stacked)
               out_ref):            # (T-1, Bp, Vp) log-probs
        enc = enc_ref[...]                                              # (T, Bp, Hd)
        # decode-invariant: enc @ Wa_e + b_a, hoisted once (one 2-D matmul)
        ae = (_mm(enc.reshape(T * Bp, Hd), wa_e_ref[...])
              + ba_ref[...]).reshape(T, Bp, Hd)
        v_col = v_ref[...]                                              # (Hd, 1)
        bih = bih_ref[...]
        bhh = bhh_ref[...]
        bout = bout_ref[...]                                            # pads at -1e30
        colv = lax.broadcasted_iota(jnp.int32, (Bp, Vp), 1)             # hoisted iota

        def step(i, carry):
            h_prev, prev_oh = carry                                     # (Bp,Hd), (Bp,Vp)

            # input one-hot: trg[i] when teacher-forced (always at i==0), else prev argmax
            use_trg = jnp.logical_or(i == 0, mask_ref[i] != 0)
            onehot = jnp.where(use_trg, trg_oh_ref[i], prev_oh)
            emb = _mm(onehot, emb_ref[...])                             # (Bp, Ep)

            # attention: relu(h@Wa_h + ae) . v  (score on the MXU), softmax over T
            a_h = _mm(h_prev, wa_h_ref[...])                            # (Bp, Hd)
            energy = jnp.maximum(a_h[None, :, :] + ae, 0.0)             # (T, Bp, Hd)
            e = _mm(energy.reshape(T * Bp, Hd), v_col).reshape(T, Bp, 1)
            p = jnp.exp(e - jnp.max(e, axis=0, keepdims=True))
            attn = p * pl.reciprocal(jnp.sum(p, axis=0, keepdims=True), approx=True)
            ctx = jnp.sum(attn * enc, axis=0)                           # (Bp, Hd)

            # GRU cell on [embedded | context]; PyTorch gate order r, z, n
            gi = _mm(jnp.concatenate([emb, ctx], axis=1), w_gru_ref[...]) + bih
            gh = _mm(h_prev, whh_ref[...]) + bhh
            r = jax.nn.sigmoid(gi[:, 0:Hd] + gh[:, 0:Hd])
            z = jax.nn.sigmoid(gi[:, Hd:2 * Hd] + gh[:, Hd:2 * Hd])
            n = jnp.tanh(gi[:, 2 * Hd:3 * Hd] + r * gh[:, 2 * Hd:3 * Hd])
            h_new = (1.0 - z) * n + z * h_prev

            # output = log_softmax(Linear([gru_out | context])) over padded vocab
            logits = _mm(jnp.concatenate([h_new, ctx], axis=1), w_out_ref[...]) + bout
            m = jnp.max(logits, axis=1, keepdims=True)
            s = logits - m
            out_ref[i] = s - jnp.log(jnp.sum(jnp.exp(s), axis=1, keepdims=True))

            # greedy argmax (min-index tie-break) as next step's one-hot input
            top1 = jnp.min(jnp.where(logits == m, colv, Vp), axis=1, keepdims=True)
            return (h_new, (colv == top1).astype(jnp.float32))

        lax.fori_loop(0, T - 1, step,
                      (h0_ref[...], jnp.zeros((Bp, Vp), jnp.float32)),
                      unroll=unroll)

    return kernel


def decoder_forward(params, trg_onehot, mask_i32, h0, enc_out):
    T, Bp, Hd = enc_out.shape
    Vp, Ep = params["embed_dec_pad"].shape

    return pl.pallas_call(
        _make_decoder_kernel(T, Bp, Hd, Ep, Vp),
        out_shape=jax.ShapeDtypeStruct((T - 1, Bp, Vp), jnp.float32),
        in_specs=[SMEM] + [VMEM] * 14,
        out_specs=VMEM,
    )(mask_i32, trg_onehot, h0, enc_out,
      params["embed_dec_pad"],
      params["wa_h"], params["wa_e"], params["ba"], params["v_col"],
      params["w_gru_in"], params["whh_d"], params["bih"], params["bhh"],
      params["w_out"], params["bout"])


# ----------------------------------------------------------------------------
# Parameter init (deterministic, PyTorch-like uniform(-1/sqrt(H), 1/sqrt(H))),
# with host-side packing / padding for the kernels.
# ----------------------------------------------------------------------------
def _uniform(key, shape, scale):
    return jax.random.uniform(key, shape, jnp.float32, -scale, scale)


def _pack_enc_layer(key, din, He):
    ks = jax.random.split(key, 6)
    s = 1.0 / float(He) ** 0.5
    wih_f = _uniform(ks[0], (din, 4 * He), s)
    whh_f = _uniform(ks[1], (He, 4 * He), s)
    b_f = _uniform(ks[2], (1, 4 * He), s)
    wih_b = _uniform(ks[3], (din, 4 * He), s)
    whh_b = _uniform(ks[4], (He, 4 * He), s)
    b_b = _uniform(ks[5], (1, 4 * He), s)

    # Pack the two directions along lanes with gate-major interleaved columns
    # [i_f i_b | f_f f_b | g_f g_b | o_f o_b]; Whh becomes block-diagonal.
    wf_big = jnp.zeros((din, 8 * He), jnp.float32)
    wb_big = jnp.zeros((din, 8 * He), jnp.float32)
    whh_c = jnp.zeros((2 * He, 8 * He), jnp.float32)
    b_c = jnp.zeros((1, 8 * He), jnp.float32)
    for g in range(4):
        src = slice(g * He, (g + 1) * He)
        fdst = slice(g * 2 * He, g * 2 * He + He)
        bdst = slice(g * 2 * He + He, (g + 1) * 2 * He)
        wf_big = wf_big.at[:, fdst].set(wih_f[:, src])
        wb_big = wb_big.at[:, bdst].set(wih_b[:, src])
        whh_c = whh_c.at[0:He, fdst].set(whh_f[:, src])
        whh_c = whh_c.at[He:2 * He, bdst].set(whh_b[:, src])
        b_c = b_c.at[:, fdst].set(b_f[:, src])
        b_c = b_c.at[:, bdst].set(b_b[:, src])
    return {"wf_big": wf_big, "wb_big": wb_big, "b_comb": b_c, "whh_comb": whh_c}


def init_params(key, enc_vocab, enc_embed, enc_hidden, enc_layers,
                dec_vocab, dec_embed, dec_hidden, vocab_pad, embed_pad):
    keys = iter(jax.random.split(key, 64))
    p = {}
    # ---- encoder ----
    p["embed_enc"] = _uniform(next(keys), (enc_vocab, enc_embed), 1.0)
    p["enc"] = []
    for layer in range(enc_layers):
        din = enc_embed if layer == 0 else 2 * enc_hidden
        p["enc"].append(_pack_enc_layer(next(keys), din, enc_hidden))
    # ---- decoder ----
    Hd = dec_hidden
    sd = 1.0 / float(Hd) ** 0.5
    emb = _uniform(next(keys), (dec_vocab, dec_embed), 1.0)
    p["embed_dec_pad"] = (jnp.zeros((vocab_pad, embed_pad), jnp.float32)
                          .at[:dec_vocab, :dec_embed].set(emb))
    p["wa_h"] = _uniform(next(keys), (Hd, Hd), sd)      # attention weight (hidden part)
    p["wa_e"] = _uniform(next(keys), (Hd, Hd), sd)      # attention weight (enc-out part)
    p["ba"] = _uniform(next(keys), (1, Hd), sd)
    p["v_col"] = _uniform(next(keys), (Hd, 1), sd)      # column vector for MXU score
    # GRU input weights stacked for the fused [emb_pad | ctx] matmul
    wih_e = _uniform(next(keys), (dec_embed, 3 * Hd), sd)
    wih_c = _uniform(next(keys), (Hd, 3 * Hd), sd)
    p["w_gru_in"] = (jnp.zeros((embed_pad + Hd, 3 * Hd), jnp.float32)
                     .at[:dec_embed, :].set(wih_e)
                     .at[embed_pad:, :].set(wih_c))
    p["whh_d"] = _uniform(next(keys), (Hd, 3 * Hd), sd)
    p["bih"] = _uniform(next(keys), (1, 3 * Hd), sd)
    p["bhh"] = _uniform(next(keys), (1, 3 * Hd), sd)
    # output projection stacked for the fused [h | ctx] matmul, vocab padded to 128;
    # pad columns get a -1e30 bias so they vanish from softmax and never win argmax.
    wout_h = _uniform(next(keys), (Hd, dec_vocab), sd)
    wout_c = _uniform(next(keys), (Hd, dec_vocab), sd)
    bout = _uniform(next(keys), (1, dec_vocab), sd)
    p["w_out"] = (jnp.zeros((2 * Hd, vocab_pad), jnp.float32)
                  .at[0:Hd, 0:dec_vocab].set(wout_h)
                  .at[Hd:2 * Hd, 0:dec_vocab].set(wout_c))
    p["bout"] = (jnp.full((1, vocab_pad), -1e30, jnp.float32)
                 .at[:, 0:dec_vocab].set(bout))
    return p


# ----------------------------------------------------------------------------
# Forward pass (glue: embedding gather, batch padding, transposes, unpadding)
# ----------------------------------------------------------------------------
def seq2seq_forward(params, src, trg, teacher_mask, dec_vocab):
    B, T = src.shape
    Bp = _round_up(B, 8)                                       # pad batch to 8 sublanes
    Vp = params["bout"].shape[1]

    # ---- encoder ----
    src_p = jnp.pad(src, ((0, Bp - B), (0, 0)))
    x = jnp.take(params["embed_enc"], src_p, axis=0)           # (Bp, T, E)
    x = jnp.transpose(x, (1, 0, 2)).astype(jnp.float32)        # (T, Bp, E) seq-first
    enc_out, h0 = encoder_forward(params, x)                   # (T, Bp, 2He), (Bp, 2He)

    # ---- decoder (whole decode loop fused into one kernel) ----
    trg_p = jnp.pad(trg, ((0, 0), (0, Bp - B)))                # (T, Bp)
    trg_onehot = jax.nn.one_hot(trg_p, Vp, dtype=jnp.float32)  # (T, Bp, Vp)
    mask_i32 = teacher_mask.astype(jnp.int32)                  # (T,)
    slab = decoder_forward(params, trg_onehot, mask_i32, h0, enc_out)   # (T-1, Bp, Vp)

    out_rest = slab[:, :B, :dec_vocab]
    out0 = jnp.zeros((1, B, dec_vocab), jnp.float32)           # outputs[0] stays zero
    return jnp.concatenate([out0, out_rest], axis=0)           # (T, B, V)


if __name__ == "__main__":
    B, T = 2, 8
    ENC_VOCAB, ENC_EMBED, ENC_HIDDEN, ENC_LAYERS = 26, 32, 64, 2   # module defaults
    DEC_EMBED, DEC_VOCAB = 32, 24
    DEC_HIDDEN = 2 * ENC_HIDDEN                                    # 128 -> lane-dense
    V_PAD = 128                                                    # lane-dense vocab slab
    E_PAD = 128                                                    # lane-dense embed width

    root = jax.random.PRNGKey(0)
    k_param, k_src, k_trg, k_tf = jax.random.split(root, 4)

    params = init_params(k_param, ENC_VOCAB, ENC_EMBED, ENC_HIDDEN, ENC_LAYERS,
                         DEC_VOCAB, DEC_EMBED, DEC_HIDDEN, V_PAD, E_PAD)
    src = jax.random.randint(k_src, (B, T), 0, ENC_VOCAB, dtype=jnp.int32)
    trg = jax.random.randint(k_trg, (T, B), 0, DEC_VOCAB, dtype=jnp.int32)
    teacher_mask = jax.random.uniform(k_tf, (T,)) < 0.5            # stand-in for random()

    out = seq2seq_forward(params, src, trg, teacher_mask, DEC_VOCAB)
    out = jax.block_until_ready(out)

    assert out.shape == (T, B, DEC_VOCAB)
    assert bool(jnp.all(jnp.isfinite(out)))
    # rows 1..T-1 are log-softmax outputs -> each should sum to ~1 in prob space
    probs = jnp.exp(out[1:]).sum(axis=-1)
    assert bool(jnp.all(jnp.abs(probs - 1.0) < 1e-3))
    print("KERNEL_OK")
</pallas_src>

<mosaic_0001>
module attributes {stable_mosaic.version = 11 : i64} {
  func.func @kernel(%arg0: memref<8x8x32xf32, #tpu.memory_space<vmem>>, %arg1: memref<32x512xf32, #tpu.memory_space<vmem>>, %arg2: memref<32x512xf32, #tpu.memory_space<vmem>>, %arg3: memref<1x512xf32, #tpu.memory_space<vmem>>, %arg4: memref<128x512xf32, #tpu.memory_space<vmem>>, %arg5: memref<128x512xf32, #tpu.memory_space<vmem>>, %arg6: memref<128x512xf32, #tpu.memory_space<vmem>>, %arg7: memref<1x512xf32, #tpu.memory_space<vmem>>, %arg8: memref<128x512xf32, #tpu.memory_space<vmem>>, %arg9: memref<8x8x128xf32, #tpu.memory_space<vmem>>, %arg10: memref<8x128xf32, #tpu.memory_space<vmem>>, %arg11: memref<8x8x128xf32, #tpu.memory_space<vmem>>, %arg12: memref<8x8x512xf32, #tpu.memory_space<vmem>>, %arg13: memref<8x8x512xf32, #tpu.memory_space<vmem>>) attributes {dimension_semantics = [], scalar_prefetch = 0 : i64, scratch_operands = 3 : i64, tpu.core_type = #tpu.core_type<tc>} {
    %c0 = arith.constant 0 : index
    %c0_0 = arith.constant 0 : index
    %c0_1 = arith.constant 0 : index
    %0 = vector.load %arg0[%c0, %c0_0, %c0_1] : memref<8x8x32xf32, #tpu.memory_space<vmem>>, vector<8x8x32xf32>
    %1 = vector.shape_cast %0 : vector<8x8x32xf32> to vector<64x32xf32>
    %c0_2 = arith.constant 0 : index
    %c0_3 = arith.constant 0 : index
    %2 = vector.load %arg1[%c0_2, %c0_3] : memref<32x512xf32, #tpu.memory_space<vmem>>, vector<32x512xf32>
    %cst = arith.constant dense<0.000000e+00> : vector<64x512xf32>
    %3 = tpu.matmul %1, %2, %cst {dimension_numbers = #tpu.dot_dimension_numbers<[1], [0], [0], [1], [0, 0, 1, 1], [], []>} : vector<64x32xf32>, vector<32x512xf32>, vector<64x512xf32> -> vector<64x512xf32>
    %c0_4 = arith.constant 0 : index
    %c0_5 = arith.constant 0 : index
    %4 = vector.load %arg3[%c0_4, %c0_5] : memref<1x512xf32, #tpu.memory_space<vmem>>, vector<1x512xf32>
    %5 = vector.broadcast %4 : vector<1x512xf32> to vector<64x512xf32>
    %6 = arith.addf %3, %5 : vector<64x512xf32>
    %7 = vector.shape_cast %6 : vector<64x512xf32> to vector<8x8x512xf32>
    %c0_6 = arith.constant 0 : index
    %c0_7 = arith.constant 0 : index
    %c0_8 = arith.constant 0 : index
    %8 = vector.load %arg12[%c0_6, %c0_7, %c0_8] : memref<8x8x512xf32, #tpu.memory_space<vmem>>, vector<8x8x512xf32>
    tpu.vector_store %arg12[%c0_6, %c0_7, %c0_8], %7 {strides = array<i32>} : memref<8x8x512xf32, #tpu.memory_space<vmem>>, vector<8x8x512xf32>,
    %c0_9 = arith.constant 0 : index
    %c0_10 = arith.constant 0 : index
    %9 = vector.load %arg2[%c0_9, %c0_10] : memref<32x512xf32, #tpu.memory_space<vmem>>, vector<32x512xf32>
    %cst_11 = arith.constant dense<0.000000e+00> : vector<64x512xf32>
    %10 = tpu.matmul %1, %9, %cst_11 {dimension_numbers = #tpu.dot_dimension_numbers<[1], [0], [0], [1], [0, 0, 1, 1], [], []>} : vector<64x32xf32>, vector<32x512xf32>, vector<64x512xf32> -> vector<64x512xf32>
    %11 = vector.shape_cast %10 : vector<64x512xf32> to vector<8x8x512xf32>
    %c0_12 = arith.constant 0 : index
    %c0_13 = arith.constant 0 : index
    %c0_14 = arith.constant 0 : index
    %12 = vector.load %arg13[%c0_12, %c0_13, %c0_14] : memref<8x8x512xf32, #tpu.memory_space<vmem>>, vector<8x8x512xf32>
    tpu.vector_store %arg13[%c0_12, %c0_13, %c0_14], %11 {strides = array<i32>} : memref<8x8x512xf32, #tpu.memory_space<vmem>>, vector<8x8x512xf32>,
    %c0_15 = arith.constant 0 : index
    %c0_16 = arith.constant 0 : index
    %13 = vector.load %arg4[%c0_15, %c0_16] : memref<128x512xf32, #tpu.memory_space<vmem>>, vector<128x512xf32>
    %cst_17 = arith.constant 0.000000e+00 : f32
    %14 = vector.broadcast %cst_17 : f32 to vector<8x128xf32>
    %c0_i32 = arith.constant 0 : i32
    %15 = arith.index_cast %c0_i32 : i32 to index
    %c0_18 = arith.constant 0 : index
    %c0_19 = arith.constant 0 : index
    %16 = vector.load %arg12[%15, %c0_18, %c0_19] : memref<8x8x512xf32, #tpu.memory_space<vmem>>, vector<1x8x512xf32>
    %17 = vector.shape_cast %16 : vector<1x8x512xf32> to vector<8x512xf32>
    %c7_i32 = arith.constant 7 : i32
    %18 = arith.subi %c7_i32, %c0_i32 : i32
    %19 = arith.index_cast %18 : i32 to index
    %c0_20 = arith.constant 0 : index
    %c0_21 = arith.constant 0 : index
    %20 = vector.load %arg13[%19, %c0_20, %c0_21] : memref<8x8x512xf32, #tpu.memory_space<vmem>>, vector<1x8x512xf32>
    %21 = vector.shape_cast %20 : vector<1x8x512xf32> to vector<8x512xf32>
    %22 = arith.addf %17, %21 : vector<8x512xf32>
    %cst_22 = arith.constant dense<0.000000e+00> : vector<8x512xf32>
    %23 = tpu.matmul %14, %13, %cst_22 {dimension_numbers = #tpu.dot_dimension_numbers<[1], [0], [0], [1], [0, 0, 1, 1], [], []>} : vector<8x128xf32>, vector<128x512xf32>, vector<8x512xf32> -> vector<8x512xf32>
    %24 = arith.addf %22, %23 : vector<8x512xf32>
    %25 = vector.extract_strided_slice %24 {offsets = [0, 0], sizes = [8, 128], strides = [1, 1]} : vector<8x512xf32> to vector<8x128xf32>
    %26 = arith.negf %25 : vector<8x128xf32>
    %27 = math.exp %26 : vector<8x128xf32>
    %cst_23 = arith.constant 1.000000e+00 : f32
    %28 = vector.broadcast %cst_23 : f32 to vector<8x128xf32>
    %29 = arith.addf %28, %27 : vector<8x128xf32>
    %30 = arith.divf %28, %29 : vector<8x128xf32>
    %31 = vector.extract_strided_slice %24 {offsets = [0, 128], sizes = [8, 128], strides = [1, 1]} : vector<8x512xf32> to vector<8x128xf32>
    %32 = arith.negf %31 : vector<8x128xf32>
    %33 = math.exp %32 : vector<8x128xf32>
    %cst_24 = arith.constant 1.000000e+00 : f32
    %34 = vector.broadcast %cst_24 : f32 to vector<8x128xf32>
    %35 = arith.addf %34, %33 : vector<8x128xf32>
    %36 = arith.divf %34, %35 : vector<8x128xf32>
    %37 = vector.extract_strided_slice %24 {offsets = [0, 256], sizes = [8, 128], strides = [1, 1]} : vector<8x512xf32> to vector<8x128xf32>
    %38 = math.tanh %37 : vector<8x128xf32>
    %39 = vector.extract_strided_slice %24 {offsets = [0, 384], sizes = [8, 128], strides = [1, 1]} : vector<8x512xf32> to vector<8x128xf32>
    %40 = arith.negf %39 : vector<8x128xf32>
    %41 = math.exp %40 : vector<8x128xf32>
    %cst_25 = arith.constant 1.000000e+00 : f32
    %42 = vector.broadcast %cst_25 : f32 to vector<8x128xf32>
    %43 = arith.addf %42, %41 : vector<8x128xf32>
    %44 = arith.divf %42, %43 : vector<8x128xf32>
    %45 = arith.mulf %36, %14 : vector<8x128xf32>
    %46 = arith.mulf %30, %38 : vector<8x128xf32>
    %47 = arith.addf %45, %46 : vector<8x128xf32>
    %48 = math.tanh %47 : vector<8x128xf32>
    %49 = arith.mulf %44, %48 : vector<8x128xf32>
    %50 = vector.extract_strided_slice %49 {offsets = [0, 0], sizes = [8, 64], strides = [1, 1]} : vector<8x128xf32> to vector<8x64xf32>
    %51 = arith.index_cast %c0_i32 : i32 to index
    %c0_26 = arith.constant 0 : index
    %c0_27 = arith.constant 0 : index
    %52 = vector.load %arg11[%51, %c0_26, %c0_27] : memref<8x8x128xf32, #tpu.memory_space<vmem>>, vector<1x8x64xf32>
    %53 = vector.shape_cast %52 : vector<1x8x64xf32> to vector<8x64xf32>
    %54 = vector.shape_cast %50 : vector<8x64xf32> to vector<1x8x64xf32>
    tpu.vector_store %arg11[%51, %c0_26, %c0_27], %54 {strides = array<i32>} : memref<8x8x128xf32, #tpu.memory_space<vmem>>, vector<1x8x64xf32>,
    %55 = vector.extract_strided_slice %49 {offsets = [0, 64], sizes = [8, 64], strides = [1, 1]} : vector<8x128xf32> to vector<8x64xf32>
    %c7_i32_28 = arith.constant 7 : i32
    %56 = arith.subi %c7_i32_28, %c0_i32 : i32
    %57 = arith.index_cast %56 : i32 to index
    %c0_29 = arith.constant 0 : index
    %c64 = arith.constant 64 : index
    %58 = vector.load %arg11[%57, %c0_29, %c64] : memref<8x8x128xf32, #tpu.memory_space<vmem>>, vector<1x8x64xf32>
    %59 = vector.shape_cast %58 : vector<1x8x64xf32> to vector<8x64xf32>
    %60 = vector.shape_cast %55 : vector<8x64xf32> to vector<1x8x64xf32>
    tpu.vector_store %arg11[%57, %c0_29, %c64], %60 {strides = array<i32>} : memref<8x8x128xf32, #tpu.memory_space<vmem>>, vector<1x8x64xf32>,
    %c1_i32 = arith.constant 1 : i32
    %61 = arith.index_cast %c1_i32 : i32 to index
    %c0_30 = arith.constant 0 : index
    %c0_31 = arith.constant 0 : index
    %62 = vector.load %arg12[%61, %c0_30, %c0_31] : memref<8x8x512xf32, #tpu.memory_space<vmem>>, vector<1x8x512xf32>
    %63 = vector.shape_cast %62 : vector<1x8x512xf32> to vector<8x512xf32>
    %c7_i32_32 = arith.constant 7 : i32
    %64 = arith.subi %c7_i32_32, %c1_i32 : i32
    %65 = arith.index_cast %64 : i32 to index
    %c0_33 = arith.constant 0 : index
    %c0_34 = arith.constant 0 : index
    %66 = vector.load %arg13[%65, %c0_33, %c0_34] : memref<8x8x512xf32, #tpu.memory_space<vmem>>, vector<1x8x512xf32>
    %67 = vector.shape_cast %66 : vector<1x8x512xf32> to vector<8x512xf32>
    %68 = arith.addf %63, %67 : vector<8x512xf32>
    %cst_35 = arith.constant dense<0.000000e+00> : vector<8x512xf32>
    %69 = tpu.matmul %49, %13, %cst_35 {dimension_numbers = #tpu.dot_dimension_numbers<[1], [0], [0], [1], [0, 0, 1, 1], [], []>} : vector<8x128xf32>, vector<128x512xf32>, vector<8x512xf32> -> vector<8x512xf32>
    %70 = arith.addf %68, %69 : vector<8x512xf32>
    %71 = vector.extract_strided_slice %70 {offsets = [0, 0], sizes = [8, 128], strides = [1, 1]} : vector<8x512xf32> to vector<8x128xf32>
    %72 = arith.negf %71 : vector<8x128xf32>
    %73 = math.exp %72 : vector<8x128xf32>
    %cst_36 = arith.constant 1.000000e+00 : f32
    %74 = vector.broadcast %cst_36 : f32 to vector<8x128xf32>
    %75 = arith.addf %74, %73 : vector<8x128xf32>
    %76 = arith.divf %74, %75 : vector<8x128xf32>
    %77 = vector.extract_strided_slice %70 {offsets = [0, 128], sizes = [8, 128], strides = [1, 1]} : vector<8x512xf32> to vector<8x128xf32>
    %78 = arith.negf %77 : vector<8x128xf32>
    %79 = math.exp %78 : vector<8x128xf32>
    %cst_37 = arith.constant 1.000000e+00 : f32
    %80 = vector.broadcast %cst_37 : f32 to vector<8x128xf32>
    %81 = arith.addf %80, %79 : vector<8x128xf32>
    %82 = arith.divf %80, %81 : vector<8x128xf32>
    %83 = vector.extract_strided_slice %70 {offsets = [0, 256], sizes = [8, 128], strides = [1, 1]} : vector<8x512xf32> to vector<8x128xf32>
    %84 = math.tanh %83 : vector<8x128xf32>
    %85 = vector.extract_strided_slice %70 {offsets = [0, 384], sizes = [8, 128], strides = [1, 1]} : vector<8x512xf32> to vector<8x128xf32>
    %86 = arith.negf %85 : vector<8x128xf32>
    %87 = math.exp %86 : vector<8x128xf32>
    %cst_38 = arith.constant 1.000000e+00 : f32
    %88 = vector.broadcast %cst_38 : f32 to vector<8x128xf32>
    %89 = arith.addf %88, %87 : vector<8x128xf32>
    %90 = arith.divf %88, %89 : vector<8x128xf32>
    %91 = arith.mulf %82, %47 : vector<8x128xf32>
    %92 = arith.mulf %76, %84 : vector<8x128xf32>
    %93 = arith.addf %91, %92 : vector<8x128xf32>
    %94 = math.tanh %93 : vector<8x128xf32>
    %95 = arith.mulf %90, %94 : vector<8x128xf32>
    %96 = vector.extract_strided_slice %95 {offsets = [0, 0], sizes = [8, 64], strides = [1, 1]} : vector<8x128xf32> to vector<8x64xf32>
    %97 = arith.index_cast %c1_i32 : i32 to index
    %c0_39 = arith.constant 0 : index
    %c0_40 = arith.constant 0 : index
    %98 = vector.load %arg11[%97, %c0_39, %c0_40] : memref<8x8x128xf32, #tpu.memory_space<vmem>>, vector<1x8x64xf32>
    %99 = vector.shape_cast %98 : vector<1x8x64xf32> to vector<8x64xf32>
    %100 = vector.shape_cast %96 : vector<8x64xf32> to vector<1x8x64xf32>
    tpu.vector_store %arg11[%97, %c0_39, %c0_40], %100 {strides = array<i32>} : memref<8x8x128xf32, #tpu.memory_space<vmem>>, vector<1x8x64xf32>,
    %101 = vector.extract_strided_slice %95 {offsets = [0, 64], sizes = [8, 64], strides = [1, 1]} : vector<8x128xf32> to vector<8x64xf32>
    %c7_i32_41 = arith.constant 7 : i32
    %102 = arith.subi %c7_i32_41, %c1_i32 : i32
    %103 = arith.index_cast %102 : i32 to index
    %c0_42 = arith.constant 0 : index
    %c64_43 = arith.constant 64 : index
    %104 = vector.load %arg11[%103, %c0_42, %c64_43] : memref<8x8x128xf32, #tpu.memory_space<vmem>>, vector<1x8x64xf32>
    %105 = vector.shape_cast %104 : vector<1x8x64xf32> to vector<8x64xf32>
    %106 = vector.shape_cast %101 : vector<8x64xf32> to vector<1x8x64xf32>
    tpu.vector_store %arg11[%103, %c0_42, %c64_43], %106 {strides = array<i32>} : memref<8x8x128xf32, #tpu.memory_space<vmem>>, vector<1x8x64xf32>,
    %c2_i32 = arith.constant 2 : i32
    %107 = arith.index_cast %c2_i32 : i32 to index
    %c0_44 = arith.constant 0 : index
    %c0_45 = arith.constant 0 : index
    %108 = vector.load %arg12[%107, %c0_44, %c0_45] : memref<8x8x512xf32, #tpu.memory_space<vmem>>, vector<1x8x512xf32>
    %109 = vector.shape_cast %108 : vector<1x8x512xf32> to vector<8x512xf32>
    %c7_i32_46 = arith.constant 7 : i32
    %110 = arith.subi %c7_i32_46, %c2_i32 : i32
    %111 = arith.index_cast %110 : i32 to index
    %c0_47 = arith.constant 0 : index
    %c0_48 = arith.constant 0 : index
    %112 = vector.load %arg13[%111, %c0_47, %c0_48] : memref<8x8x512xf32, #tpu.memory_space<vmem>>, vector<1x8x512xf32>
    %113 = vector.shape_cast %112 : vector<1x8x512xf32> to vector<8x512xf32>
    %114 = arith.addf %109, %113 : vector<8x512xf32>
    %cst_49 = arith.constant dense<0.000000e+00> : vector<8x512xf32>
    %115 = tpu.matmul %95, %13, %cst_49 {dimension_numbers = #tpu.dot_dimension_numbers<[1], [0], [0], [1], [0, 0, 1, 1], [], []>} : vector<8x128xf32>, vector<128x512xf32>, vector<8x512xf32> -> vector<8x512xf32>
    %116 = arith.addf %114, %115 : vector<8x512xf32>
    %117 = vector.extract_strided_slice %116 {offsets = [0, 0], sizes = [8, 128], strides = [1, 1]} : vector<8x512xf32> to vector<8x128xf32>
    %118 = arith.negf %117 : vector<8x128xf32>
    %119 = math.exp %118 : vector<8x128xf32>
    %cst_50 = arith.constant 1.000000e+00 : f32
    %120 = vector.broadcast %cst_50 : f32 to vector<8x128xf32>
    %121 = arith.addf %120, %119 : vector<8x128xf32>
    %122 = arith.divf %120, %121 : vector<8x128xf32>
    %123 = vector.extract_strided_slice %116 {offsets = [0, 128], sizes = [8, 128], strides = [1, 1]} : vector<8x512xf32> to vector<8x128xf32>
    %124 = arith.negf %123 : vector<8x128xf32>
    %125 = math.exp %124 : vector<8x128xf32>
    %cst_51 = arith.constant 1.000000e+00 : f32
    %126 = vector.broadcast %cst_51 : f32 to vector<8x128xf32>
    %127 = arith.addf %126, %125 : vector<8x128xf32>
    %128 = arith.divf %126, %127 : vector<8x128xf32>
    %129 = vector.extract_strided_slice %116 {offsets = [0, 256], sizes = [8, 128], strides = [1, 1]} : vector<8x512xf32> to vector<8x128xf32>
    %130 = math.tanh %129 : vector<8x128xf32>
    %131 = vector.extract_strided_slice %116 {offsets = [0, 384], sizes = [8, 128], strides = [1, 1]} : vector<8x512xf32> to vector<8x128xf32>
    %132 = arith.negf %131 : vector<8x128xf32>
    %133 = math.exp %132 : vector<8x128xf32>
    %cst_52 = arith.constant 1.000000e+00 : f32
    %134 = vector.broadcast %cst_52 : f32 to vector<8x128xf32>
    %135 = arith.addf %134, %133 : vector<8x128xf32>
    %136 = arith.divf %134, %135 : vector<8x128xf32>
    %137 = arith.mulf %128, %93 : vector<8x128xf32>
    %138 = arith.mulf %122, %130 : vector<8x128xf32>
    %139 = arith.addf %137, %138 : vector<8x128xf32>
    %140 = math.tanh %139 : vector<8x128xf32>
    %141 = arith.mulf %136, %140 : vector<8x128xf32>
    %142 = vector.extract_strided_slice %141 {offsets = [0, 0], sizes = [8, 64], strides = [1, 1]} : vector<8x128xf32> to vector<8x64xf32>
    %143 = arith.index_cast %c2_i32 : i32 to index
    %c0_53 = arith.constant 0 : index
    %c0_54 = arith.constant 0 : index
    %144 = vector.load %arg11[%143, %c0_53, %c0_54] : memref<8x8x128xf32, #tpu.memory_space<vmem>>, vector<1x8x64xf32>
    %145 = vector.shape_cast %144 : vector<1x8x64xf32> to vector<8x64xf32>
    %146 = vector.shape_cast %142 : vector<8x64xf32> to vector<1x8x64xf32>
    tpu.vector_store %arg11[%143, %c0_53, %c0_54], %146 {strides = array<i32>} : memref<8x8x128xf32, #tpu.memory_space<vmem>>, vector<1x8x64xf32>,
    %147 = vector.extract_strided_slice %141 {offsets = [0, 64], sizes = [8, 64], strides = [1, 1]} : vector<8x128xf32> to vector<8x64xf32>
    %c7_i32_55 = arith.constant 7 : i32
    %148 = arith.subi %c7_i32_55, %c2_i32 : i32
    %149 = arith.index_cast %148 : i32 to index
    %c0_56 = arith.constant 0 : index
    %c64_57 = arith.constant 64 : index
    %150 = vector.load %arg11[%149, %c0_56, %c64_57] : memref<8x8x128xf32, #tpu.memory_space<vmem>>, vector<1x8x64xf32>
    %151 = vector.shape_cast %150 : vector<1x8x64xf32> to vector<8x64xf32>
    %152 = vector.shape_cast %147 : vector<8x64xf32> to vector<1x8x64xf32>
    tpu.vector_store %arg11[%149, %c0_56, %c64_57], %152 {strides = array<i32>} : memref<8x8x128xf32, #tpu.memory_space<vmem>>, vector<1x8x64xf32>,
    %c3_i32 = arith.constant 3 : i32
    %153 = arith.index_cast %c3_i32 : i32 to index
    %c0_58 = arith.constant 0 : index
    %c0_59 = arith.constant 0 : index
    %154 = vector.load %arg12[%153, %c0_58, %c0_59] : memref<8x8x512xf32, #tpu.memory_space<vmem>>, vector<1x8x512xf32>
    %155 = vector.shape_cast %154 : vector<1x8x512xf32> to vector<8x512xf32>
    %c7_i32_60 = arith.constant 7 : i32
    %156 = arith.subi %c7_i32_60, %c3_i32 : i32
    %157 = arith.index_cast %156 : i32 to index
    %c0_61 = arith.constant 0 : index
    %c0_62 = arith.constant 0 : index
    %158 = vector.load %arg13[%157, %c0_61, %c0_62] : memref<8x8x512xf32, #tpu.memory_space<vmem>>, vector<1x8x512xf32>
    %159 = vector.shape_cast %158 : vector<1x8x512xf32> to vector<8x512xf32>
    %160 = arith.addf %155, %159 : vector<8x512xf32>
    %cst_63 = arith.constant dense<0.000000e+00> : vector<8x512xf32>
    %161 = tpu.matmul %141, %13, %cst_63 {dimension_numbers = #tpu.dot_dimension_numbers<[1], [0], [0], [1], [0, 0, 1, 1], [], []>} : vector<8x128xf32>, vector<128x512xf32>, vector<8x512xf32> -> vector<8x512xf32>
    %162 = arith.addf %160, %161 : vector<8x512xf32>
    %163 = vector.extract_strided_slice %162 {offsets = [0, 0], sizes = [8, 128], strides = [1, 1]} : vector<8x512xf32> to vector<8x128xf32>
    %164 = arith.negf %163 : vector<8x128xf32>
    %165 = math.exp %164 : vector<8x128xf32>
    %cst_64 = arith.constant 1.000000e+00 : f32
    %166 = vector.broadcast %cst_64 : f32 to vector<8x128xf32>
    %167 = arith.addf %166, %165 : vector<8x128xf32>
    %168 = arith.divf %166, %167 : vector<8x128xf32>
    %169 = vector.extract_strided_slice %162 {offsets = [0, 128], sizes = [8, 128], strides = [1, 1]} : vector<8x512xf32> to vector<8x128xf32>
    %170 = arith.negf %169 : vector<8x128xf32>
    %171 = math.exp %170 : vector<8x128xf32>
    %cst_65 = arith.constant 1.000000e+00 : f32
    %172 = vector.broadcast %cst_65 : f32 to vector<8x128xf32>
    %173 = arith.addf %172, %171 : vector<8x128xf32>
    %174 = arith.divf %172, %173 : vector<8x128xf32>
    %175 = vector.extract_strided_slice %162 {offsets = [0, 256], sizes = [8, 128], strides = [1, 1]} : vector<8x512xf32> to vector<8x128xf32>
    %176 = math.tanh %175 : vector<8x128xf32>
    %177 = vector.extract_strided_slice %162 {offsets = [0, 384], sizes = [8, 128], strides = [1, 1]} : vector<8x512xf32> to vector<8x128xf32>
    %178 = arith.negf %177 : vector<8x128xf32>
    %179 = math.exp %178 : vector<8x128xf32>
    %cst_66 = arith.constant 1.000000e+00 : f32
    %180 = vector.broadcast %cst_66 : f32 to vector<8x128xf32>
    %181 = arith.addf %180, %179 : vector<8x128xf32>
    %182 = arith.divf %180, %181 : vector<8x128xf32>
    %183 = arith.mulf %174, %139 : vector<8x128xf32>
    %184 = arith.mulf %168, %176 : vector<8x128xf32>
    %185 = arith.addf %183, %184 : vector<8x128xf32>
    %186 = math.tanh %185 : vector<8x128xf32>
    %187 = arith.mulf %182, %186 : vector<8x128xf32>
    %188 = vector.extract_strided_slice %187 {offsets = [0, 0], sizes = [8, 64], strides = [1, 1]} : vector<8x128xf32> to vector<8x64xf32>
    %189 = arith.index_cast %c3_i32 : i32 to index
    %c0_67 = arith.constant 0 : index
    %c0_68 = arith.constant 0 : index
    %190 = vector.load %arg11[%189, %c0_67, %c0_68] : memref<8x8x128xf32, #tpu.memory_space<vmem>>, vector<1x8x64xf32>
    %191 = vector.shape_cast %190 : vector<1x8x64xf32> to vector<8x64xf32>
    %192 = vector.shape_cast %188 : vector<8x64xf32> to vector<1x8x64xf32>
    tpu.vector_store %arg11[%189, %c0_67, %c0_68], %192 {strides = array<i32>} : memref<8x8x128xf32, #tpu.memory_space<vmem>>, vector<1x8x64xf32>,
    %193 = vector.extract_strided_slice %187 {offsets = [0, 64], sizes = [8, 64], strides = [1, 1]} : vector<8x128xf32> to vector<8x64xf32>
    %c7_i32_69 = arith.constant 7 : i32
    %194 = arith.subi %c7_i32_69, %c3_i32 : i32
    %195 = arith.index_cast %194 : i32 to index
    %c0_70 = arith.constant 0 : index
    %c64_71 = arith.constant 64 : index
    %196 = vector.load %arg11[%195, %c0_70, %c64_71] : memref<8x8x128xf32, #tpu.memory_space<vmem>>, vector<1x8x64xf32>
    %197 = vector.shape_cast %196 : vector<1x8x64xf32> to vector<8x64xf32>
    %198 = vector.shape_cast %193 : vector<8x64xf32> to vector<1x8x64xf32>
    tpu.vector_store %arg11[%195, %c0_70, %c64_71], %198 {strides = array<i32>} : memref<8x8x128xf32, #tpu.memory_space<vmem>>, vector<1x8x64xf32>,
    %c4_i32 = arith.constant 4 : i32
    %199 = arith.index_cast %c4_i32 : i32 to index
    %c0_72 = arith.constant 0 : index
    %c0_73 = arith.constant 0 : index
    %200 = vector.load %arg12[%199, %c0_72, %c0_73] : memref<8x8x512xf32, #tpu.memory_space<vmem>>, vector<1x8x512xf32>
    %201 = vector.shape_cast %200 : vector<1x8x512xf32> to vector<8x512xf32>
    %c7_i32_74 = arith.constant 7 : i32
    %202 = arith.subi %c7_i32_74, %c4_i32 : i32
    %203 = arith.index_cast %202 : i32 to index
    %c0_75 = arith.constant 0 : index
    %c0_76 = arith.constant 0 : index
    %204 = vector.load %arg13[%203, %c0_75, %c0_76] : memref<8x8x512xf32, #tpu.memory_space<vmem>>, vector<1x8x512xf32>
    %205 = vector.shape_cast %204 : vector<1x8x512xf32> to vector<8x512xf32>
    %206 = arith.addf %201, %205 : vector<8x512xf32>
    %cst_77 = arith.constant dense<0.000000e+00> : vector<8x512xf32>
    %207 = tpu.matmul %187, %13, %cst_77 {dimension_numbers = #tpu.dot_dimension_numbers<[1], [0], [0], [1], [0, 0, 1, 1], [], []>} : vector<8x128xf32>, vector<128x512xf32>, vector<8x512xf32> -> vector<8x512xf32>
    %208 = arith.addf %206, %207 : vector<8x512xf32>
    %209 = vector.extract_strided_slice %208 {offsets = [0, 0], sizes = [8, 128], strides = [1, 1]} : vector<8x512xf32> to vector<8x128xf32>
    %210 = arith.negf %209 : vector<8x128xf32>
    %211 = math.exp %210 : vector<8x128xf32>
    %cst_78 = arith.constant 1.000000e+00 : f32
    %212 = vector.broadcast %cst_78 : f32 to vector<8x128xf32>
    %213 = arith.addf %212, %211 : vector<8x128xf32>
    %214 = arith.divf %212, %213 : vector<8x128xf32>
    %215 = vector.extract_strided_slice %208 {offsets = [0, 128], sizes = [8, 128], strides = [1, 1]} : vector<8x512xf32> to vector<8x128xf32>
    %216 = arith.negf %215 : vector<8x128xf32>
    %217 = math.exp %216 : vector<8x128xf32>
    %cst_79 = arith.constant 1.000000e+00 : f32
    %218 = vector.broadcast %cst_79 : f32 to vector<8x128xf32>
    %219 = arith.addf %218, %217 : vector<8x128xf32>
    %220 = arith.divf %218, %219 : vector<8x128xf32>
    %221 = vector.extract_strided_slice %208 {offsets = [0, 256], sizes = [8, 128], strides = [1, 1]} : vector<8x512xf32> to vector<8x128xf32>
    %222 = math.tanh %221 : vector<8x128xf32>
    %223 = vector.extract_strided_slice %208 {offsets = [0, 384], sizes = [8, 128], strides = [1, 1]} : vector<8x512xf32> to vector<8x128xf32>
    %224 = arith.negf %223 : vector<8x128xf32>
    %225 = math.exp %224 : vector<8x128xf32>
    %cst_80 = arith.constant 1.000000e+00 : f32
    %226 = vector.broadcast %cst_80 : f32 to vector<8x128xf32>
    %227 = arith.addf %226, %225 : vector<8x128xf32>
    %228 = arith.divf %226, %227 : vector<8x128xf32>
    %229 = arith.mulf %220, %185 : vector<8x128xf32>
    %230 = arith.mulf %214, %222 : vector<8x128xf32>
    %231 = arith.addf %229, %230 : vector<8x128xf32>
    %232 = math.tanh %231 : vector<8x128xf32>
    %233 = arith.mulf %228, %232 : vector<8x128xf32>
    %234 = vector.extract_strided_slice %233 {offsets = [0, 0], sizes = [8, 64], strides = [1, 1]} : vector<8x128xf32> to vector<8x64xf32>
    %235 = arith.index_cast %c4_i32 : i32 to index
    %c0_81 = arith.constant 0 : index
    %c0_82 = arith.constant 0 : index
    %236 = vector.load %arg11[%235, %c0_81, %c0_82] : memref<8x8x128xf32, #tpu.memory_space<vmem>>, vector<1x8x64xf32>
    %237 = vector.shape_cast %236 : vector<1x8x64xf32> to vector<8x64xf32>
    %238 = vector.shape_cast %234 : vector<8x64xf32> to vector<1x8x64xf32>
    tpu.vector_store %arg11[%235, %c0_81, %c0_82], %238 {strides = array<i32>} : memref<8x8x128xf32, #tpu.memory_space<vmem>>, vector<1x8x64xf32>,
    %239 = vector.extract_strided_slice %233 {offsets = [0, 64], sizes = [8, 64], strides = [1, 1]} : vector<8x128xf32> to vector<8x64xf32>
    %c7_i32_83 = arith.constant 7 : i32
    %240 = arith.subi %c7_i32_83, %c4_i32 : i32
    %241 = arith.index_cast %240 : i32 to index
    %c0_84 = arith.constant 0 : index
    %c64_85 = arith.constant 64 : index
    %242 = vector.load %arg11[%241, %c0_84, %c64_85] : memref<8x8x128xf32, #tpu.memory_space<vmem>>, vector<1x8x64xf32>
    %243 = vector.shape_cast %242 : vector<1x8x64xf32> to vector<8x64xf32>
    %244 = vector.shape_cast %239 : vector<8x64xf32> to vector<1x8x64xf32>
    tpu.vector_store %arg11[%241, %c0_84, %c64_85], %244 {strides = array<i32>} : memref<8x8x128xf32, #tpu.memory_space<vmem>>, vector<1x8x64xf32>,
    %c5_i32 = arith.constant 5 : i32
    %245 = arith.index_cast %c5_i32 : i32 to index
    %c0_86 = arith.constant 0 : index
    %c0_87 = arith.constant 0 : index
    %246 = vector.load %arg12[%245, %c0_86, %c0_87] : memref<8x8x512xf32, #tpu.memory_space<vmem>>, vector<1x8x512xf32>
    %247 = vector.shape_cast %246 : vector<1x8x512xf32> to vector<8x512xf32>
    %c7_i32_88 = arith.constant 7 : i32
    %248 = arith.subi %c7_i32_88, %c5_i32 : i32
    %249 = arith.index_cast %248 : i32 to index
    %c0_89 = arith.constant 0 : index
    %c0_90 = arith.constant 0 : index
    %250 = vector.load %arg13[%249, %c0_89, %c0_90] : memref<8x8x512xf32, #tpu.memory_space<vmem>>, vector<1x8x512xf32>
    %251 = vector.shape_cast %250 : vector<1x8x512xf32> to vector<8x512xf32>
    %252 = arith.addf %247, %251 : vector<8x512xf32>
    %cst_91 = arith.constant dense<0.000000e+00> : vector<8x512xf32>
    %253 = tpu.matmul %233, %13, %cst_91 {dimension_numbers = #tpu.dot_dimension_numbers<[1], [0], [0], [1], [0, 0, 1, 1], [], []>} : vector<8x128xf32>, vector<128x512xf32>, vector<8x512xf32> -> vector<8x512xf32>
    %254 = arith.addf %252, %253 : vector<8x512xf32>
    %255 = vector.extract_strided_slice %254 {offsets = [0, 0], sizes = [8, 128], strides = [1, 1]} : vector<8x512xf32> to vector<8x128xf32>
    %256 = arith.negf %255 : vector<8x128xf32>
    %257 = math.exp %256 : vector<8x128xf32>
    %cst_92 = arith.constant 1.000000e+00 : f32
    %258 = vector.broadcast %cst_92 : f32 to vector<8x128xf32>
    %259 = arith.addf %258, %257 : vector<8x128xf32>
    %260 = arith.divf %258, %259 : vector<8x128xf32>
    %261 = vector.extract_strided_slice %254 {offsets = [0, 128], sizes = [8, 128], strides = [1, 1]} : vector<8x512xf32> to vector<8x128xf32>
    %262 = arith.negf %261 : vector<8x128xf32>
    %263 = math.exp %262 : vector<8x128xf32>
    %cst_93 = arith.constant 1.000000e+00 : f32
    %264 = vector.broadcast %cst_93 : f32 to vector<8x128xf32>
    %265 = arith.addf %264, %263 : vector<8x128xf32>
    %266 = arith.divf %264, %265 : vector<8x128xf32>
    %267 = vector.extract_strided_slice %254 {offsets = [0, 256], sizes = [8, 128], strides = [1, 1]} : vector<8x512xf32> to vector<8x128xf32>
    %268 = math.tanh %267 : vector<8x128xf32>
    %269 = vector.extract_strided_slice %254 {offsets = [0, 384], sizes = [8, 128], strides = [1, 1]} : vector<8x512xf32> to vector<8x128xf32>
    %270 = arith.negf %269 : vector<8x128xf32>
    %271 = math.exp %270 : vector<8x128xf32>
    %cst_94 = arith.constant 1.000000e+00 : f32
    %272 = vector.broadcast %cst_94 : f32 to vector<8x128xf32>
    %273 = arith.addf %272, %271 : vector<8x128xf32>
    %274 = arith.divf %272, %273 : vector<8x128xf32>
    %275 = arith.mulf %266, %231 : vector<8x128xf32>
    %276 = arith.mulf %260, %268 : vector<8x128xf32>
    %277 = arith.addf %275, %276 : vector<8x128xf32>
    %278 = math.tanh %277 : vector<8x128xf32>
    %279 = arith.mulf %274, %278 : vector<8x128xf32>
    %280 = vector.extract_strided_slice %279 {offsets = [0, 0], sizes = [8, 64], strides = [1, 1]} : vector<8x128xf32> to vector<8x64xf32>
    %281 = arith.index_cast %c5_i32 : i32 to index
    %c0_95 = arith.constant 0 : index
    %c0_96 = arith.constant 0 : index
    %282 = vector.load %arg11[%281, %c0_95, %c0_96] : memref<8x8x128xf32, #tpu.memory_space<vmem>>, vector<1x8x64xf32>
    %283 = vector.shape_cast %282 : vector<1x8x64xf32> to vector<8x64xf32>
    %284 = vector.shape_cast %280 : vector<8x64xf32> to vector<1x8x64xf32>
    tpu.vector_store %arg11[%281, %c0_95, %c0_96], %284 {strides = array<i32>} : memref<8x8x128xf32, #tpu.memory_space<vmem>>, vector<1x8x64xf32>,
    %285 = vector.extract_strided_slice %279 {offsets = [0, 64], sizes = [8, 64], strides = [1, 1]} : vector<8x128xf32> to vector<8x64xf32>
    %c7_i32_97 = arith.constant 7 : i32
    %286 = arith.subi %c7_i32_97, %c5_i32 : i32
    %287 = arith.index_cast %286 : i32 to index
    %c0_98 = arith.constant 0 : index
    %c64_99 = arith.constant 64 : index
    %288 = vector.load %arg11[%287, %c0_98, %c64_99] : memref<8x8x128xf32, #tpu.memory_space<vmem>>, vector<1x8x64xf32>
    %289 = vector.shape_cast %288 : vector<1x8x64xf32> to vector<8x64xf32>
    %290 = vector.shape_cast %285 : vector<8x64xf32> to vector<1x8x64xf32>
    tpu.vector_store %arg11[%287, %c0_98, %c64_99], %290 {strides = array<i32>} : memref<8x8x128xf32, #tpu.memory_space<vmem>>, vector<1x8x64xf32>,
    %c6_i32 = arith.constant 6 : i32
    %291 = arith.index_cast %c6_i32 : i32 to index
    %c0_100 = arith.constant 0 : index
    %c0_101 = arith.constant 0 : index
    %292 = vector.load %arg12[%291, %c0_100, %c0_101] : memref<8x8x512xf32, #tpu.memory_space<vmem>>, vector<1x8x512xf32>
    %293 = vector.shape_cast %292 : vector<1x8x512xf32> to vector<8x512xf32>
    %c7_i32_102 = arith.constant 7 : i32
    %294 = arith.subi %c7_i32_102, %c6_i32 : i32
    %295 = arith.index_cast %294 : i32 to index
    %c0_103 = arith.constant 0 : index
    %c0_104 = arith.constant 0 : index
    %296 = vector.load %arg13[%295, %c0_103, %c0_104] : memref<8x8x512xf32, #tpu.memory_space<vmem>>, vector<1x8x512xf32>
    %297 = vector.shape_cast %296 : vector<1x8x512xf32> to vector<8x512xf32>
    %298 = arith.addf %293, %297 : vector<8x512xf32>
    %cst_105 = arith.constant dense<0.000000e+00> : vector<8x512xf32>
    %299 = tpu.matmul %279, %13, %cst_105 {dimension_numbers = #tpu.dot_dimension_numbers<[1], [0], [0], [1], [0, 0, 1, 1], [], []>} : vector<8x128xf32>, vector<128x512xf32>, vector<8x512xf32> -> vector<8x512xf32>
    %300 = arith.addf %298, %299 : vector<8x512xf32>
    %301 = vector.extract_strided_slice %300 {offsets = [0, 0], sizes = [8, 128], strides = [1, 1]} : vector<8x512xf32> to vector<8x128xf32>
    %302 = arith.negf %301 : vector<8x128xf32>
    %303 = math.exp %302 : vector<8x128xf32>
    %cst_106 = arith.constant 1.000000e+00 : f32
    %304 = vector.broadcast %cst_106 : f32 to vector<8x128xf32>
    %305 = arith.addf %304, %303 : vector<8x128xf32>
    %306 = arith.divf %304, %305 : vector<8x128xf32>
    %307 = vector.extract_strided_slice %300 {offsets = [0, 128], sizes = [8, 128], strides = [1, 1]} : vector<8x512xf32> to vector<8x128xf32>
    %308 = arith.negf %307 : vector<8x128xf32>
    %309 = math.exp %308 : vector<8x128xf32>
    %cst_107 = arith.constant 1.000000e+00 : f32
    %310 = vector.broadcast %cst_107 : f32 to vector<8x128xf32>
    %311 = arith.addf %310, %309 : vector<8x128xf32>
    %312 = arith.divf %310, %311 : vector<8x128xf32>
    %313 = vector.extract_strided_slice %300 {offsets = [0, 256], sizes = [8, 128], strides = [1, 1]} : vector<8x512xf32> to vector<8x128xf32>
    %314 = math.tanh %313 : vector<8x128xf32>
    %315 = vector.extract_strided_slice %300 {offsets = [0, 384], sizes = [8, 128], strides = [1, 1]} : vector<8x512xf32> to vector<8x128xf32>
    %316 = arith.negf %315 : vector<8x128xf32>
    %317 = math.exp %316 : vector<8x128xf32>
    %cst_108 = arith.constant 1.000000e+00 : f32
    %318 = vector.broadcast %cst_108 : f32 to vector<8x128xf32>
    %319 = arith.addf %318, %317 : vector<8x128xf32>
    %320 = arith.divf %318, %319 : vector<8x128xf32>
    %321 = arith.mulf %312, %277 : vector<8x128xf32>
    %322 = arith.mulf %306, %314 : vector<8x128xf32>
    %323 = arith.addf %321, %322 : vector<8x128xf32>
    %324 = math.tanh %323 : vector<8x128xf32>
    %325 = arith.mulf %320, %324 : vector<8x128xf32>
    %326 = vector.extract_strided_slice %325 {offsets = [0, 0], sizes = [8, 64], strides = [1, 1]} : vector<8x128xf32> to vector<8x64xf32>
    %327 = arith.index_cast %c6_i32 : i32 to index
    %c0_109 = arith.constant 0 : index
    %c0_110 = arith.constant 0 : index
    %328 = vector.load %arg11[%327, %c0_109, %c0_110] : memref<8x8x128xf32, #tpu.memory_space<vmem>>, vector<1x8x64xf32>
    %329 = vector.shape_cast %328 : vector<1x8x64xf32> to vector<8x64xf32>
    %330 = vector.shape_cast %326 : vector<8x64xf32> to vector<1x8x64xf32>
    tpu.vector_store %arg11[%327, %c0_109, %c0_110], %330 {strides = array<i32>} : memref<8x8x128xf32, #tpu.memory_space<vmem>>, vector<1x8x64xf32>,
    %331 = vector.extract_strided_slice %325 {offsets = [0, 64], sizes = [8, 64], strides = [1, 1]} : vector<8x128xf32> to vector<8x64xf32>
    %c7_i32_111 = arith.constant 7 : i32
    %332 = arith.subi %c7_i32_111, %c6_i32 : i32
    %333 = arith.index_cast %332 : i32 to index
    %c0_112 = arith.constant 0 : index
    %c64_113 = arith.constant 64 : index
    %334 = vector.load %arg11[%333, %c0_112, %c64_113] : memref<8x8x128xf32, #tpu.memory_space<vmem>>, vector<1x8x64xf32>
    %335 = vector.shape_cast %334 : vector<1x8x64xf32> to vector<8x64xf32>
    %336 = vector.shape_cast %331 : vector<8x64xf32> to vector<1x8x64xf32>
    tpu.vector_store %arg11[%333, %c0_112, %c64_113], %336 {strides = array<i32>} : memref<8x8x128xf32, #tpu.memory_space<vmem>>, vector<1x8x64xf32>,
    %c7_i32_114 = arith.constant 7 : i32
    %337 = arith.index_cast %c7_i32_114 : i32 to index
    %c0_115 = arith.constant 0 : index
    %c0_116 = arith.constant 0 : index
    %338 = vector.load %arg12[%337, %c0_115, %c0_116] : memref<8x8x512xf32, #tpu.memory_space<vmem>>, vector<1x8x512xf32>
    %339 = vector.shape_cast %338 : vector<1x8x512xf32> to vector<8x512xf32>
    %c7_i32_117 = arith.constant 7 : i32
    %340 = arith.subi %c7_i32_117, %c7_i32_114 : i32
    %341 = arith.index_cast %340 : i32 to index
    %c0_118 = arith.constant 0 : index
    %c0_119 = arith.constant 0 : index
    %342 = vector.load %arg13[%341, %c0_118, %c0_119] : memref<8x8x512xf32, #tpu.memory_space<vmem>>, vector<1x8x512xf32>
    %343 = vector.shape_cast %342 : vector<1x8x512xf32> to vector<8x512xf32>
    %344 = arith.addf %339, %343 : vector<8x512xf32>
    %cst_120 = arith.constant dense<0.000000e+00> : vector<8x512xf32>
    %345 = tpu.matmul %325, %13, %cst_120 {dimension_numbers = #tpu.dot_dimension_numbers<[1], [0], [0], [1], [0, 0, 1, 1], [], []>} : vector<8x128xf32>, vector<128x512xf32>, vector<8x512xf32> -> vector<8x512xf32>
    %346 = arith.addf %344, %345 : vector<8x512xf32>
    %347 = vector.extract_strided_slice %346 {offsets = [0, 0], sizes = [8, 128], strides = [1, 1]} : vector<8x512xf32> to vector<8x128xf32>
    %348 = arith.negf %347 : vector<8x128xf32>
    %349 = math.exp %348 : vector<8x128xf32>
    %cst_121 = arith.constant 1.000000e+00 : f32
    %350 = vector.broadcast %cst_121 : f32 to vector<8x128xf32>
    %351 = arith.addf %350, %349 : vector<8x128xf32>
    %352 = arith.divf %350, %351 : vector<8x128xf32>
    %353 = vector.extract_strided_slice %346 {offsets = [0, 128], sizes = [8, 128], strides = [1, 1]} : vector<8x512xf32> to vector<8x128xf32>
    %354 = arith.negf %353 : vector<8x128xf32>
    %355 = math.exp %354 : vector<8x128xf32>
    %cst_122 = arith.constant 1.000000e+00 : f32
    %356 = vector.broadcast %cst_122 : f32 to vector<8x128xf32>
    %357 = arith.addf %356, %355 : vector<8x128xf32>
    %358 = arith.divf %356, %357 : vector<8x128xf32>
    %359 = vector.extract_strided_slice %346 {offsets = [0, 256], sizes = [8, 128], strides = [1, 1]} : vector<8x512xf32> to vector<8x128xf32>
    %360 = math.tanh %359 : vector<8x128xf32>
    %361 = vector.extract_strided_slice %346 {offsets = [0, 384], sizes = [8, 128], strides = [1, 1]} : vector<8x512xf32> to vector<8x128xf32>
    %362 = arith.negf %361 : vector<8x128xf32>
    %363 = math.exp %362 : vector<8x128xf32>
    %cst_123 = arith.constant 1.000000e+00 : f32
    %364 = vector.broadcast %cst_123 : f32 to vector<8x128xf32>
    %365 = arith.addf %364, %363 : vector<8x128xf32>
    %366 = arith.divf %364, %365 : vector<8x128xf32>
    %367 = arith.mulf %358, %323 : vector<8x128xf32>
    %368 = arith.mulf %352, %360 : vector<8x128xf32>
    %369 = arith.addf %367, %368 : vector<8x128xf32>
    %370 = math.tanh %369 : vector<8x128xf32>
    %371 = arith.mulf %366, %370 : vector<8x128xf32>
    %372 = vector.extract_strided_slice %371 {offsets = [0, 0], sizes = [8, 64], strides = [1, 1]} : vector<8x128xf32> to vector<8x64xf32>
    %373 = arith.index_cast %c7_i32_114 : i32 to index
    %c0_124 = arith.constant 0 : index
    %c0_125 = arith.constant 0 : index
    %374 = vector.load %arg11[%373, %c0_124, %c0_125] : memref<8x8x128xf32, #tpu.memory_space<vmem>>, vector<1x8x64xf32>
    %375 = vector.shape_cast %374 : vector<1x8x64xf32> to vector<8x64xf32>
    %376 = vector.shape_cast %372 : vector<8x64xf32> to vector<1x8x64xf32>
    tpu.vector_store %arg11[%373, %c0_124, %c0_125], %376 {strides = array<i32>} : memref<8x8x128xf32, #tpu.memory_space<vmem>>, vector<1x8x64xf32>,
    %377 = vector.extract_strided_slice %371 {offsets = [0, 64], sizes = [8, 64], strides = [1, 1]} : vector<8x128xf32> to vector<8x64xf32>
    %c7_i32_126 = arith.constant 7 : i32
    %378 = arith.subi %c7_i32_126, %c7_i32_114 : i32
    %379 = arith.index_cast %378 : i32 to index
    %c0_127 = arith.constant 0 : index
    %c64_128 = arith.constant 64 : index
    %380 = vector.load %arg11[%379, %c0_127, %c64_128] : memref<8x8x128xf32, #tpu.memory_space<vmem>>, vector<1x8x64xf32>
    %381 = vector.shape_cast %380 : vector<1x8x64xf32> to vector<8x64xf32>
    %382 = vector.shape_cast %377 : vector<8x64xf32> to vector<1x8x64xf32>
    tpu.vector_store %arg11[%379, %c0_127, %c64_128], %382 {strides = array<i32>} : memref<8x8x128xf32, #tpu.memory_space<vmem>>, vector<1x8x64xf32>,
    %c8_i32 = arith.constant 8 : i32
    %c0_129 = arith.constant 0 : index
    %c0_130 = arith.constant 0 : index
    %c0_131 = arith.constant 0 : index
    %383 = vector.load %arg11[%c0_129, %c0_130, %c0_131] : memref<8x8x128xf32, #tpu.memory_space<vmem>>, vector<8x8x128xf32>
    %384 = vector.shape_cast %383 : vector<8x8x128xf32> to vector<64x128xf32>
    %c0_132 = arith.constant 0 : index
    %c0_133 = arith.constant 0 : index
    %385 = vector.load %arg5[%c0_132, %c0_133] : memref<128x512xf32, #tpu.memory_space<vmem>>, vector<128x512xf32>
    %cst_134 = arith.constant dense<0.000000e+00> : vector<64x512xf32>
    %386 = tpu.matmul %384, %385, %cst_134 {dimension_numbers = #tpu.dot_dimension_numbers<[1], [0], [0], [1], [0, 0, 1, 1], [], []>} : vector<64x128xf32>, vector<128x512xf32>, vector<64x512xf32> -> vector<64x512xf32>
    %c0_135 = arith.constant 0 : index
    %c0_136 = arith.constant 0 : index
    %387 = vector.load %arg7[%c0_135, %c0_136] : memref<1x512xf32, #tpu.memory_space<vmem>>, vector<1x512xf32>
    %388 = vector.broadcast %387 : vector<1x512xf32> to vector<64x512xf32>
    %389 = arith.addf %386, %388 : vector<64x512xf32>
    %390 = vector.shape_cast %389 : vector<64x512xf32> to vector<8x8x512xf32>
    %c0_137 = arith.constant 0 : index
    %c0_138 = arith.constant 0 : index
    %c0_139 = arith.constant 0 : index
    %391 = vector.load %arg12[%c0_137, %c0_138, %c0_139] : memref<8x8x512xf32, #tpu.memory_space<vmem>>, vector<8x8x512xf32>
    tpu.vector_store %arg12[%c0_137, %c0_138, %c0_139], %390 {strides = array<i32>} : memref<8x8x512xf32, #tpu.memory_space<vmem>>, vector<8x8x512xf32>,
    %c0_140 = arith.constant 0 : index
    %c0_141 = arith.constant 0 : index
    %392 = vector.load %arg6[%c0_140, %c0_141] : memref<128x512xf32, #tpu.memory_space<vmem>>, vector<128x512xf32>
    %cst_142 = arith.constant dense<0.000000e+00> : vector<64x512xf32>
    %393 = tpu.matmul %384, %392, %cst_142 {dimension_numbers = #tpu.dot_dimension_numbers<[1], [0], [0], [1], [0, 0, 1, 1], [], []>} : vector<64x128xf32>, vector<128x512xf32>, vector<64x512xf32> -> vector<64x512xf32>
    %394 = vector.shape_cast %393 : vector<64x512xf32> to vector<8x8x512xf32>
    %c0_143 = arith.constant 0 : index
    %c0_144 = arith.constant 0 : index
    %c0_145 = arith.constant 0 : index
    %395 = vector.load %arg13[%c0_143, %c0_144, %c0_145] : memref<8x8x512xf32, #tpu.memory_space<vmem>>, vector<8x8x512xf32>
    tpu.vector_store %arg13[%c0_143, %c0_144, %c0_145], %394 {strides = array<i32>} : memref<8x8x512xf32, #tpu.memory_space<vmem>>, vector<8x8x512xf32>,
    %c0_146 = arith.constant 0 : index
    %c0_147 = arith.constant 0 : index
    %396 = vector.load %arg8[%c0_146, %c0_147] : memref<128x512xf32, #tpu.memory_space<vmem>>, vector<128x512xf32>
    %cst_148 = arith.constant 0.000000e+00 : f32
    %397 = vector.broadcast %cst_148 : f32 to vector<8x128xf32>
    %c0_i32_149 = arith.constant 0 : i32
    %398 = arith.index_cast %c0_i32_149 : i32 to index
    %c0_150 = arith.constant 0 : index
    %c0_151 = arith.constant 0 : index
    %399 = vector.load %arg12[%398, %c0_150, %c0_151] : memref<8x8x512xf32, #tpu.memory_space<vmem>>, vector<1x8x512xf32>
    %400 = vector.shape_cast %399 : vector<1x8x512xf32> to vector<8x512xf32>
    %c7_i32_152 = arith.constant 7 : i32
    %401 = arith.subi %c7_i32_152, %c0_i32_149 : i32
    %402 = arith.index_cast %401 : i32 to index
    %c0_153 = arith.constant 0 : index
    %c0_154 = arith.constant 0 : index
    %403 = vector.load %arg13[%402, %c0_153, %c0_154] : memref<8x8x512xf32, #tpu.memory_space<vmem>>, vector<1x8x512xf32>
    %404 = vector.shape_cast %403 : vector<1x8x512xf32> to vector<8x512xf32>
    %405 = arith.addf %400, %404 : vector<8x512xf32>
    %cst_155 = arith.constant dense<0.000000e+00> : vector<8x512xf32>
    %406 = tpu.matmul %397, %396, %cst_155 {dimension_numbers = #tpu.dot_dimension_numbers<[1], [0], [0], [1], [0, 0, 1, 1], [], []>} : vector<8x128xf32>, vector<128x512xf32>, vector<8x512xf32> -> vector<8x512xf32>
    %407 = arith.addf %405, %406 : vector<8x512xf32>
    %408 = vector.extract_strided_slice %407 {offsets = [0, 0], sizes = [8, 128], strides = [1, 1]} : vector<8x512xf32> to vector<8x128xf32>
    %409 = arith.negf %408 : vector<8x128xf32>
    %410 = math.exp %409 : vector<8x128xf32>
    %cst_156 = arith.constant 1.000000e+00 : f32
    %411 = vector.broadcast %cst_156 : f32 to vector<8x128xf32>
    %412 = arith.addf %411, %410 : vector<8x128xf32>
    %413 = arith.divf %411, %412 : vector<8x128xf32>
    %414 = vector.extract_strided_slice %407 {offsets = [0, 128], sizes = [8, 128], strides = [1, 1]} : vector<8x512xf32> to vector<8x128xf32>
    %415 = arith.negf %414 : vector<8x128xf32>
    %416 = math.exp %415 : vector<8x128xf32>
    %cst_157 = arith.constant 1.000000e+00 : f32
    %417 = vector.broadcast %cst_157 : f32 to vector<8x128xf32>
    %418 = arith.addf %417, %416 : vector<8x128xf32>
    %419 = arith.divf %417, %418 : vector<8x128xf32>
    %420 = vector.extract_strided_slice %407 {offsets = [0, 256], sizes = [8, 128], strides = [1, 1]} : vector<8x512xf32> to vector<8x128xf32>
    %421 = math.tanh %420 : vector<8x128xf32>
    %422 = vector.extract_strided_slice %407 {offsets = [0, 384], sizes = [8, 128], strides = [1, 1]} : vector<8x512xf32> to vector<8x128xf32>
    %423 = arith.negf %422 : vector<8x128xf32>
    %424 = math.exp %423 : vector<8x128xf32>
    %cst_158 = arith.constant 1.000000e+00 : f32
    %425 = vector.broadcast %cst_158 : f32 to vector<8x128xf32>
    %426 = arith.addf %425, %424 : vector<8x128xf32>
    %427 = arith.divf %425, %426 : vector<8x128xf32>
    %428 = arith.mulf %419, %397 : vector<8x128xf32>
    %429 = arith.mulf %413, %421 : vector<8x128xf32>
    %430 = arith.addf %428, %429 : vector<8x128xf32>
    %431 = math.tanh %430 : vector<8x128xf32>
    %432 = arith.mulf %427, %431 : vector<8x128xf32>
    %433 = vector.extract_strided_slice %432 {offsets = [0, 0], sizes = [8, 64], strides = [1, 1]} : vector<8x128xf32> to vector<8x64xf32>
    %434 = arith.index_cast %c0_i32_149 : i32 to index
    %c0_159 = arith.constant 0 : index
    %c0_160 = arith.constant 0 : index
    %435 = vector.load %arg9[%434, %c0_159, %c0_160] : memref<8x8x128xf32, #tpu.memory_space<vmem>>, vector<1x8x64xf32>
    %436 = vector.shape_cast %435 : vector<1x8x64xf32> to vector<8x64xf32>
    %437 = vector.shape_cast %433 : vector<8x64xf32> to vector<1x8x64xf32>
    tpu.vector_store %arg9[%434, %c0_159, %c0_160], %437 {strides = array<i32>} : memref<8x8x128xf32, #tpu.memory_space<vmem>>, vector<1x8x64xf32>,
    %438 = vector.extract_strided_slice %432 {offsets = [0, 64], sizes = [8, 64], strides = [1, 1]} : vector<8x128xf32> to vector<8x64xf32>
    %c7_i32_161 = arith.constant 7 : i32
    %439 = arith.subi %c7_i32_161, %c0_i32_149 : i32
    %440 = arith.index_cast %439 : i32 to index
    %c0_162 = arith.constant 0 : index
    %c64_163 = arith.constant 64 : index
    %441 = vector.load %arg9[%440, %c0_162, %c64_163] : memref<8x8x128xf32, #tpu.memory_space<vmem>>, vector<1x8x64xf32>
    %442 = vector.shape_cast %441 : vector<1x8x64xf32> to vector<8x64xf32>
    %443 = vector.shape_cast %438 : vector<8x64xf32> to vector<1x8x64xf32>
    tpu.vector_store %arg9[%440, %c0_162, %c64_163], %443 {strides = array<i32>} : memref<8x8x128xf32, #tpu.memory_space<vmem>>, vector<1x8x64xf32>,
    %c1_i32_164 = arith.constant 1 : i32
    %444 = arith.index_cast %c1_i32_164 : i32 to index
    %c0_165 = arith.constant 0 : index
    %c0_166 = arith.constant 0 : index
    %445 = vector.load %arg12[%444, %c0_165, %c0_166] : memref<8x8x512xf32, #tpu.memory_space<vmem>>, vector<1x8x512xf32>
    %446 = vector.shape_cast %445 : vector<1x8x512xf32> to vector<8x512xf32>
    %c7_i32_167 = arith.constant 7 : i32
    %447 = arith.subi %c7_i32_167, %c1_i32_164 : i32
    %448 = arith.index_cast %447 : i32 to index
    %c0_168 = arith.constant 0 : index
    %c0_169 = arith.constant 0 : index
    %449 = vector.load %arg13[%448, %c0_168, %c0_169] : memref<8x8x512xf32, #tpu.memory_space<vmem>>, vector<1x8x512xf32>
    %450 = vector.shape_cast %449 : vector<1x8x512xf32> to vector<8x512xf32>
    %451 = arith.addf %446, %450 : vector<8x512xf32>
    %cst_170 = arith.constant dense<0.000000e+00> : vector<8x512xf32>
    %452 = tpu.matmul %432, %396, %cst_170 {dimension_numbers = #tpu.dot_dimension_numbers<[1], [0], [0], [1], [0, 0, 1, 1], [], []>} : vector<8x128xf32>, vector<128x512xf32>, vector<8x512xf32> -> vector<8x512xf32>
    %453 = arith.addf %451, %452 : vector<8x512xf32>
    %454 = vector.extract_strided_slice %453 {offsets = [0, 0], sizes = [8, 128], strides = [1, 1]} : vector<8x512xf32> to vector<8x128xf32>
    %455 = arith.negf %454 : vector<8x128xf32>
    %456 = math.exp %455 : vector<8x128xf32>
    %cst_171 = arith.constant 1.000000e+00 : f32
    %457 = vector.broadcast %cst_171 : f32 to vector<8x128xf32>
    %458 = arith.addf %457, %456 : vector<8x128xf32>
    %459 = arith.divf %457, %458 : vector<8x128xf32>
    %460 = vector.extract_strided_slice %453 {offsets = [0, 128], sizes = [8, 128], strides = [1, 1]} : vector<8x512xf32> to vector<8x128xf32>
    %461 = arith.negf %460 : vector<8x128xf32>
    %462 = math.exp %461 : vector<8x128xf32>
    %cst_172 = arith.constant 1.000000e+00 : f32
    %463 = vector.broadcast %cst_172 : f32 to vector<8x128xf32>
    %464 = arith.addf %463, %462 : vector<8x128xf32>
    %465 = arith.divf %463, %464 : vector<8x128xf32>
    %466 = vector.extract_strided_slice %453 {offsets = [0, 256], sizes = [8, 128], strides = [1, 1]} : vector<8x512xf32> to vector<8x128xf32>
    %467 = math.tanh %466 : vector<8x128xf32>
    %468 = vector.extract_strided_slice %453 {offsets = [0, 384], sizes = [8, 128], strides = [1, 1]} : vector<8x512xf32> to vector<8x128xf32>
    %469 = arith.negf %468 : vector<8x128xf32>
    %470 = math.exp %469 : vector<8x128xf32>
    %cst_173 = arith.constant 1.000000e+00 : f32
    %471 = vector.broadcast %cst_173 : f32 to vector<8x128xf32>
    %472 = arith.addf %471, %470 : vector<8x128xf32>
    %473 = arith.divf %471, %472 : vector<8x128xf32>
    %474 = arith.mulf %465, %430 : vector<8x128xf32>
    %475 = arith.mulf %459, %467 : vector<8x128xf32>
    %476 = arith.addf %474, %475 : vector<8x128xf32>
    %477 = math.tanh %476 : vector<8x128xf32>
    %478 = arith.mulf %473, %477 : vector<8x128xf32>
    %479 = vector.extract_strided_slice %478 {offsets = [0, 0], sizes = [8, 64], strides = [1, 1]} : vector<8x128xf32> to vector<8x64xf32>
    %480 = arith.index_cast %c1_i32_164 : i32 to index
    %c0_174 = arith.constant 0 : index
    %c0_175 = arith.constant 0 : index
    %481 = vector.load %arg9[%480, %c0_174, %c0_175] : memref<8x8x128xf32, #tpu.memory_space<vmem>>, vector<1x8x64xf32>
    %482 = vector.shape_cast %481 : vector<1x8x64xf32> to vector<8x64xf32>
    %483 = vector.shape_cast %479 : vector<8x64xf32> to vector<1x8x64xf32>
    tpu.vector_store %arg9[%480, %c0_174, %c0_175], %483 {strides = array<i32>} : memref<8x8x128xf32, #tpu.memory_space<vmem>>, vector<1x8x64xf32>,
    %484 = vector.extract_strided_slice %478 {offsets = [0, 64], sizes = [8, 64], strides = [1, 1]} : vector<8x128xf32> to vector<8x64xf32>
    %c7_i32_176 = arith.constant 7 : i32
    %485 = arith.subi %c7_i32_176, %c1_i32_164 : i32
    %486 = arith.index_cast %485 : i32 to index
    %c0_177 = arith.constant 0 : index
    %c64_178 = arith.constant 64 : index
    %487 = vector.load %arg9[%486, %c0_177, %c64_178] : memref<8x8x128xf32, #tpu.memory_space<vmem>>, vector<1x8x64xf32>
    %488 = vector.shape_cast %487 : vector<1x8x64xf32> to vector<8x64xf32>
    %489 = vector.shape_cast %484 : vector<8x64xf32> to vector<1x8x64xf32>
    tpu.vector_store %arg9[%486, %c0_177, %c64_178], %489 {strides = array<i32>} : memref<8x8x128xf32, #tpu.memory_space<vmem>>, vector<1x8x64xf32>,
    %c2_i32_179 = arith.constant 2 : i32
    %490 = arith.index_cast %c2_i32_179 : i32 to index
    %c0_180 = arith.constant 0 : index
    %c0_181 = arith.constant 0 : index
    %491 = vector.load %arg12[%490, %c0_180, %c0_181] : memref<8x8x512xf32, #tpu.memory_space<vmem>>, vector<1x8x512xf32>
    %492 = vector.shape_cast %491 : vector<1x8x512xf32> to vector<8x512xf32>
    %c7_i32_182 = arith.constant 7 : i32
    %493 = arith.subi %c7_i32_182, %c2_i32_179 : i32
    %494 = arith.index_cast %493 : i32 to index
    %c0_183 = arith.constant 0 : index
    %c0_184 = arith.constant 0 : index
    %495 = vector.load %arg13[%494, %c0_183, %c0_184] : memref<8x8x512xf32, #tpu.memory_space<vmem>>, vector<1x8x512xf32>
    %496 = vector.shape_cast %495 : vector<1x8x512xf32> to vector<8x512xf32>
    %497 = arith.addf %492, %496 : vector<8x512xf32>
    %cst_185 = arith.constant dense<0.000000e+00> : vector<8x512xf32>
    %498 = tpu.matmul %478, %396, %cst_185 {dimension_numbers = #tpu.dot_dimension_numbers<[1], [0], [0], [1], [0, 0, 1, 1], [], []>} : vector<8x128xf32>, vector<128x512xf32>, vector<8x512xf32> -> vector<8x512xf32>
    %499 = arith.addf %497, %498 : vector<8x512xf32>
    %500 = vector.extract_strided_slice %499 {offsets = [0, 0], sizes = [8, 128], strides = [1, 1]} : vector<8x512xf32> to vector<8x128xf32>
    %501 = arith.negf %500 : vector<8x128xf32>
    %502 = math.exp %501 : vector<8x128xf32>
    %cst_186 = arith.constant 1.000000e+00 : f32
    %503 = vector.broadcast %cst_186 : f32 to vector<8x128xf32>
    %504 = arith.addf %503, %502 : vector<8x128xf32>
    %505 = arith.divf %503, %504 : vector<8x128xf32>
    %506 = vector.extract_strided_slice %499 {offsets = [0, 128], sizes = [8, 128], strides = [1, 1]} : vector<8x512xf32> to vector<8x128xf32>
    %507 = arith.negf %506 : vector<8x128xf32>
    %508 = math.exp %507 : vector<8x128xf32>
    %cst_187 = arith.constant 1.000000e+00 : f32
    %509 = vector.broadcast %cst_187 : f32 to vector<8x128xf32>
    %510 = arith.addf %509, %508 : vector<8x128xf32>
    %511 = arith.divf %509, %510 : vector<8x128xf32>
    %512 = vector.extract_strided_slice %499 {offsets = [0, 256], sizes = [8, 128], strides = [1, 1]} : vector<8x512xf32> to vector<8x128xf32>
    %513 = math.tanh %512 : vector<8x128xf32>
    %514 = vector.extract_strided_slice %499 {offsets = [0, 384], sizes = [8, 128], strides = [1, 1]} : vector<8x512xf32> to vector<8x128xf32>
    %515 = arith.negf %514 : vector<8x128xf32>
    %516 = math.exp %515 : vector<8x128xf32>
    %cst_188 = arith.constant 1.000000e+00 : f32
    %517 = vector.broadcast %cst_188 : f32 to vector<8x128xf32>
    %518 = arith.addf %517, %516 : vector<8x128xf32>
    %519 = arith.divf %517, %518 : vector<8x128xf32>
    %520 = arith.mulf %511, %476 : vector<8x128xf32>
    %521 = arith.mulf %505, %513 : vector<8x128xf32>
    %522 = arith.addf %520, %521 : vector<8x128xf32>
    %523 = math.tanh %522 : vector<8x128xf32>
    %524 = arith.mulf %519, %523 : vector<8x128xf32>
    %525 = vector.extract_strided_slice %524 {offsets = [0, 0], sizes = [8, 64], strides = [1, 1]} : vector<8x128xf32> to vector<8x64xf32>
    %526 = arith.index_cast %c2_i32_179 : i32 to index
    %c0_189 = arith.constant 0 : index
    %c0_190 = arith.constant 0 : index
    %527 = vector.load %arg9[%526, %c0_189, %c0_190] : memref<8x8x128xf32, #tpu.memory_space<vmem>>, vector<1x8x64xf32>
    %528 = vector.shape_cast %527 : vector<1x8x64xf32> to vector<8x64xf32>
    %529 = vector.shape_cast %525 : vector<8x64xf32> to vector<1x8x64xf32>
    tpu.vector_store %arg9[%526, %c0_189, %c0_190], %529 {strides = array<i32>} : memref<8x8x128xf32, #tpu.memory_space<vmem>>, vector<1x8x64xf32>,
    %530 = vector.extract_strided_slice %524 {offsets = [0, 64], sizes = [8, 64], strides = [1, 1]} : vector<8x128xf32> to vector<8x64xf32>
    %c7_i32_191 = arith.constant 7 : i32
    %531 = arith.subi %c7_i32_191, %c2_i32_179 : i32
    %532 = arith.index_cast %531 : i32 to index
    %c0_192 = arith.constant 0 : index
    %c64_193 = arith.constant 64 : index
    %533 = vector.load %arg9[%532, %c0_192, %c64_193] : memref<8x8x128xf32, #tpu.memory_space<vmem>>, vector<1x8x64xf32>
    %534 = vector.shape_cast %533 : vector<1x8x64xf32> to vector<8x64xf32>
    %535 = vector.shape_cast %530 : vector<8x64xf32> to vector<1x8x64xf32>
    tpu.vector_store %arg9[%532, %c0_192, %c64_193], %535 {strides = array<i32>} : memref<8x8x128xf32, #tpu.memory_space<vmem>>, vector<1x8x64xf32>,
    %c3_i32_194 = arith.constant 3 : i32
    %536 = arith.index_cast %c3_i32_194 : i32 to index
    %c0_195 = arith.constant 0 : index
    %c0_196 = arith.constant 0 : index
    %537 = vector.load %arg12[%536, %c0_195, %c0_196] : memref<8x8x512xf32, #tpu.memory_space<vmem>>, vector<1x8x512xf32>
    %538 = vector.shape_cast %537 : vector<1x8x512xf32> to vector<8x512xf32>
    %c7_i32_197 = arith.constant 7 : i32
    %539 = arith.subi %c7_i32_197, %c3_i32_194 : i32
    %540 = arith.index_cast %539 : i32 to index
    %c0_198 = arith.constant 0 : index
    %c0_199 = arith.constant 0 : index
    %541 = vector.load %arg13[%540, %c0_198, %c0_199] : memref<8x8x512xf32, #tpu.memory_space<vmem>>, vector<1x8x512xf32>
    %542 = vector.shape_cast %541 : vector<1x8x512xf32> to vector<8x512xf32>
    %543 = arith.addf %538, %542 : vector<8x512xf32>
    %cst_200 = arith.constant dense<0.000000e+00> : vector<8x512xf32>
    %544 = tpu.matmul %524, %396, %cst_200 {dimension_numbers = #tpu.dot_dimension_numbers<[1], [0], [0], [1], [0, 0, 1, 1], [], []>} : vector<8x128xf32>, vector<128x512xf32>, vector<8x512xf32> -> vector<8x512xf32>
    %545 = arith.addf %543, %544 : vector<8x512xf32>
    %546 = vector.extract_strided_slice %545 {offsets = [0, 0], sizes = [8, 128], strides = [1, 1]} : vector<8x512xf32> to vector<8x128xf32>
    %547 = arith.negf %546 : vector<8x128xf32>
    %548 = math.exp %547 : vector<8x128xf32>
    %cst_201 = arith.constant 1.000000e+00 : f32
    %549 = vector.broadcast %cst_201 : f32 to vector<8x128xf32>
    %550 = arith.addf %549, %548 : vector<8x128xf32>
    %551 = arith.divf %549, %550 : vector<8x128xf32>
    %552 = vector.extract_strided_slice %545 {offsets = [0, 128], sizes = [8, 128], strides = [1, 1]} : vector<8x512xf32> to vector<8x128xf32>
    %553 = arith.negf %552 : vector<8x128xf32>
    %554 = math.exp %553 : vector<8x128xf32>
    %cst_202 = arith.constant 1.000000e+00 : f32
    %555 = vector.broadcast %cst_202 : f32 to vector<8x128xf32>
    %556 = arith.addf %555, %554 : vector<8x128xf32>
    %557 = arith.divf %555, %556 : vector<8x128xf32>
    %558 = vector.extract_strided_slice %545 {offsets = [0, 256], sizes = [8, 128], strides = [1, 1]} : vector<8x512xf32> to vector<8x128xf32>
    %559 = math.tanh %558 : vector<8x128xf32>
    %560 = vector.extract_strided_slice %545 {offsets = [0, 384], sizes = [8, 128], strides = [1, 1]} : vector<8x512xf32> to vector<8x128xf32>
    %561 = arith.negf %560 : vector<8x128xf32>
    %562 = math.exp %561 : vector<8x128xf32>
    %cst_203 = arith.constant 1.000000e+00 : f32
    %563 = vector.broadcast %cst_203 : f32 to vector<8x128xf32>
    %564 = arith.addf %563, %562 : vector<8x128xf32>
    %565 = arith.divf %563, %564 : vector<8x128xf32>
    %566 = arith.mulf %557, %522 : vector<8x128xf32>
    %567 = arith.mulf %551, %559 : vector<8x128xf32>
    %568 = arith.addf %566, %567 : vector<8x128xf32>
    %569 = math.tanh %568 : vector<8x128xf32>
    %570 = arith.mulf %565, %569 : vector<8x128xf32>
    %571 = vector.extract_strided_slice %570 {offsets = [0, 0], sizes = [8, 64], strides = [1, 1]} : vector<8x128xf32> to vector<8x64xf32>
    %572 = arith.index_cast %c3_i32_194 : i32 to index
    %c0_204 = arith.constant 0 : index
    %c0_205 = arith.constant 0 : index
    %573 = vector.load %arg9[%572, %c0_204, %c0_205] : memref<8x8x128xf32, #tpu.memory_space<vmem>>, vector<1x8x64xf32>
    %574 = vector.shape_cast %573 : vector<1x8x64xf32> to vector<8x64xf32>
    %575 = vector.shape_cast %571 : vector<8x64xf32> to vector<1x8x64xf32>
    tpu.vector_store %arg9[%572, %c0_204, %c0_205], %575 {strides = array<i32>} : memref<8x8x128xf32, #tpu.memory_space<vmem>>, vector<1x8x64xf32>,
    %576 = vector.extract_strided_slice %570 {offsets = [0, 64], sizes = [8, 64], strides = [1, 1]} : vector<8x128xf32> to vector<8x64xf32>
    %c7_i32_206 = arith.constant 7 : i32
    %577 = arith.subi %c7_i32_206, %c3_i32_194 : i32
    %578 = arith.index_cast %577 : i32 to index
    %c0_207 = arith.constant 0 : index
    %c64_208 = arith.constant 64 : index
    %579 = vector.load %arg9[%578, %c0_207, %c64_208] : memref<8x8x128xf32, #tpu.memory_space<vmem>>, vector<1x8x64xf32>
    %580 = vector.shape_cast %579 : vector<1x8x64xf32> to vector<8x64xf32>
    %581 = vector.shape_cast %576 : vector<8x64xf32> to vector<1x8x64xf32>
    tpu.vector_store %arg9[%578, %c0_207, %c64_208], %581 {strides = array<i32>} : memref<8x8x128xf32, #tpu.memory_space<vmem>>, vector<1x8x64xf32>,
    %c4_i32_209 = arith.constant 4 : i32
    %582 = arith.index_cast %c4_i32_209 : i32 to index
    %c0_210 = arith.constant 0 : index
    %c0_211 = arith.constant 0 : index
    %583 = vector.load %arg12[%582, %c0_210, %c0_211] : memref<8x8x512xf32, #tpu.memory_space<vmem>>, vector<1x8x512xf32>
    %584 = vector.shape_cast %583 : vector<1x8x512xf32> to vector<8x512xf32>
    %c7_i32_212 = arith.constant 7 : i32
    %585 = arith.subi %c7_i32_212, %c4_i32_209 : i32
    %586 = arith.index_cast %585 : i32 to index
    %c0_213 = arith.constant 0 : index
    %c0_214 = arith.constant 0 : index
    %587 = vector.load %arg13[%586, %c0_213, %c0_214] : memref<8x8x512xf32, #tpu.memory_space<vmem>>, vector<1x8x512xf32>
    %588 = vector.shape_cast %587 : vector<1x8x512xf32> to vector<8x512xf32>
    %589 = arith.addf %584, %588 : vector<8x512xf32>
    %cst_215 = arith.constant dense<0.000000e+00> : vector<8x512xf32>
    %590 = tpu.matmul %570, %396, %cst_215 {dimension_numbers = #tpu.dot_dimension_numbers<[1], [0], [0], [1], [0, 0, 1, 1], [], []>} : vector<8x128xf32>, vector<128x512xf32>, vector<8x512xf32> -> vector<8x512xf32>
    %591 = arith.addf %589, %590 : vector<8x512xf32>
    %592 = vector.extract_strided_slice %591 {offsets = [0, 0], sizes = [8, 128], strides = [1, 1]} : vector<8x512xf32> to vector<8x128xf32>
    %593 = arith.negf %592 : vector<8x128xf32>
    %594 = math.exp %593 : vector<8x128xf32>
    %cst_216 = arith.constant 1.000000e+00 : f32
    %595 = vector.broadcast %cst_216 : f32 to vector<8x128xf32>
    %596 = arith.addf %595, %594 : vector<8x128xf32>
    %597 = arith.divf %595, %596 : vector<8x128xf32>
    %598 = vector.extract_strided_slice %591 {offsets = [0, 128], sizes = [8, 128], strides = [1, 1]} : vector<8x512xf32> to vector<8x128xf32>
    %599 = arith.negf %598 : vector<8x128xf32>
    %600 = math.exp %599 : vector<8x128xf32>
    %cst_217 = arith.constant 1.000000e+00 : f32
    %601 = vector.broadcast %cst_217 : f32 to vector<8x128xf32>
    %602 = arith.addf %601, %600 : vector<8x128xf32>
    %603 = arith.divf %601, %602 : vector<8x128xf32>
    %604 = vector.extract_strided_slice %591 {offsets = [0, 256], sizes = [8, 128], strides = [1, 1]} : vector<8x512xf32> to vector<8x128xf32>
    %605 = math.tanh %604 : vector<8x128xf32>
    %606 = vector.extract_strided_slice %591 {offsets = [0, 384], sizes = [8, 128], strides = [1, 1]} : vector<8x512xf32> to vector<8x128xf32>
    %607 = arith.negf %606 : vector<8x128xf32>
    %608 = math.exp %607 : vector<8x128xf32>
    %cst_218 = arith.constant 1.000000e+00 : f32
    %609 = vector.broadcast %cst_218 : f32 to vector<8x128xf32>
    %610 = arith.addf %609, %608 : vector<8x128xf32>
    %611 = arith.divf %609, %610 : vector<8x128xf32>
    %612 = arith.mulf %603, %568 : vector<8x128xf32>
    %613 = arith.mulf %597, %605 : vector<8x128xf32>
    %614 = arith.addf %612, %613 : vector<8x128xf32>
    %615 = math.tanh %614 : vector<8x128xf32>
    %616 = arith.mulf %611, %615 : vector<8x128xf32>
    %617 = vector.extract_strided_slice %616 {offsets = [0, 0], sizes = [8, 64], strides = [1, 1]} : vector<8x128xf32> to vector<8x64xf32>
    %618 = arith.index_cast %c4_i32_209 : i32 to index
    %c0_219 = arith.constant 0 : index
    %c0_220 = arith.constant 0 : index
    %619 = vector.load %arg9[%618, %c0_219, %c0_220] : memref<8x8x128xf32, #tpu.memory_space<vmem>>, vector<1x8x64xf32>
    %620 = vector.shape_cast %619 : vector<1x8x64xf32> to vector<8x64xf32>
    %621 = vector.shape_cast %617 : vector<8x64xf32> to vector<1x8x64xf32>
    tpu.vector_store %arg9[%618, %c0_219, %c0_220], %621 {strides = array<i32>} : memref<8x8x128xf32, #tpu.memory_space<vmem>>, vector<1x8x64xf32>,
    %622 = vector.extract_strided_slice %616 {offsets = [0, 64], sizes = [8, 64], strides = [1, 1]} : vector<8x128xf32> to vector<8x64xf32>
    %c7_i32_221 = arith.constant 7 : i32
    %623 = arith.subi %c7_i32_221, %c4_i32_209 : i32
    %624 = arith.index_cast %623 : i32 to index
    %c0_222 = arith.constant 0 : index
    %c64_223 = arith.constant 64 : index
    %625 = vector.load %arg9[%624, %c0_222, %c64_223] : memref<8x8x128xf32, #tpu.memory_space<vmem>>, vector<1x8x64xf32>
    %626 = vector.shape_cast %625 : vector<1x8x64xf32> to vector<8x64xf32>
    %627 = vector.shape_cast %622 : vector<8x64xf32> to vector<1x8x64xf32>
    tpu.vector_store %arg9[%624, %c0_222, %c64_223], %627 {strides = array<i32>} : memref<8x8x128xf32, #tpu.memory_space<vmem>>, vector<1x8x64xf32>,
    %c5_i32_224 = arith.constant 5 : i32
    %628 = arith.index_cast %c5_i32_224 : i32 to index
    %c0_225 = arith.constant 0 : index
    %c0_226 = arith.constant 0 : index
    %629 = vector.load %arg12[%628, %c0_225, %c0_226] : memref<8x8x512xf32, #tpu.memory_space<vmem>>, vector<1x8x512xf32>
    %630 = vector.shape_cast %629 : vector<1x8x512xf32> to vector<8x512xf32>
    %c7_i32_227 = arith.constant 7 : i32
    %631 = arith.subi %c7_i32_227, %c5_i32_224 : i32
    %632 = arith.index_cast %631 : i32 to index
    %c0_228 = arith.constant 0 : index
    %c0_229 = arith.constant 0 : index
    %633 = vector.load %arg13[%632, %c0_228, %c0_229] : memref<8x8x512xf32, #tpu.memory_space<vmem>>, vector<1x8x512xf32>
    %634 = vector.shape_cast %633 : vector<1x8x512xf32> to vector<8x512xf32>
    %635 = arith.addf %630, %634 : vector<8x512xf32>
    %cst_230 = arith.constant dense<0.000000e+00> : vector<8x512xf32>
    %636 = tpu.matmul %616, %396, %cst_230 {dimension_numbers = #tpu.dot_dimension_numbers<[1], [0], [0], [1], [0, 0, 1, 1], [], []>} : vector<8x128xf32>, vector<128x512xf32>, vector<8x512xf32> -> vector<8x512xf32>
    %637 = arith.addf %635, %636 : vector<8x512xf32>
    %638 = vector.extract_strided_slice %637 {offsets = [0, 0], sizes = [8, 128], strides = [1, 1]} : vector<8x512xf32> to vector<8x128xf32>
    %639 = arith.negf %638 : vector<8x128xf32>
    %640 = math.exp %639 : vector<8x128xf32>
    %cst_231 = arith.constant 1.000000e+00 : f32
    %641 = vector.broadcast %cst_231 : f32 to vector<8x128xf32>
    %642 = arith.addf %641, %640 : vector<8x128xf32>
    %643 = arith.divf %641, %642 : vector<8x128xf32>
    %644 = vector.extract_strided_slice %637 {offsets = [0, 128], sizes = [8, 128], strides = [1, 1]} : vector<8x512xf32> to vector<8x128xf32>
    %645 = arith.negf %644 : vector<8x128xf32>
    %646 = math.exp %645 : vector<8x128xf32>
    %cst_232 = arith.constant 1.000000e+00 : f32
    %647 = vector.broadcast %cst_232 : f32 to vector<8x128xf32>
    %648 = arith.addf %647, %646 : vector<8x128xf32>
    %649 = arith.divf %647, %648 : vector<8x128xf32>
    %650 = vector.extract_strided_slice %637 {offsets = [0, 256], sizes = [8, 128], strides = [1, 1]} : vector<8x512xf32> to vector<8x128xf32>
    %651 = math.tanh %650 : vector<8x128xf32>
    %652 = vector.extract_strided_slice %637 {offsets = [0, 384], sizes = [8, 128], strides = [1, 1]} : vector<8x512xf32> to vector<8x128xf32>
    %653 = arith.negf %652 : vector<8x128xf32>
    %654 = math.exp %653 : vector<8x128xf32>
    %cst_233 = arith.constant 1.000000e+00 : f32
    %655 = vector.broadcast %cst_233 : f32 to vector<8x128xf32>
    %656 = arith.addf %655, %654 : vector<8x128xf32>
    %657 = arith.divf %655, %656 : vector<8x128xf32>
    %658 = arith.mulf %649, %614 : vector<8x128xf32>
    %659 = arith.mulf %643, %651 : vector<8x128xf32>
    %660 = arith.addf %658, %659 : vector<8x128xf32>
    %661 = math.tanh %660 : vector<8x128xf32>
    %662 = arith.mulf %657, %661 : vector<8x128xf32>
    %663 = vector.extract_strided_slice %662 {offsets = [0, 0], sizes = [8, 64], strides = [1, 1]} : vector<8x128xf32> to vector<8x64xf32>
    %664 = arith.index_cast %c5_i32_224 : i32 to index
    %c0_234 = arith.constant 0 : index
    %c0_235 = arith.constant 0 : index
    %665 = vector.load %arg9[%664, %c0_234, %c0_235] : memref<8x8x128xf32, #tpu.memory_space<vmem>>, vector<1x8x64xf32>
    %666 = vector.shape_cast %665 : vector<1x8x64xf32> to vector<8x64xf32>
    %667 = vector.shape_cast %663 : vector<8x64xf32> to vector<1x8x64xf32>
    tpu.vector_store %arg9[%664, %c0_234, %c0_235], %667 {strides = array<i32>} : memref<8x8x128xf32, #tpu.memory_space<vmem>>, vector<1x8x64xf32>,
    %668 = vector.extract_strided_slice %662 {offsets = [0, 64], sizes = [8, 64], strides = [1, 1]} : vector<8x128xf32> to vector<8x64xf32>
    %c7_i32_236 = arith.constant 7 : i32
    %669 = arith.subi %c7_i32_236, %c5_i32_224 : i32
    %670 = arith.index_cast %669 : i32 to index
    %c0_237 = arith.constant 0 : index
    %c64_238 = arith.constant 64 : index
    %671 = vector.load %arg9[%670, %c0_237, %c64_238] : memref<8x8x128xf32, #tpu.memory_space<vmem>>, vector<1x8x64xf32>
    %672 = vector.shape_cast %671 : vector<1x8x64xf32> to vector<8x64xf32>
    %673 = vector.shape_cast %668 : vector<8x64xf32> to vector<1x8x64xf32>
    tpu.vector_store %arg9[%670, %c0_237, %c64_238], %673 {strides = array<i32>} : memref<8x8x128xf32, #tpu.memory_space<vmem>>, vector<1x8x64xf32>,
    %c6_i32_239 = arith.constant 6 : i32
    %674 = arith.index_cast %c6_i32_239 : i32 to index
    %c0_240 = arith.constant 0 : index
    %c0_241 = arith.constant 0 : index
    %675 = vector.load %arg12[%674, %c0_240, %c0_241] : memref<8x8x512xf32, #tpu.memory_space<vmem>>, vector<1x8x512xf32>
    %676 = vector.shape_cast %675 : vector<1x8x512xf32> to vector<8x512xf32>
    %c7_i32_242 = arith.constant 7 : i32
    %677 = arith.subi %c7_i32_242, %c6_i32_239 : i32
    %678 = arith.index_cast %677 : i32 to index
    %c0_243 = arith.constant 0 : index
    %c0_244 = arith.constant 0 : index
    %679 = vector.load %arg13[%678, %c0_243, %c0_244] : memref<8x8x512xf32, #tpu.memory_space<vmem>>, vector<1x8x512xf32>
    %680 = vector.shape_cast %679 : vector<1x8x512xf32> to vector<8x512xf32>
    %681 = arith.addf %676, %680 : vector<8x512xf32>
    %cst_245 = arith.constant dense<0.000000e+00> : vector<8x512xf32>
    %682 = tpu.matmul %662, %396, %cst_245 {dimension_numbers = #tpu.dot_dimension_numbers<[1], [0], [0], [1], [0, 0, 1, 1], [], []>} : vector<8x128xf32>, vector<128x512xf32>, vector<8x512xf32> -> vector<8x512xf32>
    %683 = arith.addf %681, %682 : vector<8x512xf32>
    %684 = vector.extract_strided_slice %683 {offsets = [0, 0], sizes = [8, 128], strides = [1, 1]} : vector<8x512xf32> to vector<8x128xf32>
    %685 = arith.negf %684 : vector<8x128xf32>
    %686 = math.exp %685 : vector<8x128xf32>
    %cst_246 = arith.constant 1.000000e+00 : f32
    %687 = vector.broadcast %cst_246 : f32 to vector<8x128xf32>
    %688 = arith.addf %687, %686 : vector<8x128xf32>
    %689 = arith.divf %687, %688 : vector<8x128xf32>
    %690 = vector.extract_strided_slice %683 {offsets = [0, 128], sizes = [8, 128], strides = [1, 1]} : vector<8x512xf32> to vector<8x128xf32>
    %691 = arith.negf %690 : vector<8x128xf32>
    %692 = math.exp %691 : vector<8x128xf32>
    %cst_247 = arith.constant 1.000000e+00 : f32
    %693 = vector.broadcast %cst_247 : f32 to vector<8x128xf32>
    %694 = arith.addf %693, %692 : vector<8x128xf32>
    %695 = arith.divf %693, %694 : vector<8x128xf32>
    %696 = vector.extract_strided_slice %683 {offsets = [0, 256], sizes = [8, 128], strides = [1, 1]} : vector<8x512xf32> to vector<8x128xf32>
    %697 = math.tanh %696 : vector<8x128xf32>
    %698 = vector.extract_strided_slice %683 {offsets = [0, 384], sizes = [8, 128], strides = [1, 1]} : vector<8x512xf32> to vector<8x128xf32>
    %699 = arith.negf %698 : vector<8x128xf32>
    %700 = math.exp %699 : vector<8x128xf32>
    %cst_248 = arith.constant 1.000000e+00 : f32
    %701 = vector.broadcast %cst_248 : f32 to vector<8x128xf32>
    %702 = arith.addf %701, %700 : vector<8x128xf32>
    %703 = arith.divf %701, %702 : vector<8x128xf32>
    %704 = arith.mulf %695, %660 : vector<8x128xf32>
    %705 = arith.mulf %689, %697 : vector<8x128xf32>
    %706 = arith.addf %704, %705 : vector<8x128xf32>
    %707 = math.tanh %706 : vector<8x128xf32>
    %708 = arith.mulf %703, %707 : vector<8x128xf32>
    %709 = vector.extract_strided_slice %708 {offsets = [0, 0], sizes = [8, 64], strides = [1, 1]} : vector<8x128xf32> to vector<8x64xf32>
    %710 = arith.index_cast %c6_i32_239 : i32 to index
    %c0_249 = arith.constant 0 : index
    %c0_250 = arith.constant 0 : index
    %711 = vector.load %arg9[%710, %c0_249, %c0_250] : memref<8x8x128xf32, #tpu.memory_space<vmem>>, vector<1x8x64xf32>
    %712 = vector.shape_cast %711 : vector<1x8x64xf32> to vector<8x64xf32>
    %713 = vector.shape_cast %709 : vector<8x64xf32> to vector<1x8x64xf32>
    tpu.vector_store %arg9[%710, %c0_249, %c0_250], %713 {strides = array<i32>} : memref<8x8x128xf32, #tpu.memory_space<vmem>>, vector<1x8x64xf32>,
    %714 = vector.extract_strided_slice %708 {offsets = [0, 64], sizes = [8, 64], strides = [1, 1]} : vector<8x128xf32> to vector<8x64xf32>
    %c7_i32_251 = arith.constant 7 : i32
    %715 = arith.subi %c7_i32_251, %c6_i32_239 : i32
    %716 = arith.index_cast %715 : i32 to index
    %c0_252 = arith.constant 0 : index
    %c64_253 = arith.constant 64 : index
    %717 = vector.load %arg9[%716, %c0_252, %c64_253] : memref<8x8x128xf32, #tpu.memory_space<vmem>>, vector<1x8x64xf32>
    %718 = vector.shape_cast %717 : vector<1x8x64xf32> to vector<8x64xf32>
    %719 = vector.shape_cast %714 : vector<8x64xf32> to vector<1x8x64xf32>
    tpu.vector_store %arg9[%716, %c0_252, %c64_253], %719 {strides = array<i32>} : memref<8x8x128xf32, #tpu.memory_space<vmem>>, vector<1x8x64xf32>,
    %c7_i32_254 = arith.constant 7 : i32
    %720 = arith.index_cast %c7_i32_254 : i32 to index
    %c0_255 = arith.constant 0 : index
    %c0_256 = arith.constant 0 : index
    %721 = vector.load %arg12[%720, %c0_255, %c0_256] : memref<8x8x512xf32, #tpu.memory_space<vmem>>, vector<1x8x512xf32>
    %722 = vector.shape_cast %721 : vector<1x8x512xf32> to vector<8x512xf32>
    %c7_i32_257 = arith.constant 7 : i32
    %723 = arith.subi %c7_i32_257, %c7_i32_254 : i32
    %724 = arith.index_cast %723 : i32 to index
    %c0_258 = arith.constant 0 : index
    %c0_259 = arith.constant 0 : index
    %725 = vector.load %arg13[%724, %c0_258, %c0_259] : memref<8x8x512xf32, #tpu.memory_space<vmem>>, vector<1x8x512xf32>
    %726 = vector.shape_cast %725 : vector<1x8x512xf32> to vector<8x512xf32>
    %727 = arith.addf %722, %726 : vector<8x512xf32>
    %cst_260 = arith.constant dense<0.000000e+00> : vector<8x512xf32>
    %728 = tpu.matmul %708, %396, %cst_260 {dimension_numbers = #tpu.dot_dimension_numbers<[1], [0], [0], [1], [0, 0, 1, 1], [], []>} : vector<8x128xf32>, vector<128x512xf32>, vector<8x512xf32> -> vector<8x512xf32>
    %729 = arith.addf %727, %728 : vector<8x512xf32>
    %730 = vector.extract_strided_slice %729 {offsets = [0, 0], sizes = [8, 128], strides = [1, 1]} : vector<8x512xf32> to vector<8x128xf32>
    %731 = arith.negf %730 : vector<8x128xf32>
    %732 = math.exp %731 : vector<8x128xf32>
    %cst_261 = arith.constant 1.000000e+00 : f32
    %733 = vector.broadcast %cst_261 : f32 to vector<8x128xf32>
    %734 = arith.addf %733, %732 : vector<8x128xf32>
    %735 = arith.divf %733, %734 : vector<8x128xf32>
    %736 = vector.extract_strided_slice %729 {offsets = [0, 128], sizes = [8, 128], strides = [1, 1]} : vector<8x512xf32> to vector<8x128xf32>
    %737 = arith.negf %736 : vector<8x128xf32>
    %738 = math.exp %737 : vector<8x128xf32>
    %cst_262 = arith.constant 1.000000e+00 : f32
    %739 = vector.broadcast %cst_262 : f32 to vector<8x128xf32>
    %740 = arith.addf %739, %738 : vector<8x128xf32>
    %741 = arith.divf %739, %740 : vector<8x128xf32>
    %742 = vector.extract_strided_slice %729 {offsets = [0, 256], sizes = [8, 128], strides = [1, 1]} : vector<8x512xf32> to vector<8x128xf32>
    %743 = math.tanh %742 : vector<8x128xf32>
    %744 = vector.extract_strided_slice %729 {offsets = [0, 384], sizes = [8, 128], strides = [1, 1]} : vector<8x512xf32> to vector<8x128xf32>
    %745 = arith.negf %744 : vector<8x128xf32>
    %746 = math.exp %745 : vector<8x128xf32>
    %cst_263 = arith.constant 1.000000e+00 : f32
    %747 = vector.broadcast %cst_263 : f32 to vector<8x128xf32>
    %748 = arith.addf %747, %746 : vector<8x128xf32>
    %749 = arith.divf %747, %748 : vector<8x128xf32>
    %750 = arith.mulf %741, %706 : vector<8x128xf32>
    %751 = arith.mulf %735, %743 : vector<8x128xf32>
    %752 = arith.addf %750, %751 : vector<8x128xf32>
    %753 = math.tanh %752 : vector<8x128xf32>
    %754 = arith.mulf %749, %753 : vector<8x128xf32>
    %755 = vector.extract_strided_slice %754 {offsets = [0, 0], sizes = [8, 64], strides = [1, 1]} : vector<8x128xf32> to vector<8x64xf32>
    %756 = arith.index_cast %c7_i32_254 : i32 to index
    %c0_264 = arith.constant 0 : index
    %c0_265 = arith.constant 0 : index
    %757 = vector.load %arg9[%756, %c0_264, %c0_265] : memref<8x8x128xf32, #tpu.memory_space<vmem>>, vector<1x8x64xf32>
    %758 = vector.shape_cast %757 : vector<1x8x64xf32> to vector<8x64xf32>
    %759 = vector.shape_cast %755 : vector<8x64xf32> to vector<1x8x64xf32>
    tpu.vector_store %arg9[%756, %c0_264, %c0_265], %759 {strides = array<i32>} : memref<8x8x128xf32, #tpu.memory_space<vmem>>, vector<1x8x64xf32>,
    %760 = vector.extract_strided_slice %754 {offsets = [0, 64], sizes = [8, 64], strides = [1, 1]} : vector<8x128xf32> to vector<8x64xf32>
    %c7_i32_266 = arith.constant 7 : i32
    %761 = arith.subi %c7_i32_266, %c7_i32_254 : i32
    %762 = arith.index_cast %761 : i32 to index
    %c0_267 = arith.constant 0 : index
    %c64_268 = arith.constant 64 : index
    %763 = vector.load %arg9[%762, %c0_267, %c64_268] : memref<8x8x128xf32, #tpu.memory_space<vmem>>, vector<1x8x64xf32>
    %764 = vector.shape_cast %763 : vector<1x8x64xf32> to vector<8x64xf32>
    %765 = vector.shape_cast %760 : vector<8x64xf32> to vector<1x8x64xf32>
    tpu.vector_store %arg9[%762, %c0_267, %c64_268], %765 {strides = array<i32>} : memref<8x8x128xf32, #tpu.memory_space<vmem>>, vector<1x8x64xf32>,
    %c8_i32_269 = arith.constant 8 : i32
    %c0_270 = arith.constant 0 : index
    %c0_271 = arith.constant 0 : index
    %766 = vector.load %arg10[%c0_270, %c0_271] : memref<8x128xf32, #tpu.memory_space<vmem>>, vector<8x128xf32>
    tpu.vector_store %arg10[%c0_270, %c0_271], %754 {strides = array<i32>} : memref<8x128xf32, #tpu.memory_space<vmem>>, vector<8x128xf32>,
    return
  }
}

</mosaic_0001>

<bundles_post_ra>
// kernel: tpu_custom_call.1
= control target key start
LH: loop header
LB: loop body
LE: loop exit
PB: predicated region body
PF: predicated region fallthrough
CT: control target
= control target key end

     0   :  { %16 = vsyncpa [#allocation6], 0  ;;  %s7756_s0 = inlined_call_operand.hbm [shape: f32[8,8,32], index: 0, kind: input, shape index: {}]   ;;  %s7757_s1 = inlined_call_operand.hbm [shape: f32[32,512], index: 1, kind: input, shape index: {}]   ;;  %s7758_s2 = inlined_call_operand.hbm [shape: f32[32,512], index: 2, kind: input, shape index: {}]   ;;  %s7759_s3 = inlined_call_operand.vmem [shape: f32[1,512], index: 3, kind: input, shape index: {}]   ;;  %s7760_s4 = inlined_call_operand.hbm [shape: f32[128,512], index: 4, kind: input, shape index: {}]   ;;  %s7761_s5 = inlined_call_operand.hbm [shape: f32[128,512], index: 5, kind: input, shape index: {}]   ;;  %s7762_s6 = inlined_call_operand.hbm [shape: f32[128,512], index: 6, kind: input, shape index: {}]   ;;  %s7763_s7 = inlined_call_operand.vmem [shape: f32[1,512], index: 7, kind: input, shape index: {}]   ;;  %s7764_s8 = inlined_call_operand.hbm [shape: f32[128,512], index: 8, kind: input, shape index: {}]   ;;  %s7765_s9 = inlined_call_operand.hbm [shape: f32[8,8,128], index: 9, kind: output, shape index: {0}]   ;;  %s7766_s10 = inlined_call_operand.hbm [shape: f32[8,128], index: 10, kind: output, shape index: {1}]  }
   0x1   :  { %17 = vsyncpa [#allocation9], 0 }
   0x2   :  { %18 = vsyncpa [#allocation12], 0 }
   0x3   :  { %19 = vsyncpa [#allocation15], 0 }
   0x4   :  { %20 = vsyncpa [#allocation7], 0 }
   0x5   :  { %21 = vsyncpa [#allocation19], 0  ;;  %s6481_s13 = smov [#allocation8]   ;;  %s6271_s17 = scalar_lea.hbm %s7757_s1, 2048 }
   0x6   :  { %s39_s14 = sshll.u32 %s6481_s13, 4  ;;  %p6272_p0 = scmp.ne.s32.totalorder %s7757_s1, %s6271_s17  ;;  %s40_s14 = int_to_ptr.vmem [resolvable:$true] %s39_s14 }
   0x7   :  { %p6275_p1 = scmp.lt.u32.totalorder %s6271_s17, %s7757_s1 }
   0x9   :  { %p6277_p2 = pnand %p6275_p1, %p6272_p0 }
   0xb   :  { %6280 = shalt.err (!%p6277_p2)
}
   0xc   :  { %s6281_s22 = scalar_lea.vmem %s40_s14, 2048  ;;  %p6286_p4 = scmp.lt.s32.totalorder %s40_s14, %s40_s14 }
   0xd   :  { %p6282_p3 = scmp.ne.s32.totalorder %s40_s14, %s6281_s22  ;;  %p6287_p5 = scmp.lt.s32.totalorder %s6281_s22, %s6281_s22 }
   0xf   :  { %p6288_p6 = por %p6287_p5, %p6286_p4 }
  0x11   :  { %p6289_p7 = pnand %p6288_p6, %p6282_p3 }
  0x13   :  { %6292 = shalt.err (!%p6289_p7)
}
  0x14   :  { %s6482_s23 = smov 512   ;;  %s6483_s24 = smov 32  }
  0x15   :  { %45 = dma.hbm_to_vmem [thread:$0]  %s7757_s1, 2048, %s40_s14, [#allocation9], %s6482_s23, %s6482_s23, %s6483_s24  }
  0x16   :  { %s6484_s27 = smov [#allocation11]   ;;  %s6485_s29 = smov [#allocation14]  }
  0x17   :  { %s65_s28 = sshll.u32 %s6484_s27, 4  ;;  %s89_s30 = sshll.u32 %s6485_s29, 4  ;;  %s66_s28 = int_to_ptr.vmem [resolvable:$true] %s65_s28  ;;  %s90_s30 = int_to_ptr.vmem [resolvable:$true] %s89_s30 }
  0x18   :  { %s6293_s13 = scalar_lea.hbm %s7760_s4, 8192 }
  0x19   :  { %p6294_p8 = scmp.ne.s32.totalorder %s7760_s4, %s6293_s13  ;;  %p6297_p9 = scmp.lt.u32.totalorder %s6293_s13, %s7760_s4 }
  0x1b   :  { %p6299_p10 = pnand %p6297_p9, %p6294_p8 }
  0x1d   :  { %6302 = shalt.err (!%p6299_p10)
}
  0x1e   :  { %s6303_s1 = scalar_lea.vmem %s66_s28, 8192  ;;  %p6308_p12 = scmp.lt.s32.totalorder %s66_s28, %s66_s28 }
  0x1f   :  { %p6304_p11 = scmp.ne.s32.totalorder %s66_s28, %s6303_s1  ;;  %p6309_p13 = scmp.lt.s32.totalorder %s6303_s1, %s6303_s1 }
  0x21   :  { %p6310_p0 = por %p6309_p13, %p6308_p12 }
  0x23   :  { %p6311_p1 = pnand %p6310_p0, %p6304_p11 }
  0x25   :  { %6314 = shalt.err (!%p6311_p1)
}
  0x26   :  { %71 = dma.hbm_to_vmem [thread:$0]  %s7760_s4, 8192, %s66_s28, [#allocation12], %s6482_s23, %s6482_s23, %s6483_s24  }
  0x27   :  { %s6315_s22 = scalar_lea.hbm %s7762_s6, 8192 }
  0x28   :  { %p6316_p2 = scmp.ne.s32.totalorder %s7762_s6, %s6315_s22  ;;  %p6319_p3 = scmp.lt.u32.totalorder %s6315_s22, %s7762_s6 }
  0x2a   :  { %p6321_p4 = pnand %p6319_p3, %p6316_p2 }
  0x2c   :  { %6324 = shalt.err (!%p6321_p4)
}
  0x2d   :  { %s6325_s11 = scalar_lea.vmem %s90_s30, 8192  ;;  %p6330_p6 = scmp.lt.s32.totalorder %s90_s30, %s90_s30 }
  0x2e   :  { %p6326_p5 = scmp.ne.s32.totalorder %s90_s30, %s6325_s11  ;;  %p6331_p7 = scmp.lt.s32.totalorder %s6325_s11, %s6325_s11 }
  0x30   :  { %p6332_p8 = por %p6331_p7, %p6330_p6 }
  0x32   :  { %p6333_p9 = pnand %p6332_p8, %p6326_p5 }
  0x34   :  { %6336 = shalt.err (!%p6333_p9)
}
  0x35   :  { %95 = dma.hbm_to_vmem [thread:$0]  %s7762_s6, 8192, %s90_s30, [#allocation15], %s6482_s23, %s6482_s23, %s6483_s24  }
  0x36   :  { %s6486_s12 = smov [#allocation5]   ;;  %s6337_s17 = scalar_lea.hbm %s7756_s0, 1024 }
  0x37   :  { %s27_s13 = sshll.u32 %s6486_s12, 4  ;;  %p6338_p10 = scmp.ne.s32.totalorder %s7756_s0, %s6337_s17  ;;  %s28_s13 = int_to_ptr.vmem [resolvable:$true] %s27_s13 }
  0x38   :  { %p6341_p11 = scmp.lt.u32.totalorder %s6337_s17, %s7756_s0 }
  0x3a   :  { %p6343_p12 = pnand %p6341_p11, %p6338_p10 }
  0x3c   :  { %6346 = shalt.err (!%p6343_p12)
}
  0x3d   :  { %s6347_s20 = scalar_lea.vmem %s28_s13, 1024  ;;  %p6352_p0 = scmp.lt.s32.totalorder %s28_s13, %s28_s13 }
  0x3e   :  { %p6348_p13 = scmp.ne.s32.totalorder %s28_s13, %s6347_s20  ;;  %p6353_p1 = scmp.lt.s32.totalorder %s6347_s20, %s6347_s20 }
  0x40   :  { %p6354_p2 = por %p6353_p1, %p6352_p0 }
  0x42   :  { %p6355_p3 = pnand %p6354_p2, %p6348_p13 }
  0x44   :  { %6358 = shalt.err (!%p6355_p3)
}
  0x45   :  { %s6487_s6 = smov 128   ;;  %s6488_s30 = smov 8  }
  0x46   :  { %33 = dma.hbm_to_vmem [thread:$0]  %s7756_s0, 1024, %s28_s13, [#allocation6], %s6487_s6, %s6487_s6, %s6488_s30  }
  0x47   :  { %s6489_s25 = smov [#allocation10]   ;;  %s6490_s27 = smov [#allocation13]  }
  0x48   :  { %s51_s26 = sshll.u32 %s6489_s25, 4  ;;  %s77_s29 = sshll.u32 %s6490_s27, 4  ;;  %s52_s26 = int_to_ptr.vmem [resolvable:$true] %s51_s26  ;;  %s6610_s29 = int_to_ptr.vmem [resolvable:$true] %s77_s29 }
  0x49   :  { %s6359_s28 = scalar_lea.hbm %s7758_s2, 2048 }
  0x4a   :  { %p6360_p4 = scmp.ne.s32.totalorder %s7758_s2, %s6359_s28  ;;  %p6363_p5 = scmp.lt.u32.totalorder %s6359_s28, %s7758_s2 }
  0x4c   :  { %p6365_p6 = pnand %p6363_p5, %p6360_p4 }
  0x4e   :  { %6368 = shalt.err (!%p6365_p6)
}
  0x4f   :  { %s6369_s0 = scalar_lea.vmem %s52_s26, 2048  ;;  %p6374_p8 = scmp.lt.s32.totalorder %s52_s26, %s52_s26 }
  0x50   :  { %p6370_p7 = scmp.ne.s32.totalorder %s52_s26, %s6369_s0  ;;  %p6375_p9 = scmp.lt.s32.totalorder %s6369_s0, %s6369_s0 }
  0x52   :  { %p6376_p10 = por %p6375_p9, %p6374_p8 }
  0x54   :  { %p6377_p11 = pnand %p6376_p10, %p6370_p7 }
  0x56   :  { %6380 = shalt.err (!%p6377_p11)
}
  0x57   :  { %57 = dma.hbm_to_vmem [thread:$0]  %s7758_s2, 2048, %s52_s26, [#allocation9], %s6482_s23, %s6482_s23, %s6483_s24  }
  0x58   :  { %s6381_s19 = scalar_lea.hbm %s7761_s5, 8192 }
  0x59   :  { %p6382_p12 = scmp.ne.s32.totalorder %s7761_s5, %s6381_s19  ;;  %p6385_p13 = scmp.lt.u32.totalorder %s6381_s19, %s7761_s5 }
  0x5b   :  { %p6387_p0 = pnand %p6385_p13, %p6382_p12 }
  0x5d   :  { %6390 = shalt.err (!%p6387_p0)
}
  0x5e   :  { %s6391_s27 = scalar_lea.vmem %s6610_s29, 8192  ;;  %p6396_p2 = scmp.lt.s32.totalorder %s6610_s29, %s6610_s29 }
  0x5f   :  { %p6392_p1 = scmp.ne.s32.totalorder %s6610_s29, %s6391_s27  ;;  %p6397_p3 = scmp.lt.s32.totalorder %s6391_s27, %s6391_s27 }
  0x61   :  { %p6398_p4 = por %p6397_p3, %p6396_p2 }
  0x63   :  { %p6399_p5 = pnand %p6398_p4, %p6392_p1 }
  0x65   :  { %6402 = shalt.err (!%p6399_p5)
}
  0x66   :  { %83 = dma.hbm_to_vmem [thread:$0]  %s7761_s5, 8192, %s6610_s29, [#allocation12], %s6482_s23, %s6482_s23, %s6483_s24  }
  0x67   :  { %s6491_s11 = smov [#allocation16]   ;;  %s6403_s15 = scalar_lea.hbm %s7764_s8, 8192 }
  0x68   :  { %s103_s4 = sshll.u32 %s6491_s11, 4  ;;  %p6404_p6 = scmp.ne.s32.totalorder %s7764_s8, %s6403_s15  ;;  %s104_s4 = int_to_ptr.vmem [resolvable:$true] %s103_s4 }
  0x69   :  { %p6407_p7 = scmp.lt.u32.totalorder %s6403_s15, %s7764_s8 }
  0x6b   :  { %p6409_p8 = pnand %p6407_p7, %p6404_p6 }
  0x6d   :  { %6412 = shalt.err (!%p6409_p8)
}
  0x6e   :  { %s6413_s18 = scalar_lea.vmem %s104_s4, 8192  ;;  %p6418_p10 = scmp.lt.s32.totalorder %s104_s4, %s104_s4 }
  0x6f   :  { %p6414_p9 = scmp.ne.s32.totalorder %s104_s4, %s6413_s18  ;;  %p6419_p11 = scmp.lt.s32.totalorder %s6413_s18, %s6413_s18 }
  0x71   :  { %p6420_p12 = por %p6419_p11, %p6418_p10 }
  0x73   :  { %p6421_p13 = pnand %p6420_p12, %p6414_p9 }
  0x75   :  { %6424 = shalt.err (!%p6421_p13)
}
  0x76   :  { %109 = dma.hbm_to_vmem [thread:$0]  %s7764_s8, 8192, %s104_s4, [#allocation15], %s6482_s23, %s6482_s23, %s6483_s24  }
  0x77   :  { %6469 = dma.done.wait [#allocation6], 1024  }
  0x78   :  { %6470 = vsyncadd [#allocation6], 4294966272 }
  0x79   :  { %6471 = dma.done.wait [#allocation9], 4096  }
  0x7a   :  { %6472 = vsyncadd [#allocation9], 4294963200 }
  0x7b   :  { %6473 = dma.done.wait [#allocation12], 16384  }
  0x7c   :  { %6474 = vsyncadd [#allocation12], 4294950912 }
  0x7d   :  { %6475 = dma.done.wait [#allocation15], 16384  }
  0x7e   :  { %6476 = vsyncadd [#allocation15], 4294950912  ;;  %v6492_v0 = vmov 0.0   ;;  %v140_v1 = vld [vmem:[#allocation8 + $0x8] sm:$0xff]  ;;  %v142_v3 = vld [vmem:[#allocation8 + $0x18] sm:$0xff]  ;;  %vm177_vm0 = vcmask 261120  }
  0x7f   :  { %266 = vmatprep.mubr.f32.mxu0 %v6492_v0  ;;  %379 = vmatprep.mubr.f32.mxu1 %v6492_v0  ;;  %v144_v2 = vld [vmem:[#allocation8 + $0x28] sm:$0xff]  ;;  %v146_v5 = vld [vmem:[#allocation8 + $0x38] sm:$0xff]  ;;  %v139_v6 = vld [vmem:[#allocation8] sm:$0xff]  ;;  %vm981_vm1 = vcmask 523264   ;;  %vm984_vm2 = vcmask 1048064   ;;  %s6494_s14 = smov [#allocation18]  }
  0x80   :  { %v4625_v4 = vpack.c.bf16 %v144_v2, %v140_v1  ;;  %v143_v7 = vld [vmem:[#allocation8 + $0x20] sm:$0xff]  ;;  %v4633_v8 = vpack.c.bf16 %v146_v5, %v142_v3  ;;  %v141_v10 = vld [vmem:[#allocation8 + $0x10] sm:$0xff]  ;;  %v148_v12 = vld [vmem:[#allocation8 + $0x48] sm:$0xff]  ;;  %s4529_s19 = sshll.u32 %s6494_s14, 4  ;;  %s7720_s19 = int_to_ptr.vmem [resolvable:$true] %s4529_s19 }
  0x81   :  { %v4627_v9 = vpack.c.bf16 %v143_v7, %v139_v6  ;;  %v145_v11 = vld [vmem:[#allocation8 + $0x30] sm:$0xff]  ;;  %v152_v14 = vld [vmem:[#allocation8 + $0x68] sm:$0xff]  ;;  %v150_v15 = vld [vmem:[#allocation8 + $0x58] sm:$0xff] }
  0x82   :  { %4626 = vmatprep.subr.bf16.mxu0 %v4625_v4  ;;  %v4635_v13 = vpack.c.bf16 %v145_v11, %v141_v10  ;;  %v154_v16 = vld [vmem:[#allocation8 + $0x78] sm:$0xff]  ;;  %4634 = vmatprep.subr.bf16.mxu1 %v4633_v8  ;;  %v4629_v17 = vpack.c.bf16 %v152_v14, %v148_v12  ;;  %v147_v19 = vld [vmem:[#allocation8 + $0x40] sm:$0xff]  ;;  %v149_v21 = vld [vmem:[#allocation8 + $0x50] sm:$0xff] }
  0x83   :  { %4628 = vmatpush1.bf16.msra.mxu0 %v4627_v9  ;;  %v4637_v18 = vpack.c.bf16 %v154_v16, %v150_v15  ;;  %v151_v20 = vld [vmem:[#allocation8 + $0x60] sm:$0xff]  ;;  %v153_v23 = vld [vmem:[#allocation8 + $0x70] sm:$0xff]  ;;  %v461_v24 = vld [vmem:[#allocation10 + $0x8] sm:$0xff] }
  0x84   :  { %4636 = vmatpush1.bf16.msra.mxu1 %v4635_v13  ;;  %v4631_v22 = vpack.c.bf16 %v151_v20, %v147_v19  ;;  %4630 = vmatprep.subr.bf16.mxu0 %v4629_v17  ;;  %v4639_v25 = vpack.c.bf16 %v153_v23, %v149_v21  ;;  %v465_v26 = vld [vmem:[#allocation10 + $0x28] sm:$0xff]  ;;  %v460_v27 = vld [vmem:[#allocation10] sm:$0xff]  ;;  %v463_v32 = vld [vmem:[#allocation10 + $0x18] sm:$0xff] }
  0x85   :  { %4638 = vmatprep.subr.bf16.mxu1 %v4637_v18  ;;  %v464_v28 = vld [vmem:[#allocation10 + $0x20] sm:$0xff]  ;;  %v4641_v29 = vpack.c.bf16 %v465_v26, %v461_v24  ;;  %v467_v33 = vld [vmem:[#allocation10 + $0x38] sm:$0xff]  ;;  %v462_v35 = vld [vmem:[#allocation10 + $0x10] sm:$0xff] }
  0x86   :  { %v6664_v30 = vld [vmem:[#allocation5] sm:$0xff]  ;;  %v4643_v31 = vpack.c.bf16 %v464_v28, %v460_v27  ;;  %v4649_v34 = vpack.c.bf16 %v467_v33, %v463_v32  ;;  %v466_v36 = vld [vmem:[#allocation10 + $0x30] sm:$0xff]  ;;  %v469_v37 = vld [vmem:[#allocation10 + $0x48] sm:$0xff] }
  0x87   :  { %4632 = vmatpush1.bf16.msra.mxu0 %v4631_v22  ;;  %v4651_v38 = vpack.c.bf16 %v466_v36, %v462_v35  ;;  %v473_v39 = vld [vmem:[#allocation10 + $0x68] sm:$0xff]  ;;  %v468_v40 = vld [vmem:[#allocation10 + $0x40] sm:$0xff]  ;;  %v471_v44 = vld [vmem:[#allocation10 + $0x58] sm:$0xff] }
  0x88   :  { %4640 = vmatpush1.bf16.msra.mxu1 %v4639_v25  ;;  %4642 = vmatprep.subr.bf16.mxu0 %v4641_v29  ;;  %v472_v41 = vld [vmem:[#allocation10 + $0x60] sm:$0xff]  ;;  %v6668_v42 = vld [vmem:[#allocation5 + $0x8] sm:$0xff]  ;;  %v4645_v43 = vpack.c.bf16 %v473_v39, %v469_v37  ;;  %v475_v45 = vld [vmem:[#allocation10 + $0x78] sm:$0xff] }
  0x89   :  { %4650 = vmatprep.subr.bf16.mxu1 %v4649_v34  ;;  %v470_v46 = vld [vmem:[#allocation10 + $0x50] sm:$0xff]  ;;  %v4647_v47 = vpack.c.bf16 %v472_v41, %v468_v40  ;;  %v4653_v48 = vpack.c.bf16 %v475_v45, %v471_v44  ;;  %v735_v50 = vld [vmem:[#allocation11 + $0x8] sm:$0xff]  ;;  %v737_v54 = vld [vmem:[#allocation11 + $0x18] sm:$0xff] }
  0x8a   :  { %4545 = vmatmul.mubr.msk.f32.vlgmr.msra.gmra.mrb[0].mxu0 %vm177_vm0, %v6664_v30  ;;  %v474_v49 = vld [vmem:[#allocation10 + $0x70] sm:$0xff]  ;;  %v739_v51 = vld [vmem:[#allocation11 + $0x28] sm:$0xff]  ;;  %v741_v55 = vld [vmem:[#allocation11 + $0x38] sm:$0xff] }
  0x8b   :  { %4553 = vmatmul.mubr.msk.f32.vlgmr.msra.gmra.mrb[0].mxu1 %vm177_vm0, %v6664_v30  ;;  %4644 = vmatpush1.bf16.msra.mxu0 %v4643_v31  ;;  %v4655_v52 = vpack.c.bf16 %v474_v49, %v470_v46  ;;  %v6674_v53 = vpack.c.bf16 %v739_v51, %v735_v50  ;;  %v6681_v56 = vld [vmem:[#allocation5 + $0x10] sm:$0xff]  ;;  %v6683_v57 = vpack.c.bf16 %v741_v55, %v737_v54  ;;  %v6693_v58 = vld [vmem:[#allocation5 + $0x18] sm:$0xff]  ;;  %v6701_v59 = vld [vmem:[#allocation5 + $0x20] sm:$0xff] }
  0x8c   :  { %272 = vmatprep.mubr.f32.mxu0 %v6492_v0  ;;  %385 = vmatprep.mubr.f32.mxu1 %v6492_v0  ;;  %v6709_v60 = vld [vmem:[#allocation5 + $0x28] sm:$0xff]  ;;  %v6717_v61 = vld [vmem:[#allocation5 + $0x30] sm:$0xff]  ;;  %v6725_v62 = vld [vmem:[#allocation5 + $0x38] sm:$0xff] }
  0x8d   :  { %4652 = vmatpush1.bf16.msra.mxu1 %v4651_v38  ;;  %4646 = vmatprep.subr.bf16.mxu0 %v4645_v43  ;;  %v734_v63 = vld [vmem:[#allocation11] sm:$0xff]  ;;  %v743_v2 = vld [vmem:[#allocation11 + $0x48] sm:$0xff]  ;;  %v736_v4 = vld [vmem:[#allocation11 + $0x10] sm:$0xff] }
  0x8e   :  { %4546 = vmatmul.mubr.msk.f32.gmra.mrb[2].mxu0 %vm177_vm0, %v6668_v42  ;;  %4654 = vmatprep.subr.bf16.mxu1 %v4653_v48  ;;  %v738_v1 = vld [vmem:[#allocation11 + $0x20] sm:$0xff]  ;;  %v747_v3 = vld [vmem:[#allocation11 + $0x68] sm:$0xff]  ;;  %v740_v5 = vld [vmem:[#allocation11 + $0x30] sm:$0xff] }
  0x8f   :  { %4554 = vmatmul.mubr.msk.f32.gmra.mrb[2].mxu1 %vm177_vm0, %v6668_v42  ;;  %278 = vmatprep.mubr.f32.mxu0 %v6492_v0  ;;  %v6734_v6 = vpack.c.bf16 %v738_v1, %v734_v63  ;;  %v745_v7 = vld [vmem:[#allocation11 + $0x58] sm:$0xff]  ;;  %v742_v9 = vld [vmem:[#allocation11 + $0x40] sm:$0xff]  ;;  %v6736_v11 = vpack.c.bf16 %v747_v3, %v743_v2  ;;  %v6738_v12 = vpack.c.bf16 %v740_v5, %v736_v4  ;;  %v751_v13 = vld [vmem:[#allocation11 + $0x88] sm:$0xff] }
  0x90   :  { %391 = vmatprep.mubr.f32.mxu1 %v6492_v0  ;;  %4648 = vmatpush1.bf16.msra.mxu0 %v4647_v47  ;;  %v749_v8 = vld [vmem:[#allocation11 + $0x78] sm:$0xff]  ;;  %v746_v10 = vld [vmem:[#allocation11 + $0x60] sm:$0xff]  ;;  %v755_v15 = vld [vmem:[#allocation11 + $0xa8] sm:$0xff] }
  0x91   :  { %4656 = vmatpush1.bf16.msra.mxu1 %v4655_v52  ;;  %4658 = vmatprep.subr.bf16.mxu0 %v6674_v53  ;;  %v6742_v14 = vpack.c.bf16 %v749_v8, %v745_v7  ;;  %v744_v16 = vld [vmem:[#allocation11 + $0x50] sm:$0xff]  ;;  %v6747_v18 = vpack.c.bf16 %v746_v10, %v742_v9  ;;  %v753_v19 = vld [vmem:[#allocation11 + $0x98] sm:$0xff]  ;;  %v750_v21 = vld [vmem:[#allocation11 + $0x80] sm:$0xff]  ;;  %v6753_v23 = vpack.c.bf16 %v755_v15, %v751_v13 }
  0x92   :  { %4547 = vmatmul.mubr.msk.f32.gmra.mrb[4].mxu0 %vm177_vm0, %v6681_v56  ;;  %4690 = vmatprep.subr.bf16.mxu1 %v6683_v57  ;;  %v748_v17 = vld [vmem:[#allocation11 + $0x70] sm:$0xff]  ;;  %v757_v20 = vld [vmem:[#allocation11 + $0xb8] sm:$0xff]  ;;  %v754_v22 = vld [vmem:[#allocation11 + $0xa0] sm:$0xff] }
  0x93   :  { %4555 = vmatmul.mubr.msk.f32.gmra.mrb[4].mxu1 %vm177_vm0, %v6681_v56  ;;  %284 = vmatprep.mubr.f32.mxu0 %v6492_v0  ;;  %v6755_v24 = vpack.c.bf16 %v748_v17, %v744_v16  ;;  %v752_v25 = vld [vmem:[#allocation11 + $0x90] sm:$0xff]  ;;  %v6760_v26 = vpack.c.bf16 %v757_v20, %v753_v19  ;;  %v759_v28 = vld [vmem:[#allocation11 + $0xc8] sm:$0xff]  ;;  %v761_v31 = vld [vmem:[#allocation11 + $0xd8] sm:$0xff] }
  0x94   :  { %397 = vmatprep.mubr.f32.mxu1 %v6492_v0  ;;  %v756_v27 = vld [vmem:[#allocation11 + $0xb0] sm:$0xff]  ;;  %v763_v29 = vld [vmem:[#allocation11 + $0xe8] sm:$0xff]  ;;  %v765_v32 = vld [vmem:[#allocation11 + $0xf8] sm:$0xff] }
  0x95   :  { %v6771_v33 = vpack.c.bf16 %v756_v27, %v752_v25  ;;  %v6773_v34 = vpack.c.bf16 %v763_v29, %v759_v28  ;;  %v758_v35 = vld [vmem:[#allocation11 + $0xc0] sm:$0xff]  ;;  %v760_v37 = vld [vmem:[#allocation11 + $0xd0] sm:$0xff]  ;;  %v6778_v38 = vpack.c.bf16 %v765_v32, %v761_v31  ;;  %v767_v40 = vld [vmem:[#allocation11 + $0x108] sm:$0xff] }
  0x96   :  { %4548 = vmatmul.mubr.msk.f32.gmra.mrb[6].mxu0 %vm177_vm0, %v6693_v58  ;;  %v762_v36 = vld [vmem:[#allocation11 + $0xe0] sm:$0xff]  ;;  %v764_v39 = vld [vmem:[#allocation11 + $0xf0] sm:$0xff]  ;;  %v771_v41 = vld [vmem:[#allocation11 + $0x128] sm:$0xff] }
  0x97   :  { %4556 = vmatmul.mubr.msk.f32.gmra.mrb[6].mxu1 %vm177_vm0, %v6693_v58  ;;  %290 = vmatprep.mubr.f32.mxu0 %v6492_v0  ;;  %v773_v43 = vld [vmem:[#allocation11 + $0x138] sm:$0xff]  ;;  %v6785_v44 = vpack.c.bf16 %v762_v36, %v758_v35  ;;  %v6789_v45 = vpack.c.bf16 %v764_v39, %v760_v37  ;;  %v6791_v46 = vpack.c.bf16 %v771_v41, %v767_v40  ;;  %v766_v47 = vld [vmem:[#allocation11 + $0x100] sm:$0xff]  ;;  %v768_v49 = vld [vmem:[#allocation11 + $0x110] sm:$0xff] }
  0x98   :  { %403 = vmatprep.mubr.f32.mxu1 %v6492_v0  ;;  %v770_v48 = vld [vmem:[#allocation11 + $0x120] sm:$0xff]  ;;  %v772_v51 = vld [vmem:[#allocation11 + $0x130] sm:$0xff]  ;;  %v775_v52 = vld [vmem:[#allocation11 + $0x148] sm:$0xff] }
  0x99   :  { %v779_v54 = vld [vmem:[#allocation11 + $0x168] sm:$0xff]  ;;  %v777_v55 = vld [vmem:[#allocation11 + $0x158] sm:$0xff]  ;;  %v6803_v63 = vpack.c.bf16 %v770_v48, %v766_v47  ;;  %v6807_v1 = vpack.c.bf16 %v772_v51, %v768_v49  ;;  %v774_v3 = vld [vmem:[#allocation11 + $0x140] sm:$0xff] }
  0x9a   :  { %4549 = vmatmul.mubr.msk.f32.gmra.mrb[8].mxu0 %vm177_vm0, %v6701_v59  ;;  %v6809_v2 = vpack.c.bf16 %v779_v54, %v775_v52  ;;  %v776_v4 = vld [vmem:[#allocation11 + $0x150] sm:$0xff]  ;;  %v783_v8 = vld [vmem:[#allocation11 + $0x188] sm:$0xff]  ;;  %v785_v10 = vld [vmem:[#allocation11 + $0x198] sm:$0xff] }
  0x9b   :  { %4557 = vmatmul.mubr.msk.f32.gmra.mrb[8].mxu1 %vm177_vm0, %v6701_v59  ;;  %296 = vmatprep.mubr.f32.mxu0 %v6492_v0  ;;  %v780_v7 = vld [vmem:[#allocation11 + $0x170] sm:$0xff]  ;;  %v787_v9 = vld [vmem:[#allocation11 + $0x1a8] sm:$0xff]  ;;  %v789_v13 = vld [vmem:[#allocation11 + $0x1b8] sm:$0xff] }
  0x9c   :  { %409 = vmatprep.mubr.f32.mxu1 %v6492_v0  ;;  %v6825_v16 = vpack.c.bf16 %v780_v7, %v776_v4  ;;  %v6827_v17 = vpack.c.bf16 %v787_v9, %v783_v8  ;;  %v782_v19 = vld [vmem:[#allocation11 + $0x180] sm:$0xff]  ;;  %v784_v20 = vld [vmem:[#allocation11 + $0x190] sm:$0xff]  ;;  %v791_v25 = vld [vmem:[#allocation11 + $0x1c8] sm:$0xff] }
  0x9d   :  { %v795_v27 = vld [vmem:[#allocation11 + $0x1e8] sm:$0xff]  ;;  %v793_v28 = vld [vmem:[#allocation11 + $0x1d8] sm:$0xff]  ;;  %v790_v36 = vld [vmem:[#allocation11 + $0x1c0] sm:$0xff] }
  0x9e   :  { %4550 = vmatmul.mubr.msk.f32.gmra.mrb[10].mxu0 %vm177_vm0, %v6709_v60  ;;  %v797_v29 = vld [vmem:[#allocation11 + $0x1f8] sm:$0xff]  ;;  %v6845_v35 = vpack.c.bf16 %v795_v27, %v791_v25  ;;  %v792_v39 = vld [vmem:[#allocation11 + $0x1d0] sm:$0xff]  ;;  %v155_v47 = vld [vmem:[%s7759_s3] sm:$0xf] }
  0x9f   :  { %4558 = vmatmul.mubr.msk.f32.gmra.mrb[10].mxu1 %vm177_vm0, %v6709_v60  ;;  %302 = vmatprep.mubr.f32.mxu0 %v6492_v0  ;;  %v6850_v37 = vpack.c.bf16 %v797_v29, %v793_v28  ;;  %v796_v40 = vld [vmem:[#allocation11 + $0x1f0] sm:$0xff] }
  0xa0   :  { %415 = vmatprep.mubr.f32.mxu1 %v6492_v0 }
  0xa2   :  { %4551 = vmatmul.mubr.msk.f32.gmra.mrb[12].mxu0 %vm177_vm0, %v6717_v61 }
  0xa3   :  { %4559 = vmatmul.mubr.msk.f32.gmra.mrb[12].mxu1 %vm177_vm0, %v6717_v61  ;;  %308 = vmatprep.mubr.f32.mxu0 %v6492_v0 }
  0xa4   :  { %421 = vmatprep.mubr.f32.mxu1 %v6492_v0 }
  0xa6   :  { %4552 = vmatmul.mubr.msk.f32.gmra.mrb[14].mxu0 %vm177_vm0, %v6725_v62 }
  0xa7   :  { %4560 = vmatmul.mubr.msk.f32.gmra.mrb[14].mxu1 %vm177_vm0, %v6725_v62  ;;  %540 = vmatprep.mubr.f32.mxu0 %v6492_v0 }
  0xa8   :  { %653 = vmatprep.mubr.f32.mxu1 %v6492_v0 }
  0xae   :  { %4561 = vmatmul.mubr.msk.f32.vlgmr.msra.gmra.mrb[14].mxu0 %vm177_vm0, %v6664_v30 }
  0xaf   :  { %4569 = vmatmul.mubr.msk.f32.vlgmr.msra.gmra.mrb[14].mxu1 %vm177_vm0, %v6664_v30  ;;  %4660 = vmatpush1.bf16.msra.mxu0 %v6734_v6  ;;  %v6765_v30 = vpack.c.bf16 %v754_v22, %v750_v21  ;;  %v6832_v21 = vpack.c.bf16 %v789_v13, %v785_v10  ;;  %v788_v22 = vld [vmem:[#allocation11 + $0x1b0] sm:$0xff] }
  0xb0   :  { %546 = vmatprep.mubr.f32.mxu0 %v6492_v0  ;;  %659 = vmatprep.mubr.f32.mxu1 %v6492_v0  ;;  %v6843_v32 = vpack.c.bf16 %v788_v22, %v784_v20 }
  0xb1   :  { %4662 = vmatprep.subr.bf16.mxu0 %v6736_v11  ;;  %4692 = vmatpush1.bf16.msra.mxu1 %v6738_v12 }
  0xb2   :  { %4562 = vmatmul.mubr.msk.f32.gmra.mrb[12].mxu0 %vm177_vm0, %v6668_v42  ;;  %4694 = vmatprep.subr.bf16.mxu1 %v6742_v14 }
  0xb3   :  { %4570 = vmatmul.mubr.msk.f32.gmra.mrb[12].mxu1 %vm177_vm0, %v6668_v42  ;;  %4664 = vmatpush1.bf16.msra.mxu0 %v6747_v18  ;;  %v769_v42 = vld [vmem:[#allocation11 + $0x118] sm:$0xff] }
  0xb4   :  { %552 = vmatprep.mubr.f32.mxu0 %v6492_v0  ;;  %665 = vmatprep.mubr.f32.mxu1 %v6492_v0  ;;  %v6796_v50 = vpack.c.bf16 %v773_v43, %v769_v42  ;;  %v6861_v42 = vpack.c.bf16 %v796_v40, %v792_v39 }
  0xb5   :  { %4666 = vmatprep.subr.bf16.mxu0 %v6753_v23  ;;  %4696 = vmatpush1.bf16.msra.mxu1 %v6755_v24 }
  0xb6   :  { %4563 = vmatmul.mubr.msk.f32.gmra.mrb[10].mxu0 %vm177_vm0, %v6681_v56  ;;  %4698 = vmatprep.subr.bf16.mxu1 %v6760_v26 }
  0xb7   :  { %4571 = vmatmul.mubr.msk.f32.gmra.mrb[10].mxu1 %vm177_vm0, %v6681_v56  ;;  %4668 = vmatpush1.bf16.msra.mxu0 %v6765_v30  ;;  %v781_v56 = vld [vmem:[#allocation11 + $0x178] sm:$0xff] }
  0xb8   :  { %558 = vmatprep.mubr.f32.mxu0 %v6492_v0  ;;  %671 = vmatprep.mubr.f32.mxu1 %v6492_v0  ;;  %v6814_v5 = vpack.c.bf16 %v781_v56, %v777_v55 }
  0xb9   :  { %4700 = vmatpush1.bf16.msra.mxu1 %v6771_v33  ;;  %4670 = vmatprep.subr.bf16.mxu0 %v6773_v34 }
  0xba   :  { %4564 = vmatmul.mubr.msk.f32.gmra.mrb[8].mxu0 %vm177_vm0, %v6693_v58  ;;  %4702 = vmatprep.subr.bf16.mxu1 %v6778_v38 }
  0xbb   :  { %4572 = vmatmul.mubr.msk.f32.gmra.mrb[8].mxu1 %vm177_vm0, %v6693_v58  ;;  %564 = vmatprep.mubr.f32.mxu0 %v6492_v0  ;;  %v778_v58 = vld [vmem:[#allocation11 + $0x160] sm:$0xff] }
  0xbc   :  { %677 = vmatprep.mubr.f32.mxu1 %v6492_v0  ;;  %4672 = vmatpush1.bf16.msra.mxu0 %v6785_v44  ;;  %v6821_v15 = vpack.c.bf16 %v778_v58, %v774_v3 }
  0xbd   :  { %4704 = vmatpush1.bf16.msra.mxu1 %v6789_v45  ;;  %4674 = vmatprep.subr.bf16.mxu0 %v6791_v46 }
  0xbe   :  { %4565 = vmatmul.mubr.msk.f32.gmra.mrb[6].mxu0 %vm177_vm0, %v6701_v59  ;;  %4706 = vmatprep.subr.bf16.mxu1 %v6796_v50 }
  0xbf   :  { %4573 = vmatmul.mubr.msk.f32.gmra.mrb[6].mxu1 %vm177_vm0, %v6701_v59  ;;  %570 = vmatprep.mubr.f32.mxu0 %v6492_v0  ;;  %v786_v59 = vld [vmem:[#allocation11 + $0x1a0] sm:$0xff] }
  0xc0   :  { %683 = vmatprep.mubr.f32.mxu1 %v6492_v0  ;;  %4676 = vmatpush1.bf16.msra.mxu0 %v6803_v63  ;;  %v6839_v31 = vpack.c.bf16 %v786_v59, %v782_v19 }
  0xc1   :  { %4708 = vmatpush1.bf16.msra.mxu1 %v6807_v1  ;;  %4678 = vmatprep.subr.bf16.mxu0 %v6809_v2 }
  0xc2   :  { %4566 = vmatmul.mubr.msk.f32.gmra.mrb[4].mxu0 %vm177_vm0, %v6709_v60  ;;  %4710 = vmatprep.subr.bf16.mxu1 %v6814_v5 }
  0xc3   :  { %4574 = vmatmul.mubr.msk.f32.gmra.mrb[4].mxu1 %vm177_vm0, %v6709_v60  ;;  %576 = vmatprep.mubr.f32.mxu0 %v6492_v0  ;;  %v794_v60 = vld [vmem:[#allocation11 + $0x1e0] sm:$0xff] }
  0xc4   :  { %689 = vmatprep.mubr.f32.mxu1 %v6492_v0  ;;  %4680 = vmatpush1.bf16.msra.mxu0 %v6821_v15  ;;  %v6857_v41 = vpack.c.bf16 %v794_v60, %v790_v36 }
  0xc5   :  { %4712 = vmatpush1.bf16.msra.mxu1 %v6825_v16  ;;  %4682 = vmatprep.subr.bf16.mxu0 %v6827_v17 }
  0xc6   :  { %4567 = vmatmul.mubr.msk.f32.gmra.mrb[2].mxu0 %vm177_vm0, %v6717_v61  ;;  %4714 = vmatprep.subr.bf16.mxu1 %v6832_v21 }
  0xc7   :  { %4575 = vmatmul.mubr.msk.f32.gmra.mrb[2].mxu1 %vm177_vm0, %v6717_v61  ;;  %582 = vmatprep.mubr.f32.mxu0 %v6492_v0  ;;  %v157_v61 = vlaneseq }
  0xc8   :  { %695 = vmatprep.mubr.f32.mxu1 %v6492_v0  ;;  %4684 = vmatpush1.bf16.msra.mxu0 %v6839_v31 }
  0xc9   :  { %4716 = vmatpush1.bf16.msra.mxu1 %v6843_v32  ;;  %4686 = vmatprep.subr.bf16.mxu0 %v6845_v35 }
  0xca   :  { %4568 = vmatmul.mubr.msk.f32.gmra.mrb[0].mxu0 %vm177_vm0, %v6725_v62  ;;  %4718 = vmatprep.subr.bf16.mxu1 %v6850_v37 }
  0xcb   :  { %4576 = vmatmul.mubr.msk.f32.gmra.mrb[0].mxu1 %vm177_vm0, %v6725_v62  ;;  %875 = vmatprep.mubr.f32.mxu0 %v6492_v0  ;;  %v6910_v62 = vshrl.u32 %v157_v61, 7 }
  0xcc   :  { %4688 = vmatpush1.bf16.msra.mxu0 %v6857_v41  ;;  %946 = vmatprep.mubr.f32.mxu1 %v6492_v0 }
  0xcd   :  { %4720 = vmatpush1.bf16.msra.mxu1 %v6861_v42  ;;  %4722 = vmatprep.subr.bf16.mxu0 %v6674_v53  ;;  %v159_v43 = vsub.s32 0, %v6910_v62  ;;  %v163_v48 = vsub.s32 1, %v6910_v62  ;;  %v171_v54 = vsub.s32 3, %v6910_v62  ;;  %v167_v10 = vsub.s32 2, %v6910_v62 }
  0xce   :  { %4754 = vmatprep.subr.bf16.mxu1 %v6683_v57 }
  0xcf   :  { %v6919_v49 = vrot.slane %v155_v47, %v159_v43  ;;  %v6923_v51 = vrot.slane %v155_v47, %v163_v48  ;;  %v6930_v9 = vrot.slane %v155_v47, %v171_v54  ;;  %v6936_v19 = vrot.slane %v155_v47, %v167_v10 }
  0xd2   :  { %876 = vmatmul.mubr.f32.vlgmr.msra.gmra.mrb[0].mxu0 %v6492_v0 }
  0xd3   :  { %947 = vmatmul.mubr.f32.vlgmr.msra.gmra.mrb[0].mxu1 %v6492_v0  ;;  %4724 = vmatpush1.bf16.msra.mxu0 %v6734_v6 }
  0xd4   :  { %4756 = vmatpush1.bf16.msra.mxu1 %v6738_v12  ;;  %4726 = vmatprep.subr.bf16.mxu0 %v6736_v11 }
  0xd5   :  { %4758 = vmatprep.subr.bf16.mxu1 %v6742_v14  ;;  %1064 = vmatprep.mubr.f32.mxu0 %v6492_v0 }
  0xd6   :  { %1135 = vmatprep.mubr.f32.mxu1 %v6492_v0 }
  0xd7   :  { %4728 = vmatpush1.bf16.msra.mxu0 %v6747_v18 }
  0xd8   :  { %4760 = vmatpush1.bf16.msra.mxu1 %v6755_v24  ;;  %4730 = vmatprep.subr.bf16.mxu0 %v6753_v23 }
  0xd9   :  { %4762 = vmatprep.subr.bf16.mxu1 %v6760_v26 }
  0xdb   :  { %4732 = vmatpush1.bf16.msra.mxu0 %v6765_v30 }
  0xdc   :  { %4764 = vmatpush1.bf16.msra.mxu1 %v6771_v33  ;;  %4734 = vmatprep.subr.bf16.mxu0 %v6773_v34 }
  0xdd   :  { %4766 = vmatprep.subr.bf16.mxu1 %v6778_v38 }
  0xdf   :  { %4736 = vmatpush1.bf16.msra.mxu0 %v6785_v44 }
  0xe0   :  { %4768 = vmatpush1.bf16.msra.mxu1 %v6789_v45  ;;  %4738 = vmatprep.subr.bf16.mxu0 %v6791_v46 }
  0xe1   :  { %4770 = vmatprep.subr.bf16.mxu1 %v6796_v50 }
  0xe3   :  { %4740 = vmatpush1.bf16.msra.mxu0 %v6803_v63 }
  0xe4   :  { %4772 = vmatpush1.bf16.msra.mxu1 %v6807_v1  ;;  %4742 = vmatprep.subr.bf16.mxu0 %v6809_v2 }
  0xe5   :  { %4774 = vmatprep.subr.bf16.mxu1 %v6814_v5 }
  0xe7   :  { %4744 = vmatpush1.bf16.msra.mxu0 %v6821_v15 }
  0xe8   :  { %4776 = vmatpush1.bf16.msra.mxu1 %v6825_v16  ;;  %4746 = vmatprep.subr.bf16.mxu0 %v6827_v17 }
  0xe9   :  { %4778 = vmatprep.subr.bf16.mxu1 %v6832_v21 }
  0xeb   :  { %4748 = vmatpush1.bf16.msra.mxu0 %v6839_v31 }
  0xec   :  { %4780 = vmatpush1.bf16.msra.mxu1 %v6843_v32  ;;  %4750 = vmatprep.subr.bf16.mxu0 %v6845_v35 }
  0xed   :  { %4782 = vmatprep.subr.bf16.mxu1 %v6850_v37 }
  0xef   :  { %4752 = vmatpush1.bf16.msra.mxu0 %v6857_v41 }
  0xf0   :  { %4784 = vmatpush1.bf16.msra.mxu1 %v6861_v42  ;;  %4786 = vmatprep.subr.bf16.mxu0 %v6674_v53 }
  0xf1   :  { %4818 = vmatprep.subr.bf16.mxu1 %v6683_v57 }
 0x1a5   :  { %v877_v52 = vpop.f32.mrb[0].mxu0 }
 0x1a6   :  { %v5809_v55 = vadd.f32 %v877_v52, %v6919_v49  ;;  %v948_v56 = vpop.f32.mrb[0].mxu1  ;;  %v879_v3 = vpop.f32.mrb[1].mxu0 }
 0x1a7   :  { %v5810_v58 = vadd.f32 %v879_v3, %v6923_v51  ;;  %v950_v4 = vpop.f32.mrb[1].mxu1  ;;  %v5825_v20 = vadd.f32 %v948_v56, %v6936_v19 }
 0x1a8   :  { %v4577_v7 = vmul.f32 -1.442695, %v5809_v55  ;;  %v5826_v13 = vadd.f32 %v950_v4, %v6930_v9 }
 0x1a9   :  { %v4578_v8 = vmul.f32 -1.442695, %v5810_v58 }
 0x1aa   :  { %6015 = vpow2.f32 %v4577_v7  ;;  %v4579_v59 = vmul.f32 -1.442695, %v5826_v13 }
 0x1ab   :  { %6017 = vpow2.f32 %v4578_v8 }
 0x1ac   :  { %6019 = vpow2.f32 %v4579_v59 }
 0x1ad   :  { %6021 = vtanh.f32 %v5825_v20 }
 0x1b4   :  { %v6016_v22 = vpop.eup %6015 }
 0x1b5   :  { %v6018_v25 = vpop.eup %6017  ;;  %v960_v27 = vadd.f32 1.0, %v6016_v22 }
 0x1b6   :  { %v966_v28 = vadd.f32 1.0, %v6018_v25  ;;  %v6020_v29 = vpop.eup %6019 }
 0x1b7   :  { %6023 = vrcp.f32 %v960_v27  ;;  %v6022_v36 = vpop.eup %6021  ;;  %v973_v61 = vadd.f32 1.0, %v6020_v29 }
 0x1b8   :  { %6025 = vrcp.f32 %v966_v28 }
 0x1b9   :  { %6027 = vrcp.f32 %v973_v61 }
 0x1c1   :  { %v6024_v60 = vpop.eup %6023 }
 0x1c2   :  { %v6026_v39 = vpop.eup %6025  ;;  %v977_v40 = vmul.f32 %v6024_v60, %v6022_v36 }
 0x1c3   :  { %v976_v52 = vmul.f32 0.0, %v6026_v39  ;;  %v6028_v55 = vpop.eup %6027 }
 0x1c5   :  { %v6939_v47 = vadd.f32 %v977_v40, %v976_v52 }
 0x1c7   :  { %6029 = vtanh.f32 %v6939_v47 }
 0x1d1   :  { %v6030_v56 = vpop.eup %6029 }
 0x1d2   :  { %v980_v3 = vmul.f32 %v6030_v56, %v6028_v55 }
 0x1d4   :  { %982 = vst.msk [vmem:[#allocation2] sm:$0xff] %vm981_vm1, %v980_v3  ;;  %1065 = vmatmul.mubr.f32.vlgmr.msra.gmra.mrb[2].mxu0 %v980_v3  ;;  %1136 = vmatmul.mubr.f32.vlgmr.msra.gmra.mrb[2].mxu1 %v980_v3 }
 0x1d5   :  { %985 = vst.msk [vmem:[#allocation2 + $0x38] sm:$0xff] %vm984_vm2, %v980_v3  ;;  %4788 = vmatpush1.bf16.msra.mxu0 %v6734_v6  ;;  %4820 = vmatpush1.bf16.msra.mxu1 %v6738_v12 }
 0x1d6   :  { %4790 = vmatprep.subr.bf16.mxu0 %v6736_v11  ;;  %4822 = vmatprep.subr.bf16.mxu1 %v6742_v14 }
 0x1d7   :  { %1252 = vmatprep.mubr.f32.mxu0 %v6492_v0  ;;  %1323 = vmatprep.mubr.f32.mxu1 %v6492_v0 }
 0x1d9   :  { %4792 = vmatpush1.bf16.msra.mxu0 %v6747_v18  ;;  %4824 = vmatpush1.bf16.msra.mxu1 %v6755_v24 }
 0x1da   :  { %4794 = vmatprep.subr.bf16.mxu0 %v6753_v23  ;;  %4826 = vmatprep.subr.bf16.mxu1 %v6760_v26 }
 0x1dd   :  { %4796 = vmatpush1.bf16.msra.mxu0 %v6765_v30  ;;  %4828 = vmatpush1.bf16.msra.mxu1 %v6771_v33 }
 0x1de   :  { %4798 = vmatprep.subr.bf16.mxu0 %v6773_v34  ;;  %4830 = vmatprep.subr.bf16.mxu1 %v6778_v38 }
 0x1e1   :  { %4800 = vmatpush1.bf16.msra.mxu0 %v6785_v44  ;;  %4832 = vmatpush1.bf16.msra.mxu1 %v6789_v45 }
 0x1e2   :  { %4802 = vmatprep.subr.bf16.mxu0 %v6791_v46  ;;  %4834 = vmatprep.subr.bf16.mxu1 %v6796_v50 }
 0x1e5   :  { %4804 = vmatpush1.bf16.msra.mxu0 %v6803_v63  ;;  %4836 = vmatpush1.bf16.msra.mxu1 %v6807_v1 }
 0x1e6   :  { %4806 = vmatprep.subr.bf16.mxu0 %v6809_v2  ;;  %4838 = vmatprep.subr.bf16.mxu1 %v6814_v5 }
 0x1e9   :  { %4808 = vmatpush1.bf16.msra.mxu0 %v6821_v15  ;;  %4840 = vmatpush1.bf16.msra.mxu1 %v6825_v16 }
 0x1ea   :  { %4810 = vmatprep.subr.bf16.mxu0 %v6827_v17  ;;  %4842 = vmatprep.subr.bf16.mxu1 %v6832_v21 }
 0x1ed   :  { %4812 = vmatpush1.bf16.msra.mxu0 %v6839_v31  ;;  %4844 = vmatpush1.bf16.msra.mxu1 %v6843_v32 }
 0x1ee   :  { %4814 = vmatprep.subr.bf16.mxu0 %v6845_v35  ;;  %4846 = vmatprep.subr.bf16.mxu1 %v6850_v37 }
 0x1f1   :  { %4816 = vmatpush1.bf16.msra.mxu0 %v6857_v41  ;;  %4848 = vmatpush1.bf16.msra.mxu1 %v6861_v42 }
 0x1f2   :  { %4850 = vmatprep.subr.bf16.mxu0 %v6674_v53  ;;  %4882 = vmatprep.subr.bf16.mxu1 %v6683_v57 }
 0x2a7   :  { %v1066_v58 = vpop.f32.mrb[2].mxu0  ;;  %v1137_v4 = vpop.f32.mrb[2].mxu1 }
 0x2a8   :  { %v5811_v7 = vadd.f32 %v1066_v58, %v6919_v49  ;;  %v1068_v8 = vpop.f32.mrb[3].mxu0  ;;  %v1139_v13 = vpop.f32.mrb[3].mxu1  ;;  %v5827_v28 = vadd.f32 %v1137_v4, %v6936_v19 }
 0x2a9   :  { %v5812_v59 = vadd.f32 %v1068_v8, %v6923_v51  ;;  %v5828_v25 = vadd.f32 %v1139_v13, %v6930_v9 }
 0x2aa   :  { %v4580_v20 = vmul.f32 -1.442695, %v5811_v7 }
 0x2ab   :  { %v4581_v22 = vmul.f32 -1.442695, %v5812_v59  ;;  %v4582_v27 = vmul.f32 -1.442695, %v5828_v25 }
 0x2ac   :  { %6031 = vpow2.f32 %v4580_v20 }
 0x2ad   :  { %6033 = vpow2.f32 %v4581_v22 }
 0x2ae   :  { %6035 = vpow2.f32 %v4582_v27 }
 0x2af   :  { %6037 = vtanh.f32 %v5827_v28 }
 0x2b6   :  { %v6032_v29 = vpop.eup %6031 }
 0x2b7   :  { %v6034_v36 = vpop.eup %6033  ;;  %v1149_v60 = vadd.f32 1.0, %v6032_v29 }
 0x2b8   :  { %v1155_v39 = vadd.f32 1.0, %v6034_v36  ;;  %v6036_v40 = vpop.eup %6035 }
 0x2b9   :  { %6039 = vrcp.f32 %v1149_v60  ;;  %v6038_v61 = vpop.eup %6037  ;;  %v1162_v3 = vadd.f32 1.0, %v6036_v40 }
 0x2ba   :  { %6041 = vrcp.f32 %v1155_v39 }
 0x2bb   :  { %6043 = vrcp.f32 %v1162_v3 }
 0x2c3   :  { %v6040_v52 = vpop.eup %6039 }
 0x2c4   :  { %v6042_v55 = vpop.eup %6041  ;;  %v1166_v56 = vmul.f32 %v6040_v52, %v6038_v61 }
 0x2c5   :  { %v1165_v58 = vmul.f32 %v6042_v55, %v6939_v47  ;;  %v6044_v4 = vpop.eup %6043 }
 0x2c7   :  { %v6983_v7 = vadd.f32 %v1166_v56, %v1165_v58 }
 0x2c9   :  { %6045 = vtanh.f32 %v6983_v7 }
 0x2d3   :  { %v6046_v8 = vpop.eup %6045 }
 0x2d4   :  { %v1169_v13 = vmul.f32 %v6046_v8, %v6044_v4 }
 0x2d6   :  { %1171 = vst.msk [vmem:[#allocation2 + $0x8] sm:$0xff] %vm981_vm1, %v1169_v13  ;;  %1253 = vmatmul.mubr.f32.vlgmr.msra.gmra.mrb[4].mxu0 %v1169_v13  ;;  %1324 = vmatmul.mubr.f32.vlgmr.msra.gmra.mrb[4].mxu1 %v1169_v13 }
 0x2d7   :  { %1173 = vst.msk [vmem:[#allocation2 + $0x30] sm:$0xff] %vm984_vm2, %v1169_v13  ;;  %4852 = vmatpush1.bf16.msra.mxu0 %v6734_v6  ;;  %4884 = vmatpush1.bf16.msra.mxu1 %v6738_v12 }
 0x2d8   :  { %4854 = vmatprep.subr.bf16.mxu0 %v6736_v11  ;;  %4886 = vmatprep.subr.bf16.mxu1 %v6742_v14 }
 0x2d9   :  { %1440 = vmatprep.mubr.f32.mxu0 %v6492_v0  ;;  %1511 = vmatprep.mubr.f32.mxu1 %v6492_v0 }
 0x2db   :  { %4856 = vmatpush1.bf16.msra.mxu0 %v6747_v18  ;;  %4888 = vmatpush1.bf16.msra.mxu1 %v6755_v24 }
 0x2dc   :  { %4858 = vmatprep.subr.bf16.mxu0 %v6753_v23  ;;  %4890 = vmatprep.subr.bf16.mxu1 %v6760_v26 }
 0x2df   :  { %4860 = vmatpush1.bf16.msra.mxu0 %v6765_v30  ;;  %4892 = vmatpush1.bf16.msra.mxu1 %v6771_v33 }
 0x2e0   :  { %4862 = vmatprep.subr.bf16.mxu0 %v6773_v34  ;;  %4894 = vmatprep.subr.bf16.mxu1 %v6778_v38 }
 0x2e3   :  { %4864 = vmatpush1.bf16.msra.mxu0 %v6785_v44  ;;  %4896 = vmatpush1.bf16.msra.mxu1 %v6789_v45 }
 0x2e4   :  { %4866 = vmatprep.subr.bf16.mxu0 %v6791_v46  ;;  %4898 = vmatprep.subr.bf16.mxu1 %v6796_v50 }
 0x2e7   :  { %4868 = vmatpush1.bf16.msra.mxu0 %v6803_v63  ;;  %4900 = vmatpush1.bf16.msra.mxu1 %v6807_v1 }
 0x2e8   :  { %4870 = vmatprep.subr.bf16.mxu0 %v6809_v2  ;;  %4902 = vmatprep.subr.bf16.mxu1 %v6814_v5 }
 0x2eb   :  { %4872 = vmatpush1.bf16.msra.mxu0 %v6821_v15  ;;  %4904 = vmatpush1.bf16.msra.mxu1 %v6825_v16 }
 0x2ec   :  { %4874 = vmatprep.subr.bf16.mxu0 %v6827_v17  ;;  %4906 = vmatprep.subr.bf16.mxu1 %v6832_v21 }
 0x2ef   :  { %4876 = vmatpush1.bf16.msra.mxu0 %v6839_v31  ;;  %4908 = vmatpush1.bf16.msra.mxu1 %v6843_v32 }
 0x2f0   :  { %4878 = vmatprep.subr.bf16.mxu0 %v6845_v35  ;;  %4910 = vmatprep.subr.bf16.mxu1 %v6850_v37 }
 0x2f3   :  { %4880 = vmatpush1.bf16.msra.mxu0 %v6857_v41  ;;  %4912 = vmatpush1.bf16.msra.mxu1 %v6861_v42 }
 0x2f4   :  { %4914 = vmatprep.subr.bf16.mxu0 %v6674_v53  ;;  %4946 = vmatprep.subr.bf16.mxu1 %v6683_v57 }
 0x3a9   :  { %v1254_v47 = vpop.f32.mrb[4].mxu0  ;;  %v1325_v59 = vpop.f32.mrb[4].mxu1 }
 0x3aa   :  { %v5813_v20 = vadd.f32 %v1254_v47, %v6919_v49  ;;  %v1256_v22 = vpop.f32.mrb[5].mxu0  ;;  %v1327_v25 = vpop.f32.mrb[5].mxu1  ;;  %v5829_v39 = vadd.f32 %v1325_v59, %v6936_v19 }
 0x3ab   :  { %v5814_v27 = vadd.f32 %v1256_v22, %v6923_v51  ;;  %v5830_v36 = vadd.f32 %v1327_v25, %v6930_v9 }
 0x3ac   :  { %v4583_v28 = vmul.f32 -1.442695, %v5813_v20 }
 0x3ad   :  { %v4584_v29 = vmul.f32 -1.442695, %v5814_v27  ;;  %v4585_v60 = vmul.f32 -1.442695, %v5830_v36 }
 0x3ae   :  { %6047 = vpow2.f32 %v4583_v28 }
 0x3af   :  { %6049 = vpow2.f32 %v4584_v29 }
 0x3b0   :  { %6051 = vpow2.f32 %v4585_v60 }
 0x3b1   :  { %6053 = vtanh.f32 %v5829_v39 }
 0x3b8   :  { %v6048_v40 = vpop.eup %6047 }
 0x3b9   :  { %v6050_v61 = vpop.eup %6049  ;;  %v1337_v52 = vadd.f32 1.0, %v6048_v40 }
 0x3ba   :  { %v1343_v55 = vadd.f32 1.0, %v6050_v61  ;;  %v6052_v56 = vpop.eup %6051 }
 0x3bb   :  { %6055 = vrcp.f32 %v1337_v52  ;;  %v6054_v3 = vpop.eup %6053  ;;  %v1350_v13 = vadd.f32 1.0, %v6052_v56 }
 0x3bc   :  { %6057 = vrcp.f32 %v1343_v55 }
 0x3bd   :  { %6059 = vrcp.f32 %v1350_v13 }
 0x3c5   :  { %v6056_v58 = vpop.eup %6055 }
 0x3c6   :  { %v6058_v4 = vpop.eup %6057  ;;  %v1354_v8 = vmul.f32 %v6056_v58, %v6054_v3 }
 0x3c7   :  { %v1353_v47 = vmul.f32 %v6058_v4, %v6983_v7  ;;  %v6060_v59 = vpop.eup %6059 }
 0x3c9   :  { %v7027_v20 = vadd.f32 %v1354_v8, %v1353_v47 }
 0x3cb   :  { %6061 = vtanh.f32 %v7027_v20 }
 0x3d5   :  { %v6062_v22 = vpop.eup %6061 }
 0x3d6   :  { %v1357_v25 = vmul.f32 %v6062_v22, %v6060_v59 }
 0x3d8   :  { %1359 = vst.msk [vmem:[#allocation2 + $0x10] sm:$0xff] %vm981_vm1, %v1357_v25  ;;  %1441 = vmatmul.mubr.f32.vlgmr.msra.gmra.mrb[6].mxu0 %v1357_v25  ;;  %1512 = vmatmul.mubr.f32.vlgmr.msra.gmra.mrb[6].mxu1 %v1357_v25 }
 0x3d9   :  { %1361 = vst.msk [vmem:[#allocation2 + $0x28] sm:$0xff] %vm984_vm2, %v1357_v25  ;;  %4916 = vmatpush1.bf16.msra.mxu0 %v6734_v6  ;;  %4948 = vmatpush1.bf16.msra.mxu1 %v6738_v12 }
 0x3da   :  { %4918 = vmatprep.subr.bf16.mxu0 %v6736_v11  ;;  %4950 = vmatprep.subr.bf16.mxu1 %v6742_v14 }
 0x3db   :  { %1628 = vmatprep.mubr.f32.mxu0 %v6492_v0  ;;  %1699 = vmatprep.mubr.f32.mxu1 %v6492_v0 }
 0x3dd   :  { %4920 = vmatpush1.bf16.msra.mxu0 %v6747_v18  ;;  %4952 = vmatpush1.bf16.msra.mxu1 %v6755_v24 }
 0x3de   :  { %4922 = vmatprep.subr.bf16.mxu0 %v6753_v23  ;;  %4954 = vmatprep.subr.bf16.mxu1 %v6760_v26 }
 0x3e1   :  { %4924 = vmatpush1.bf16.msra.mxu0 %v6765_v30  ;;  %4956 = vmatpush1.bf16.msra.mxu1 %v6771_v33 }
 0x3e2   :  { %4926 = vmatprep.subr.bf16.mxu0 %v6773_v34  ;;  %4958 = vmatprep.subr.bf16.mxu1 %v6778_v38 }
 0x3e5   :  { %4928 = vmatpush1.bf16.msra.mxu0 %v6785_v44  ;;  %4960 = vmatpush1.bf16.msra.mxu1 %v6789_v45 }
 0x3e6   :  { %4930 = vmatprep.subr.bf16.mxu0 %v6791_v46  ;;  %4962 = vmatprep.subr.bf16.mxu1 %v6796_v50 }
 0x3e9   :  { %4932 = vmatpush1.bf16.msra.mxu0 %v6803_v63  ;;  %4964 = vmatpush1.bf16.msra.mxu1 %v6807_v1 }
 0x3ea   :  { %4934 = vmatprep.subr.bf16.mxu0 %v6809_v2  ;;  %4966 = vmatprep.subr.bf16.mxu1 %v6814_v5 }
 0x3ed   :  { %4936 = vmatpush1.bf16.msra.mxu0 %v6821_v15  ;;  %4968 = vmatpush1.bf16.msra.mxu1 %v6825_v16 }
 0x3ee   :  { %4938 = vmatprep.subr.bf16.mxu0 %v6827_v17  ;;  %4970 = vmatprep.subr.bf16.mxu1 %v6832_v21 }
 0x3f1   :  { %4940 = vmatpush1.bf16.msra.mxu0 %v6839_v31  ;;  %4972 = vmatpush1.bf16.msra.mxu1 %v6843_v32 }
 0x3f2   :  { %4942 = vmatprep.subr.bf16.mxu0 %v6845_v35  ;;  %4974 = vmatprep.subr.bf16.mxu1 %v6850_v37 }
 0x3f5   :  { %4944 = vmatpush1.bf16.msra.mxu0 %v6857_v41  ;;  %4976 = vmatpush1.bf16.msra.mxu1 %v6861_v42 }
 0x3f6   :  { %4978 = vmatprep.subr.bf16.mxu0 %v6674_v53  ;;  %5010 = vmatprep.subr.bf16.mxu1 %v6683_v57 }
 0x4ab   :  { %v1442_v7 = vpop.f32.mrb[6].mxu0  ;;  %v1513_v27 = vpop.f32.mrb[6].mxu1 }
 0x4ac   :  { %v5815_v28 = vadd.f32 %v1442_v7, %v6919_v49  ;;  %v1444_v29 = vpop.f32.mrb[7].mxu0  ;;  %v1515_v36 = vpop.f32.mrb[7].mxu1  ;;  %v5831_v55 = vadd.f32 %v1513_v27, %v6936_v19 }
 0x4ad   :  { %v5816_v60 = vadd.f32 %v1444_v29, %v6923_v51  ;;  %v5832_v61 = vadd.f32 %v1515_v36, %v6930_v9 }
 0x4ae   :  { %v4586_v39 = vmul.f32 -1.442695, %v5815_v28 }
 0x4af   :  { %v4587_v40 = vmul.f32 -1.442695, %v5816_v60  ;;  %v4588_v52 = vmul.f32 -1.442695, %v5832_v61 }
 0x4b0   :  { %6063 = vpow2.f32 %v4586_v39 }
 0x4b1   :  { %6065 = vpow2.f32 %v4587_v40 }
 0x4b2   :  { %6067 = vpow2.f32 %v4588_v52 }
 0x4b3   :  { %6069 = vtanh.f32 %v5831_v55 }
 0x4ba   :  { %v6064_v56 = vpop.eup %6063 }
 0x4bb   :  { %v6066_v3 = vpop.eup %6065  ;;  %v1525_v58 = vadd.f32 1.0, %v6064_v56 }
 0x4bc   :  { %v1531_v4 = vadd.f32 1.0, %v6066_v3  ;;  %v6068_v8 = vpop.eup %6067 }
 0x4bd   :  { %6071 = vrcp.f32 %v1525_v58  ;;  %v6070_v13 = vpop.eup %6069  ;;  %v1538_v25 = vadd.f32 1.0, %v6068_v8 }
 0x4be   :  { %6073 = vrcp.f32 %v1531_v4 }
 0x4bf   :  { %6075 = vrcp.f32 %v1538_v25 }
 0x4c7   :  { %v6072_v47 = vpop.eup %6071 }
 0x4c8   :  { %v6074_v59 = vpop.eup %6073  ;;  %v1542_v22 = vmul.f32 %v6072_v47, %v6070_v13 }
 0x4c9   :  { %v1541_v7 = vmul.f32 %v6074_v59, %v7027_v20  ;;  %v6076_v27 = vpop.eup %6075 }
 0x4cb   :  { %v7071_v28 = vadd.f32 %v1542_v22, %v1541_v7 }
 0x4cd   :  { %6077 = vtanh.f32 %v7071_v28 }
 0x4d7   :  { %v6078_v29 = vpop.eup %6077 }
 0x4d8   :  { %v1545_v36 = vmul.f32 %v6078_v29, %v6076_v27 }
 0x4da   :  { %1547 = vst.msk [vmem:[#allocation2 + $0x18] sm:$0xff] %vm981_vm1, %v1545_v36  ;;  %1629 = vmatmul.mubr.f32.vlgmr.msra.gmra.mrb[8].mxu0 %v1545_v36  ;;  %1700 = vmatmul.mubr.f32.vlgmr.msra.gmra.mrb[8].mxu1 %v1545_v36 }
 0x4db   :  { %1549 = vst.msk [vmem:[#allocation2 + $0x20] sm:$0xff] %vm984_vm2, %v1545_v36  ;;  %4980 = vmatpush1.bf16.msra.mxu0 %v6734_v6  ;;  %5012 = vmatpush1.bf16.msra.mxu1 %v6738_v12 }
 0x4dc   :  { %4982 = vmatprep.subr.bf16.mxu0 %v6736_v11  ;;  %5014 = vmatprep.subr.bf16.mxu1 %v6742_v14 }
 0x4dd   :  { %1814 = vmatprep.mubr.f32.mxu0 %v6492_v0  ;;  %1885 = vmatprep.mubr.f32.mxu1 %v6492_v0 }
 0x4df   :  { %4984 = vmatpush1.bf16.msra.mxu0 %v6747_v18  ;;  %5016 = vmatpush1.bf16.msra.mxu1 %v6755_v24 }
 0x4e0   :  { %4986 = vmatprep.subr.bf16.mxu0 %v6753_v23  ;;  %5018 = vmatprep.subr.bf16.mxu1 %v6760_v26 }
 0x4e3   :  { %4988 = vmatpush1.bf16.msra.mxu0 %v6765_v30  ;;  %5020 = vmatpush1.bf16.msra.mxu1 %v6771_v33 }
 0x4e4   :  { %4990 = vmatprep.subr.bf16.mxu0 %v6773_v34  ;;  %5022 = vmatprep.subr.bf16.mxu1 %v6778_v38 }
 0x4e7   :  { %4992 = vmatpush1.bf16.msra.mxu0 %v6785_v44  ;;  %5024 = vmatpush1.bf16.msra.mxu1 %v6789_v45 }
 0x4e8   :  { %4994 = vmatprep.subr.bf16.mxu0 %v6791_v46  ;;  %5026 = vmatprep.subr.bf16.mxu1 %v6796_v50 }
 0x4eb   :  { %4996 = vmatpush1.bf16.msra.mxu0 %v6803_v63  ;;  %5028 = vmatpush1.bf16.msra.mxu1 %v6807_v1 }
 0x4ec   :  { %4998 = vmatprep.subr.bf16.mxu0 %v6809_v2  ;;  %5030 = vmatprep.subr.bf16.mxu1 %v6814_v5 }
 0x4ef   :  { %5000 = vmatpush1.bf16.msra.mxu0 %v6821_v15  ;;  %5032 = vmatpush1.bf16.msra.mxu1 %v6825_v16 }
 0x4f0   :  { %5002 = vmatprep.subr.bf16.mxu0 %v6827_v17  ;;  %5034 = vmatprep.subr.bf16.mxu1 %v6832_v21 }
 0x4f3   :  { %5004 = vmatpush1.bf16.msra.mxu0 %v6839_v31  ;;  %5036 = vmatpush1.bf16.msra.mxu1 %v6843_v32 }
 0x4f4   :  { %5006 = vmatprep.subr.bf16.mxu0 %v6845_v35  ;;  %5038 = vmatprep.subr.bf16.mxu1 %v6850_v37 }
 0x4f7   :  { %5008 = vmatpush1.bf16.msra.mxu0 %v6857_v41  ;;  %5040 = vmatpush1.bf16.msra.mxu1 %v6861_v42 }
 0x4f8   :  { %5042 = vmatprep.subr.bf16.mxu0 %v6674_v53  ;;  %5074 = vmatprep.subr.bf16.mxu1 %v6683_v57 }
 0x5ad   :  { %v1630_v20 = vpop.f32.mrb[8].mxu0  ;;  %v1701_v60 = vpop.f32.mrb[8].mxu1 }
 0x5ae   :  { %v5817_v39 = vadd.f32 %v1630_v20, %v6919_v49  ;;  %v1632_v40 = vpop.f32.mrb[9].mxu0  ;;  %v1703_v61 = vpop.f32.mrb[9].mxu1  ;;  %v5833_v4 = vadd.f32 %v1701_v60, %v6936_v19 }
 0x5af   :  { %v5818_v52 = vadd.f32 %v1632_v40, %v6923_v51  ;;  %v5834_v3 = vadd.f32 %v1703_v61, %v6930_v9 }
 0x5b0   :  { %v4589_v55 = vmul.f32 -1.442695, %v5817_v39 }
 0x5b1   :  { %v4590_v56 = vmul.f32 -1.442695, %v5818_v52  ;;  %v4591_v58 = vmul.f32 -1.442695, %v5834_v3 }
 0x5b2   :  { %6079 = vpow2.f32 %v4589_v55 }
 0x5b3   :  { %6081 = vpow2.f32 %v4590_v56 }
 0x5b4   :  { %6083 = vpow2.f32 %v4591_v58 }
 0x5b5   :  { %6085 = vtanh.f32 %v5833_v4 }
 0x5bc   :  { %v6080_v8 = vpop.eup %6079 }
 0x5bd   :  { %v6082_v13 = vpop.eup %6081  ;;  %v1713_v47 = vadd.f32 1.0, %v6080_v8 }
 0x5be   :  { %v1719_v59 = vadd.f32 1.0, %v6082_v13  ;;  %v6084_v22 = vpop.eup %6083 }
 0x5bf   :  { %6087 = vrcp.f32 %v1713_v47  ;;  %v6086_v25 = vpop.eup %6085  ;;  %v1726_v36 = vadd.f32 1.0, %v6084_v22 }
 0x5c0   :  { %6089 = vrcp.f32 %v1719_v59 }
 0x5c1   :  { %6091 = vrcp.f32 %v1726_v36 }
 0x5c9   :  { %v6088_v7 = vpop.eup %6087 }
 0x5ca   :  { %v6090_v27 = vpop.eup %6089  ;;  %v1730_v29 = vmul.f32 %v6088_v7, %v6086_v25 }
 0x5cb   :  { %v1729_v20 = vmul.f32 %v6090_v27, %v7071_v28  ;;  %v6092_v60 = vpop.eup %6091 }
 0x5cd   :  { %v7115_v39 = vadd.f32 %v1730_v29, %v1729_v20 }
 0x5cf   :  { %6093 = vtanh.f32 %v7115_v39 }
 0x5d9   :  { %v6094_v40 = vpop.eup %6093 }
 0x5da   :  { %v1733_v61 = vmul.f32 %v6094_v40, %v6092_v60 }
 0x5dc   :  { %1734 = vst.msk [vmem:[#allocation2 + $0x20] sm:$0xff] %vm981_vm1, %v1733_v61  ;;  %1815 = vmatmul.mubr.f32.vlgmr.msra.gmra.mrb[10].mxu0 %v1733_v61  ;;  %1886 = vmatmul.mubr.f32.vlgmr.msra.gmra.mrb[10].mxu1 %v1733_v61 }
 0x5dd   :  { %1735 = vst.msk [vmem:[#allocation2 + $0x18] sm:$0xff] %vm984_vm2, %v1733_v61  ;;  %5044 = vmatpush1.bf16.msra.mxu0 %v6734_v6  ;;  %5076 = vmatpush1.bf16.msra.mxu1 %v6738_v12 }
 0x5de   :  { %5046 = vmatprep.subr.bf16.mxu0 %v6736_v11  ;;  %5078 = vmatprep.subr.bf16.mxu1 %v6742_v14 }
 0x5df   :  { %2000 = vmatprep.mubr.f32.mxu0 %v6492_v0  ;;  %2071 = vmatprep.mubr.f32.mxu1 %v6492_v0 }
 0x5e1   :  { %5048 = vmatpush1.bf16.msra.mxu0 %v6747_v18  ;;  %5080 = vmatpush1.bf16.msra.mxu1 %v6755_v24 }
 0x5e2   :  { %5050 = vmatprep.subr.bf16.mxu0 %v6753_v23  ;;  %5082 = vmatprep.subr.bf16.mxu1 %v6760_v26 }
 0x5e5   :  { %5052 = vmatpush1.bf16.msra.mxu0 %v6765_v30  ;;  %5084 = vmatpush1.bf16.msra.mxu1 %v6771_v33 }
 0x5e6   :  { %5054 = vmatprep.subr.bf16.mxu0 %v6773_v34  ;;  %5086 = vmatprep.subr.bf16.mxu1 %v6778_v38 }
 0x5e9   :  { %5056 = vmatpush1.bf16.msra.mxu0 %v6785_v44  ;;  %5088 = vmatpush1.bf16.msra.mxu1 %v6789_v45 }
 0x5ea   :  { %5058 = vmatprep.subr.bf16.mxu0 %v6791_v46  ;;  %5090 = vmatprep.subr.bf16.mxu1 %v6796_v50 }
 0x5ed   :  { %5060 = vmatpush1.bf16.msra.mxu0 %v6803_v63  ;;  %5092 = vmatpush1.bf16.msra.mxu1 %v6807_v1 }
 0x5ee   :  { %5062 = vmatprep.subr.bf16.mxu0 %v6809_v2  ;;  %5094 = vmatprep.subr.bf16.mxu1 %v6814_v5 }
 0x5f1   :  { %5064 = vmatpush1.bf16.msra.mxu0 %v6821_v15  ;;  %5096 = vmatpush1.bf16.msra.mxu1 %v6825_v16 }
 0x5f2   :  { %5066 = vmatprep.subr.bf16.mxu0 %v6827_v17  ;;  %5098 = vmatprep.subr.bf16.mxu1 %v6832_v21 }
 0x5f5   :  { %5068 = vmatpush1.bf16.msra.mxu0 %v6839_v31  ;;  %5100 = vmatpush1.bf16.msra.mxu1 %v6843_v32 }
 0x5f6   :  { %5070 = vmatprep.subr.bf16.mxu0 %v6845_v35  ;;  %5102 = vmatprep.subr.bf16.mxu1 %v6850_v37 }
 0x5f9   :  { %5072 = vmatpush1.bf16.msra.mxu0 %v6857_v41  ;;  %5104 = vmatpush1.bf16.msra.mxu1 %v6861_v42 }
 0x5fa   :  { %5106 = vmatprep.subr.bf16.mxu0 %v6674_v53  ;;  %5138 = vmatprep.subr.bf16.mxu1 %v6683_v57 }
 0x6af   :  { %v1816_v28 = vpop.f32.mrb[10].mxu0  ;;  %v1887_v52 = vpop.f32.mrb[10].mxu1 }
 0x6b0   :  { %v5819_v55 = vadd.f32 %v1816_v28, %v6919_v49  ;;  %v1818_v56 = vpop.f32.mrb[11].mxu0  ;;  %v1889_v3 = vpop.f32.mrb[11].mxu1  ;;  %v5835_v59 = vadd.f32 %v1887_v52, %v6936_v19 }
 0x6b1   :  { %v5820_v58 = vadd.f32 %v1818_v56, %v6923_v51  ;;  %v5836_v13 = vadd.f32 %v1889_v3, %v6930_v9  ;;  %v2301_v56 = vld [vmem:[#allocation13] sm:$0xff] }
 0x6b2   :  { %v4592_v4 = vmul.f32 -1.442695, %v5819_v55  ;;  %v2305_v3 = vld [vmem:[#allocation13 + $0x20] sm:$0xff] }
 0x6b3   :  { %v4593_v8 = vmul.f32 -1.442695, %v5820_v58  ;;  %v4594_v47 = vmul.f32 -1.442695, %v5836_v13  ;;  %v2307_v13 = vld [vmem:[#allocation13 + $0x30] sm:$0xff] }
 0x6b4   :  { %6095 = vpow2.f32 %v4592_v4  ;;  %v5171_v4 = vpack.c.bf16 %v2305_v3, %v2301_v56  ;;  %v2339_v56 = vld [vmem:[#allocation13 + $0x130] sm:$0xff] }
 0x6b5   :  { %6097 = vpow2.f32 %v4593_v8  ;;  %v2303_v8 = vld [vmem:[#allocation13 + $0x10] sm:$0xff] }
 0x6b6   :  { %6099 = vpow2.f32 %v4594_v47  ;;  %v5203_v47 = vpack.c.bf16 %v2307_v13, %v2303_v8  ;;  %v2344_v8 = vld [vmem:[#allocation13 + $0x158] sm:$0xff] }
 0x6b7   :  { %6101 = vtanh.f32 %v5835_v59  ;;  %v2310_v59 = vld [vmem:[#allocation13 + $0x48] sm:$0xff] }
 0x6be   :  { %v6096_v53 = vpop.eup %6095 }
 0x6bf   :  { %v6098_v22 = vpop.eup %6097  ;;  %v1899_v57 = vadd.f32 1.0, %v6096_v53  ;;  %v2314_v53 = vld [vmem:[#allocation13 + $0x68] sm:$0xff] }
 0x6c0   :  { %v1905_v25 = vadd.f32 1.0, %v6098_v22  ;;  %v6100_v7 = vpop.eup %6099  ;;  %v2312_v22 = vld [vmem:[#allocation13 + $0x58] sm:$0xff] }
 0x6c1   :  { %6103 = vrcp.f32 %v1899_v57  ;;  %v6102_v27 = vpop.eup %6101  ;;  %v1912_v60 = vadd.f32 1.0, %v6100_v7  ;;  %v5173_v57 = vpack.c.bf16 %v2314_v53, %v2310_v59  ;;  %v2309_v7 = vld [vmem:[#allocation13 + $0x40] sm:$0xff] }
 0x6c2   :  { %6105 = vrcp.f32 %v1905_v25  ;;  %v2316_v25 = vld [vmem:[#allocation13 + $0x78] sm:$0xff]  ;;  %v2341_v59 = vld [vmem:[#allocation13 + $0x140] sm:$0xff] }
 0x6c3   :  { %6107 = vrcp.f32 %v1912_v60  ;;  %v2315_v60 = vld [vmem:[#allocation13 + $0x70] sm:$0xff]  ;;  %v2345_v53 = vld [vmem:[#allocation13 + $0x160] sm:$0xff] }
 0x6cb   :  { %v6104_v29 = vpop.eup %6103 }
 0x6cc   :  { %v6106_v36 = vpop.eup %6105  ;;  %v1916_v20 = vmul.f32 %v6104_v29, %v6102_v27  ;;  %v2313_v27 = vld [vmem:[#allocation13 + $0x60] sm:$0xff]  ;;  %v5205_v29 = vpack.c.bf16 %v2316_v25, %v2312_v22  ;;  %v2343_v25 = vld [vmem:[#allocation13 + $0x150] sm:$0xff] }
 0x6cd   :  { %v1915_v40 = vmul.f32 %v6106_v36, %v7115_v39  ;;  %v6108_v28 = vpop.eup %6107  ;;  %v2308_v39 = vld [vmem:[#allocation13 + $0x38] sm:$0xff]  ;;  %v5175_v36 = vpack.c.bf16 %v2313_v27, %v2309_v7  ;;  %v2347_v7 = vld [vmem:[#allocation13 + $0x170] sm:$0xff] }
 0x6ce   :  { %v5223_v27 = vpack.c.bf16 %v2347_v7, %v2343_v25 }
 0x6cf   :  { %v7159_v61 = vadd.f32 %v1916_v20, %v1915_v40  ;;  %v2311_v20 = vld [vmem:[#allocation13 + $0x50] sm:$0xff] }
 0x6d0   :  { %v5207_v40 = vpack.c.bf16 %v2315_v60, %v2311_v20  ;;  %v2352_v20 = vld [vmem:[#allocation13 + $0x198] sm:$0xff] }
 0x6d1   :  { %6109 = vtanh.f32 %v7159_v61 }
 0x6db   :  { %v6110_v52 = vpop.eup %6109 }
 0x6dc   :  { %v1919_v55 = vmul.f32 %v6110_v52, %v6108_v28  ;;  %v2322_v28 = vld [vmem:[#allocation13 + $0xa8] sm:$0xff]  ;;  %v2320_v52 = vld [vmem:[#allocation13 + $0x98] sm:$0xff] }
 0x6de   :  { %1920 = vst.msk [vmem:[#allocation2 + $0x28] sm:$0xff] %vm981_vm1, %v1919_v55  ;;  %2001 = vmatmul.mubr.f32.vlgmr.msra.gmra.mrb[12].mxu0 %v1919_v55  ;;  %2072 = vmatmul.mubr.f32.vlgmr.msra.gmra.mrb[12].mxu1 %v1919_v55 }
 0x6df   :  { %1921 = vst.msk [vmem:[#allocation2 + $0x10] sm:$0xff] %vm984_vm2, %v1919_v55  ;;  %5108 = vmatpush1.bf16.msra.mxu0 %v6734_v6  ;;  %5140 = vmatpush1.bf16.msra.mxu1 %v6738_v12 }
 0x6e0   :  { %5110 = vmatprep.subr.bf16.mxu0 %v6736_v11  ;;  %5142 = vmatprep.subr.bf16.mxu1 %v6742_v14 }
 0x6e1   :  { %2185 = vmatprep.mubr.f32.mxu0 %v6492_v0  ;;  %2256 = vmatprep.mubr.f32.mxu1 %v6492_v0 }
 0x6e3   :  { %5112 = vmatpush1.bf16.msra.mxu0 %v6747_v18  ;;  %5144 = vmatpush1.bf16.msra.mxu1 %v6755_v24 }
 0x6e4   :  { %5114 = vmatprep.subr.bf16.mxu0 %v6753_v23  ;;  %5146 = vmatprep.subr.bf16.mxu1 %v6760_v26 }
 0x6e7   :  { %5116 = vmatpush1.bf16.msra.mxu0 %v6765_v30  ;;  %5148 = vmatpush1.bf16.msra.mxu1 %v6771_v33 }
 0x6e8   :  { %5118 = vmatprep.subr.bf16.mxu0 %v6773_v34  ;;  %5150 = vmatprep.subr.bf16.mxu1 %v6778_v38 }
 0x6eb   :  { %5120 = vmatpush1.bf16.msra.mxu0 %v6785_v44  ;;  %5152 = vmatpush1.bf16.msra.mxu1 %v6789_v45 }
 0x6ec   :  { %5122 = vmatprep.subr.bf16.mxu0 %v6791_v46  ;;  %5154 = vmatprep.subr.bf16.mxu1 %v6796_v50 }
 0x6ef   :  { %5124 = vmatpush1.bf16.msra.mxu0 %v6803_v63  ;;  %5156 = vmatpush1.bf16.msra.mxu1 %v6807_v1 }
 0x6f0   :  { %5126 = vmatprep.subr.bf16.mxu0 %v6809_v2  ;;  %5158 = vmatprep.subr.bf16.mxu1 %v6814_v5 }
 0x6f3   :  { %5128 = vmatpush1.bf16.msra.mxu0 %v6821_v15  ;;  %5160 = vmatpush1.bf16.msra.mxu1 %v6825_v16 }
 0x6f4   :  { %5130 = vmatprep.subr.bf16.mxu0 %v6827_v17  ;;  %5162 = vmatprep.subr.bf16.mxu1 %v6832_v21 }
 0x6f7   :  { %5132 = vmatpush1.bf16.msra.mxu0 %v6839_v31  ;;  %5164 = vmatpush1.bf16.msra.mxu1 %v6843_v32 }
 0x6f8   :  { %5134 = vmatprep.subr.bf16.mxu0 %v6845_v35  ;;  %5166 = vmatprep.subr.bf16.mxu1 %v6850_v37  ;;  %v2302_v35 = vld [vmem:[#allocation13 + $0x8] sm:$0xff] }
 0x6f9   :  { %v2306_v37 = vld [vmem:[#allocation13 + $0x28] sm:$0xff] }
 0x6fb   :  { %5136 = vmatpush1.bf16.msra.mxu0 %v6857_v41  ;;  %5168 = vmatpush1.bf16.msra.mxu1 %v6861_v42  ;;  %v2304_v41 = vld [vmem:[#allocation13 + $0x18] sm:$0xff]  ;;  %v5169_v42 = vpack.c.bf16 %v2306_v37, %v2302_v35  ;;  %v2333_v35 = vld [vmem:[#allocation13 + $0x100] sm:$0xff] }
 0x6fc   :  { %v5201_v58 = vpack.c.bf16 %v2308_v39, %v2304_v41  ;;  %v2337_v37 = vld [vmem:[#allocation13 + $0x120] sm:$0xff]  ;;  %v2335_v39 = vld [vmem:[#allocation13 + $0x110] sm:$0xff] }
 0x6fd   :  { %5170 = vmatprep.subr.bf16.mxu0 %v5169_v42  ;;  %v5187_v42 = vpack.c.bf16 %v2337_v37, %v2333_v35  ;;  %v5219_v3 = vpack.c.bf16 %v2339_v56, %v2335_v39 }
 0x6fe   :  { %5202 = vmatprep.subr.bf16.mxu1 %v5201_v58  ;;  %v2342_v58 = vld [vmem:[#allocation13 + $0x148] sm:$0xff] }
 0x7b1   :  { %v2002_v6 = vpop.f32.mrb[12].mxu0  ;;  %v2073_v11 = vpop.f32.mrb[12].mxu1 }
 0x7b2   :  { %v5821_v12 = vadd.f32 %v2002_v6, %v6919_v49  ;;  %v2004_v14 = vpop.f32.mrb[13].mxu0  ;;  %v2075_v18 = vpop.f32.mrb[13].mxu1  ;;  %v5837_v34 = vadd.f32 %v2073_v11, %v6936_v19  ;;  %v2324_v6 = vld [vmem:[#allocation13 + $0xb8] sm:$0xff]  ;;  %v2317_v11 = vld [vmem:[#allocation13 + $0x80] sm:$0xff] }
 0x7b3   :  { %v5822_v23 = vadd.f32 %v2004_v14, %v6923_v51  ;;  %v5838_v30 = vadd.f32 %v2075_v18, %v6930_v9  ;;  %v5209_v14 = vpack.c.bf16 %v2324_v6, %v2320_v52  ;;  %v2351_v6 = vld [vmem:[#allocation13 + $0x190] sm:$0xff] }
 0x7b4   :  { %v4595_v24 = vmul.f32 -1.442695, %v5821_v12  ;;  %v2321_v12 = vld [vmem:[#allocation13 + $0xa0] sm:$0xff] }
 0x7b5   :  { %v4596_v26 = vmul.f32 -1.442695, %v5822_v23  ;;  %v4597_v33 = vmul.f32 -1.442695, %v5838_v30  ;;  %v5179_v18 = vpack.c.bf16 %v2321_v12, %v2317_v11  ;;  %v2319_v23 = vld [vmem:[#allocation13 + $0x90] sm:$0xff]  ;;  %v2326_v30 = vld [vmem:[#allocation13 + $0xc8] sm:$0xff] }
 0x7b6   :  { %6111 = vpow2.f32 %v4595_v24  ;;  %v2323_v24 = vld [vmem:[#allocation13 + $0xb0] sm:$0xff]  ;;  %v2358_v12 = vld [vmem:[#allocation13 + $0x1c8] sm:$0xff] }
 0x7b7   :  { %6113 = vpow2.f32 %v4596_v26  ;;  %v5211_v26 = vpack.c.bf16 %v2323_v24, %v2319_v23  ;;  %v2355_v11 = vld [vmem:[#allocation13 + $0x1b0] sm:$0xff]  ;;  %v2360_v23 = vld [vmem:[#allocation13 + $0x1d8] sm:$0xff] }
 0x7b8   :  { %6115 = vpow2.f32 %v4597_v33  ;;  %v2330_v33 = vld [vmem:[#allocation13 + $0xe8] sm:$0xff]  ;;  %v2364_v24 = vld [vmem:[#allocation13 + $0x1f8] sm:$0xff] }
 0x7b9   :  { %6117 = vtanh.f32 %v5837_v34  ;;  %v2328_v34 = vld [vmem:[#allocation13 + $0xd8] sm:$0xff] }
 0x7c0   :  { %v6112_v38 = vpop.eup %6111 }
 0x7c1   :  { %v6114_v44 = vpop.eup %6113  ;;  %v2085_v45 = vadd.f32 1.0, %v6112_v38  ;;  %v5181_v38 = vpack.c.bf16 %v2330_v33, %v2326_v30  ;;  %v5229_v30 = vpack.c.bf16 %v2364_v24, %v2360_v23  ;;  %v2357_v33 = vld [vmem:[#allocation13 + $0x1c0] sm:$0xff]  ;;  %v2666_v23 = vld [vmem:[#allocation14 + $0xa8] sm:$0xff]  ;;  %v2659_v24 = vld [vmem:[#allocation14 + $0x70] sm:$0xff] }
 0x7c2   :  { %v2091_v46 = vadd.f32 1.0, %v6114_v44  ;;  %v6116_v50 = vpop.eup %6115  ;;  %v2332_v44 = vld [vmem:[#allocation13 + $0xf8] sm:$0xff] }
 0x7c3   :  { %6119 = vrcp.f32 %v2085_v45  ;;  %v6118_v63 = vpop.eup %6117  ;;  %v2098_v15 = vadd.f32 1.0, %v6116_v50  ;;  %v2325_v45 = vld [vmem:[#allocation13 + $0xc0] sm:$0xff]  ;;  %v5213_v50 = vpack.c.bf16 %v2332_v44, %v2328_v34 }
 0x7c4   :  { %6121 = vrcp.f32 %v2091_v46  ;;  %v2329_v46 = vld [vmem:[#allocation13 + $0xe0] sm:$0xff] }
 0x7c5   :  { %6123 = vrcp.f32 %v2098_v15  ;;  %v2334_v15 = vld [vmem:[#allocation13 + $0x108] sm:$0xff]  ;;  %v2361_v34 = vld [vmem:[#allocation13 + $0x1e0] sm:$0xff] }
 0x7c6   :  { %v5199_v44 = vpack.c.bf16 %v2361_v34, %v2357_v33  ;;  %v2661_v34 = vld [vmem:[#allocation14 + $0x80] sm:$0xff] }
 0x7cd   :  { %v6120_v1 = vpop.eup %6119 }
 0x7ce   :  { %v6122_v2 = vpop.eup %6121  ;;  %v2102_v5 = vmul.f32 %v6120_v1, %v6118_v63  ;;  %v5183_v63 = vpack.c.bf16 %v2329_v46, %v2325_v45  ;;  %v2327_v1 = vld [vmem:[#allocation13 + $0xd0] sm:$0xff] }
 0x7cf   :  { %v2101_v16 = vmul.f32 %v6122_v2, %v7159_v61  ;;  %v6124_v21 = vpop.eup %6123  ;;  %v2318_v61 = vld [vmem:[#allocation13 + $0x88] sm:$0xff]  ;;  %v2331_v2 = vld [vmem:[#allocation13 + $0xf0] sm:$0xff] }
 0x7d0   :  { %v5177_v55 = vpack.c.bf16 %v2322_v28, %v2318_v61  ;;  %v2349_v61 = vld [vmem:[#allocation13 + $0x180] sm:$0xff]  ;;  %v2363_v45 = vld [vmem:[#allocation13 + $0x1f0] sm:$0xff] }
 0x7d1   :  { %v7201_v17 = vadd.f32 %v2102_v5, %v2101_v16  ;;  %v5215_v5 = vpack.c.bf16 %v2331_v2, %v2327_v1  ;;  %v2338_v16 = vld [vmem:[#allocation13 + $0x128] sm:$0xff]  ;;  %v2353_v28 = vld [vmem:[#allocation13 + $0x1a0] sm:$0xff]  ;;  %v2648_v2 = vld [vmem:[#allocation14 + $0x18] sm:$0xff] }
 0x7d3   :  { %6125 = vtanh.f32 %v7201_v17 }
 0x7dd   :  { %v6126_v31 = vpop.eup %6125 }
 0x7de   :  { %v2105_v32 = vmul.f32 %v6126_v31, %v6124_v21  ;;  %v2336_v21 = vld [vmem:[#allocation13 + $0x118] sm:$0xff]  ;;  %v5185_v31 = vpack.c.bf16 %v2338_v16, %v2334_v15 }
 0x7e0   :  { %2106 = vst.msk [vmem:[#allocation2 + $0x30] sm:$0xff] %vm981_vm1, %v2105_v32  ;;  %2186 = vmatmul.mubr.f32.vlgmr.msra.gmra.mrb[14].mxu0 %v2105_v32  ;;  %2257 = vmatmul.mubr.f32.vlgmr.msra.gmra.mrb[14].mxu1 %v2105_v32 }
 0x7e1   :  { %2107 = vst.msk [vmem:[#allocation2 + $0x8] sm:$0xff] %vm984_vm2, %v2105_v32  ;;  %2451 = vmatprep.mubr.f32.mxu0 %v6492_v0  ;;  %2564 = vmatprep.mubr.f32.mxu1 %v6492_v0  ;;  %v2340_v32 = vld [vmem:[#allocation13 + $0x138] sm:$0xff] }
 0x7e2   :  { %5172 = vmatpush1.bf16.msra.mxu0 %v5171_v4  ;;  %5204 = vmatpush1.bf16.msra.mxu1 %v5203_v47  ;;  %v5217_v41 = vpack.c.bf16 %v2340_v32, %v2336_v21  ;;  %v2346_v4 = vld [vmem:[#allocation13 + $0x168] sm:$0xff]  ;;  %v2348_v47 = vld [vmem:[#allocation13 + $0x178] sm:$0xff] }
 0x7e3   :  { %5174 = vmatprep.subr.bf16.mxu0 %v5173_v57  ;;  %5206 = vmatprep.subr.bf16.mxu1 %v5205_v29  ;;  %v5189_v13 = vpack.c.bf16 %v2346_v4, %v2342_v58  ;;  %v5221_v22 = vpack.c.bf16 %v2348_v47, %v2344_v8  ;;  %v5191_v57 = vpack.c.bf16 %v2345_v53, %v2341_v59  ;;  %v2350_v29 = vld [vmem:[#allocation13 + $0x188] sm:$0xff] }
 0x7e6   :  { %5176 = vmatpush1.bf16.msra.mxu0 %v5175_v36  ;;  %5208 = vmatpush1.bf16.msra.mxu1 %v5207_v40  ;;  %v2354_v36 = vld [vmem:[#allocation13 + $0x1a8] sm:$0xff]  ;;  %v2356_v40 = vld [vmem:[#allocation13 + $0x1b8] sm:$0xff] }
 0x7e7   :  { %5178 = vmatprep.subr.bf16.mxu0 %v5177_v55  ;;  %5210 = vmatprep.subr.bf16.mxu1 %v5209_v14  ;;  %v5193_v60 = vpack.c.bf16 %v2354_v36, %v2350_v29  ;;  %v5225_v52 = vpack.c.bf16 %v2356_v40, %v2352_v20  ;;  %v5195_v55 = vpack.c.bf16 %v2353_v28, %v2349_v61  ;;  %v2649_v29 = vld [vmem:[#allocation14 + $0x20] sm:$0xff]  ;;  %v2654_v36 = vld [vmem:[#allocation14 + $0x48] sm:$0xff]  ;;  %v2651_v40 = vld [vmem:[#allocation14 + $0x30] sm:$0xff] }
 0x7e8   :  { %v5227_v14 = vpack.c.bf16 %v2355_v11, %v2351_v6  ;;  %v2658_v20 = vld [vmem:[#allocation14 + $0x68] sm:$0xff] }
 0x7e9   :  { %v5237_v28 = vpack.c.bf16 %v2658_v20, %v2654_v36  ;;  %v2688_v36 = vld [vmem:[#allocation14 + $0x158] sm:$0xff] }
 0x7ea   :  { %5180 = vmatpush1.bf16.msra.mxu0 %v5179_v18  ;;  %5212 = vmatpush1.bf16.msra.mxu1 %v5211_v26  ;;  %v2362_v18 = vld [vmem:[#allocation13 + $0x1e8] sm:$0xff]  ;;  %v2692_v20 = vld [vmem:[#allocation14 + $0x178] sm:$0xff] }
 0x7eb   :  { %5182 = vmatprep.subr.bf16.mxu0 %v5181_v38  ;;  %5214 = vmatprep.subr.bf16.mxu1 %v5213_v50  ;;  %v5197_v26 = vpack.c.bf16 %v2362_v18, %v2358_v12  ;;  %v2359_v38 = vld [vmem:[#allocation13 + $0x1d0] sm:$0xff]  ;;  %v2646_v50 = vld [vmem:[#allocation14 + $0x8] sm:$0xff]  ;;  %v2660_v12 = vld [vmem:[#allocation14 + $0x78] sm:$0xff] }
 0x7ec   :  { %v5231_v46 = vpack.c.bf16 %v2363_v45, %v2359_v38  ;;  %v2662_v18 = vld [vmem:[#allocation14 + $0x88] sm:$0xff]  ;;  %v2665_v38 = vld [vmem:[#allocation14 + $0xa0] sm:$0xff] }
 0x7ee   :  { %5184 = vmatpush1.bf16.msra.mxu0 %v5183_v63  ;;  %5216 = vmatpush1.bf16.msra.mxu1 %v5215_v5  ;;  %v2650_v63 = vld [vmem:[#allocation14 + $0x28] sm:$0xff]  ;;  %v2652_v5 = vld [vmem:[#allocation14 + $0x38] sm:$0xff] }
 0x7ef   :  { %5186 = vmatprep.subr.bf16.mxu0 %v5185_v31  ;;  %5218 = vmatprep.subr.bf16.mxu1 %v5217_v41  ;;  %v5233_v1 = vpack.c.bf16 %v2650_v63, %v2646_v50  ;;  %v5265_v15 = vpack.c.bf16 %v2652_v5, %v2648_v2  ;;  %v2668_v50 = vld [vmem:[#allocation14 + $0xb8] sm:$0xff]  ;;  %v2663_v63 = vld [vmem:[#allocation14 + $0x90] sm:$0xff]  ;;  %v2670_v2 = vld [vmem:[#allocation14 + $0xc8] sm:$0xff] }
 0x7f0   :  { %v2674_v5 = vld [vmem:[#allocation14 + $0xe8] sm:$0xff] }
 0x7f2   :  { %5188 = vmatpush1.bf16.msra.mxu0 %v5187_v42  ;;  %5220 = vmatpush1.bf16.msra.mxu1 %v5219_v3 }
 0x7f3   :  { %5190 = vmatprep.subr.bf16.mxu0 %v5189_v13  ;;  %5222 = vmatprep.subr.bf16.mxu1 %v5221_v22 }
 0x7f6   :  { %5192 = vmatpush1.bf16.msra.mxu0 %v5191_v57  ;;  %5224 = vmatpush1.bf16.msra.mxu1 %v5223_v27  ;;  %v2645_v27 = vld [vmem:[#allocation14] sm:$0xff] }
 0x7f7   :  { %5194 = vmatprep.subr.bf16.mxu0 %v5193_v60  ;;  %5226 = vmatprep.subr.bf16.mxu1 %v5225_v52  ;;  %v2647_v60 = vld [vmem:[#allocation14 + $0x10] sm:$0xff]  ;;  %v5235_v61 = vpack.c.bf16 %v2649_v29, %v2645_v27  ;;  %v2653_v52 = vld [vmem:[#allocation14 + $0x40] sm:$0xff] }
 0x7f8   :  { %v5267_v11 = vpack.c.bf16 %v2651_v40, %v2647_v60 }
 0x7fa   :  { %5196 = vmatpush1.bf16.msra.mxu0 %v5195_v55  ;;  %5228 = vmatpush1.bf16.msra.mxu1 %v5227_v14  ;;  %v2656_v55 = vld [vmem:[#allocation14 + $0x58] sm:$0xff]  ;;  %v2655_v14 = vld [vmem:[#allocation14 + $0x50] sm:$0xff] }
 0x7fb   :  { %5198 = vmatprep.subr.bf16.mxu0 %v5197_v26  ;;  %5230 = vmatprep.subr.bf16.mxu1 %v5229_v30  ;;  %v7221_v30 = vld [vmem:[#allocation2 + $0x8] sm:$0xff]  ;;  %v5269_v33 = vpack.c.bf16 %v2660_v12, %v2656_v55  ;;  %v5271_v45 = vpack.c.bf16 %v2659_v24, %v2655_v14  ;;  %v2700_v24 = vld [vmem:[#allocation14 + $0x1b8] sm:$0xff] }
 0x7fc   :  { %v2694_v55 = vld [vmem:[#allocation14 + $0x188] sm:$0xff] }
 0x7fd   :  { %v7245_v12 = vld [vmem:[#allocation2 + $0x28] sm:$0xff] }
 0x7fe   :  { %5200 = vmatpush1.bf16.msra.mxu0 %v5199_v44  ;;  %5232 = vmatpush1.bf16.msra.mxu1 %v5231_v46  ;;  %v5241_v44 = vpack.c.bf16 %v2666_v23, %v2662_v18  ;;  %v2664_v46 = vld [vmem:[#allocation14 + $0x98] sm:$0xff]  ;;  %v5285_v18 = vpack.c.bf16 %v2692_v20, %v2688_v36  ;;  %v2979_v36 = vld [vmem:[#allocation16 + $0x60] sm:$0xff] }
 0x7ff   :  { %5234 = vmatprep.subr.bf16.mxu0 %v5233_v1  ;;  %5266 = vmatprep.subr.bf16.mxu1 %v5265_v15  ;;  %v2667_v1 = vld [vmem:[#allocation14 + $0xb0] sm:$0xff]  ;;  %v5243_v15 = vpack.c.bf16 %v2665_v38, %v2661_v34  ;;  %v2696_v23 = vld [vmem:[#allocation14 + $0x198] sm:$0xff]  ;;  %v2693_v34 = vld [vmem:[#allocation14 + $0x180] sm:$0xff] }
 0x800   :  { %v2697_v38 = vld [vmem:[#allocation14 + $0x1a0] sm:$0xff] }
 0x8b3   :  { %v2187_v16 = vpop.f32.mrb[14].mxu0  ;;  %v2258_v21 = vpop.f32.mrb[14].mxu1 }
 0x8b4   :  { %v5823_v31 = vadd.f32 %v2187_v16, %v6919_v49  ;;  %v2189_v32 = vpop.f32.mrb[15].mxu0  ;;  %v2260_v35 = vpop.f32.mrb[15].mxu1  ;;  %v5839_v3 = vadd.f32 %v2258_v21, %v6936_v19  ;;  %v7227_v16 = vld [vmem:[#allocation2 + $0x10] sm:$0xff]  ;;  %v5273_v21 = vpack.c.bf16 %v2668_v50, %v2664_v46  ;;  %v2702_v46 = vld [vmem:[#allocation14 + $0x1c8] sm:$0xff] }
 0x8b5   :  { %v5824_v37 = vadd.f32 %v2189_v32, %v6923_v51  ;;  %v5840_v39 = vadd.f32 %v2260_v35, %v6930_v9  ;;  %v2673_v32 = vld [vmem:[#allocation14 + $0xe0] sm:$0xff]  ;;  %v5275_v35 = vpack.c.bf16 %v2667_v1, %v2663_v63  ;;  %v2706_v50 = vld [vmem:[#allocation14 + $0x1e8] sm:$0xff]  ;;  %v7251_v63 = vld [vmem:[#allocation2 + $0x30] sm:$0xff]  ;;  %v5259_v1 = vpack.c.bf16 %v2697_v38, %v2693_v34 }
 0x8b6   :  { %v4598_v41 = vmul.f32 -1.442695, %v5823_v31  ;;  %v2669_v31 = vld [vmem:[#allocation14 + $0xc0] sm:$0xff]  ;;  %v2989_v34 = vld [vmem:[#allocation16 + $0xb0] sm:$0xff]  ;;  %v2992_v38 = vld [vmem:[#allocation16 + $0xc8] sm:$0xff] }
 0x8b7   :  { %v4599_v42 = vmul.f32 -1.442695, %v5824_v37  ;;  %v4600_v56 = vmul.f32 -1.442695, %v5840_v39  ;;  %v5245_v37 = vpack.c.bf16 %v2674_v5, %v2670_v2  ;;  %v2671_v39 = vld [vmem:[#allocation14 + $0xd0] sm:$0xff]  ;;  %v5289_v2 = vpack.c.bf16 %v2700_v24, %v2696_v23  ;;  %v2704_v5 = vld [vmem:[#allocation14 + $0x1d8] sm:$0xff] }
 0x8b8   :  { %6127 = vpow2.f32 %v4598_v41  ;;  %v2672_v41 = vld [vmem:[#allocation14 + $0xd8] sm:$0xff] }
 0x8b9   :  { %6129 = vpow2.f32 %v4599_v42  ;;  %v2676_v42 = vld [vmem:[#allocation14 + $0xf8] sm:$0xff] }
 0x8ba   :  { %6131 = vpow2.f32 %v4600_v56  ;;  %v2675_v56 = vld [vmem:[#allocation14 + $0xf0] sm:$0xff]  ;;  %v2986_v24 = vld [vmem:[#allocation16 + $0x98] sm:$0xff] }
 0x8bb   :  { %6133 = vtanh.f32 %v5839_v3  ;;  %v2678_v3 = vld [vmem:[#allocation14 + $0x108] sm:$0xff] }
 0x8c2   :  { %v6128_v58 = vpop.eup %6127 }
 0x8c3   :  { %v6130_v4 = vpop.eup %6129  ;;  %v2270_v8 = vadd.f32 1.0, %v6128_v58  ;;  %v2682_v58 = vld [vmem:[#allocation14 + $0x128] sm:$0xff] }
 0x8c4   :  { %v2276_v13 = vadd.f32 1.0, %v6130_v4  ;;  %v6132_v49 = vpop.eup %6131  ;;  %v7233_v4 = vld [vmem:[#allocation2 + $0x18] sm:$0xff] }
 0x8c5   :  { %6135 = vrcp.f32 %v2270_v8  ;;  %v6134_v47 = vpop.eup %6133  ;;  %v2283_v22 = vadd.f32 1.0, %v6132_v49  ;;  %v5247_v8 = vpack.c.bf16 %v2673_v32, %v2669_v31  ;;  %v2677_v49 = vld [vmem:[#allocation14 + $0x100] sm:$0xff]  ;;  %v5261_v31 = vpack.c.bf16 %v2706_v50, %v2702_v46 }
 0x8c6   :  { %6137 = vrcp.f32 %v2276_v13  ;;  %v5277_v13 = vpack.c.bf16 %v2676_v42, %v2672_v41  ;;  %v2701_v32 = vld [vmem:[#allocation14 + $0x1c0] sm:$0xff]  ;;  %v2707_v41 = vld [vmem:[#allocation14 + $0x1f0] sm:$0xff]  ;;  %v2968_v42 = vld [vmem:[#allocation16 + $0x8] sm:$0xff] }
 0x8c7   :  { %6139 = vrcp.f32 %v2283_v22  ;;  %v2684_v22 = vld [vmem:[#allocation14 + $0x138] sm:$0xff]  ;;  %v2991_v50 = vld [vmem:[#allocation16 + $0xc0] sm:$0xff] }
 0x8cf   :  { %v6136_v51 = vpop.eup %6135 }
 0x8d0   :  { %v6138_v59 = vpop.eup %6137  ;;  %v2287_v53 = vmul.f32 %v6136_v51, %v6134_v47  ;;  %v2681_v47 = vld [vmem:[#allocation14 + $0x120] sm:$0xff]  ;;  %v5279_v51 = vpack.c.bf16 %v2675_v56, %v2671_v39  ;;  %v2972_v39 = vld [vmem:[#allocation16 + $0x28] sm:$0xff] }
 0x8d1   :  { %v2286_v57 = vmul.f32 %v6138_v59, %v7201_v17  ;;  %v6140_v19 = vpop.eup %6139  ;;  %v2657_v17 = vld [vmem:[#allocation14 + $0x60] sm:$0xff]  ;;  %v5249_v59 = vpack.c.bf16 %v2682_v58, %v2678_v3  ;;  %v5251_v27 = vpack.c.bf16 %v2681_v47, %v2677_v49  ;;  %v2970_v3 = vld [vmem:[#allocation16 + $0x18] sm:$0xff]  ;;  %v7259_v47 = vpack.c.bf16 %v2972_v39, %v2968_v42 }
 0x8d2   :  { %v5239_v26 = vpack.c.bf16 %v2657_v17, %v2653_v52  ;;  %v2687_v52 = vld [vmem:[#allocation14 + $0x150] sm:$0xff]  ;;  %v2974_v58 = vld [vmem:[#allocation16 + $0x38] sm:$0xff]  ;;  %v2999_v42 = vld [vmem:[#allocation16 + $0x100] sm:$0xff] }
 0x8d3   :  { %v2288_v9 = vadd.f32 %v2287_v53, %v2286_v57  ;;  %v2680_v53 = vld [vmem:[#allocation14 + $0x118] sm:$0xff]  ;;  %v2679_v57 = vld [vmem:[#allocation14 + $0x110] sm:$0xff]  ;;  %v3003_v39 = vld [vmem:[#allocation16 + $0x120] sm:$0xff] }
 0x8d4   :  { %v5281_v29 = vpack.c.bf16 %v2684_v22, %v2680_v53  ;;  %v2691_v17 = vld [vmem:[#allocation14 + $0x170] sm:$0xff]  ;;  %v2971_v53 = vld [vmem:[#allocation16 + $0x20] sm:$0xff]  ;;  %v2976_v22 = vld [vmem:[#allocation16 + $0x48] sm:$0xff] }
 0x8d5   :  { %6141 = vtanh.f32 %v2288_v9  ;;  %v2683_v9 = vld [vmem:[#allocation14 + $0x130] sm:$0xff] }
 0x8d6   :  { %v5283_v60 = vpack.c.bf16 %v2683_v9, %v2679_v57  ;;  %v2980_v57 = vld [vmem:[#allocation16 + $0x68] sm:$0xff]  ;;  %v2969_v9 = vld [vmem:[#allocation16 + $0x10] sm:$0xff] }
 0x8df   :  { %v6142_v25 = vpop.eup %6141 }
 0x8e0   :  { %v2290_v7 = vmul.f32 %v6142_v25, %v6140_v19  ;;  %v2686_v19 = vld [vmem:[#allocation14 + $0x148] sm:$0xff] }
 0x8e1   :  { %v2690_v25 = vld [vmem:[#allocation14 + $0x168] sm:$0xff] }
 0x8e2   :  { %2291 = vst.msk [vmem:[#allocation2 + $0x38] sm:$0xff] %vm981_vm1, %v2290_v7  ;;  %v5253_v40 = vpack.c.bf16 %v2690_v25, %v2686_v19  ;;  %v2973_v19 = vld [vmem:[#allocation16 + $0x30] sm:$0xff] }
 0x8e3   :  { %2292 = vst.msk [vmem:[#allocation2] sm:$0xff] %vm984_vm2, %v2290_v7  ;;  %v7239_v7 = vld [vmem:[#allocation2 + $0x20] sm:$0xff]  ;;  %v7273_v20 = vpack.c.bf16 %v2973_v19, %v2969_v9  ;;  %v3010_v9 = vld [vmem:[#allocation16 + $0x158] sm:$0xff] }
 0x8e4   :  { %v3014_v19 = vld [vmem:[#allocation16 + $0x178] sm:$0xff] }
 0x8ea   :  { %v7215_v6 = vld [vmem:[#allocation2] sm:$0xff] }
 0x8eb   :  { %2452 = vmatmul.mubr.f32.vlgmr.msra.gmra.mrb[16].mxu0 %v7215_v6  ;;  %2565 = vmatmul.mubr.f32.vlgmr.msra.gmra.mrb[16].mxu1 %v7215_v6 }
 0x8ec   :  { %5236 = vmatpush1.bf16.msra.mxu0 %v5235_v61  ;;  %2457 = vmatprep.mubr.f32.mxu0 %v6492_v0  ;;  %v2685_v61 = vld [vmem:[#allocation14 + $0x140] sm:$0xff] }
 0x8ed   :  { %2570 = vmatprep.mubr.f32.mxu1 %v6492_v0  ;;  %5238 = vmatprep.subr.bf16.mxu0 %v5237_v28  ;;  %v2689_v28 = vld [vmem:[#allocation14 + $0x160] sm:$0xff] }
 0x8ee   :  { %5268 = vmatpush1.bf16.msra.mxu1 %v5267_v11  ;;  %v2698_v11 = vld [vmem:[#allocation14 + $0x1a8] sm:$0xff]  ;;  %v5255_v14 = vpack.c.bf16 %v2689_v28, %v2685_v61  ;;  %v2977_v61 = vld [vmem:[#allocation16 + $0x50] sm:$0xff] }
 0x8ef   :  { %2458 = vmatmul.mubr.f32.gmra.mrb[18].mxu0 %v7221_v30  ;;  %2571 = vmatmul.mubr.f32.gmra.mrb[18].mxu1 %v7221_v30  ;;  %v2984_v28 = vld [vmem:[#allocation16 + $0x88] sm:$0xff] }
 0x8f0   :  { %5240 = vmatpush1.bf16.msra.mxu0 %v5239_v26  ;;  %2463 = vmatprep.mubr.f32.mxu0 %v6492_v0  ;;  %v5287_v26 = vpack.c.bf16 %v2691_v17, %v2687_v52  ;;  %v2988_v52 = vld [vmem:[#allocation16 + $0xa8] sm:$0xff]  ;;  %v2981_v17 = vld [vmem:[#allocation16 + $0x70] sm:$0xff] }
 0x8f1   :  { %2576 = vmatprep.mubr.f32.mxu1 %v6492_v0  ;;  %5270 = vmatprep.subr.bf16.mxu1 %v5269_v33  ;;  %v5257_v33 = vpack.c.bf16 %v2698_v11, %v2694_v55  ;;  %v7288_v23 = vpack.c.bf16 %v2981_v17, %v2977_v61  ;;  %v3013_v61 = vld [vmem:[#allocation16 + $0x170] sm:$0xff] }
 0x8f2   :  { %5242 = vmatprep.subr.bf16.mxu0 %v5241_v44  ;;  %5272 = vmatpush1.bf16.msra.mxu1 %v5271_v45  ;;  %v2695_v44 = vld [vmem:[#allocation14 + $0x190] sm:$0xff] }
 0x8f3   :  { %2464 = vmatmul.mubr.f32.gmra.mrb[20].mxu0 %v7227_v16  ;;  %2577 = vmatmul.mubr.f32.gmra.mrb[20].mxu1 %v7227_v16  ;;  %v2699_v45 = vld [vmem:[#allocation14 + $0x1b0] sm:$0xff] }
 0x8f4   :  { %5244 = vmatpush1.bf16.msra.mxu0 %v5243_v15  ;;  %2469 = vmatprep.mubr.f32.mxu0 %v6492_v0  ;;  %v2708_v15 = vld [vmem:[#allocation14 + $0x1f8] sm:$0xff] }
 0x8f5   :  { %2582 = vmatprep.mubr.f32.mxu1 %v6492_v0  ;;  %5274 = vmatprep.subr.bf16.mxu1 %v5273_v21  ;;  %v5291_v21 = vpack.c.bf16 %v2699_v45, %v2695_v44  ;;  %v5293_v56 = vpack.c.bf16 %v2708_v15, %v2704_v5  ;;  %v2996_v44 = vld [vmem:[#allocation16 + $0xe8] sm:$0xff]  ;;  %v2994_v5 = vld [vmem:[#allocation16 + $0xd8] sm:$0xff] }
 0x8f6   :  { %5276 = vmatpush1.bf16.msra.mxu1 %v5275_v35  ;;  %5246 = vmatprep.subr.bf16.mxu0 %v5245_v37  ;;  %v2705_v35 = vld [vmem:[#allocation14 + $0x1e0] sm:$0xff]  ;;  %v2703_v37 = vld [vmem:[#allocation14 + $0x1d0] sm:$0xff]  ;;  %v2998_v15 = vld [vmem:[#allocation16 + $0xf8] sm:$0xff] }
 0x8f7   :  { %2470 = vmatmul.mubr.f32.gmra.mrb[22].mxu0 %v7233_v4  ;;  %2583 = vmatmul.mubr.f32.gmra.mrb[22].mxu1 %v7233_v4  ;;  %v5295_v49 = vpack.c.bf16 %v2707_v41, %v2703_v37  ;;  %v7314_v41 = vpack.c.bf16 %v2998_v15, %v2994_v5 }
 0x8f8   :  { %2475 = vmatprep.mubr.f32.mxu0 %v6492_v0  ;;  %2588 = vmatprep.mubr.f32.mxu1 %v6492_v0 }
 0x8f9   :  { %5248 = vmatpush1.bf16.msra.mxu0 %v5247_v8  ;;  %5278 = vmatprep.subr.bf16.mxu1 %v5277_v13  ;;  %v5263_v8 = vpack.c.bf16 %v2705_v35, %v2701_v32  ;;  %v7257_v13 = vld [vmem:[#allocation2 + $0x38] sm:$0xff]  ;;  %v3000_v32 = vld [vmem:[#allocation16 + $0x108] sm:$0xff] }
 0x8fa   :  { %5280 = vmatpush1.bf16.msra.mxu1 %v5279_v51  ;;  %5250 = vmatprep.subr.bf16.mxu0 %v5249_v59  ;;  %v7263_v51 = vpack.c.bf16 %v2974_v58, %v2970_v3  ;;  %v2967_v59 = vld [vmem:[#allocation16] sm:$0xff]  ;;  %v3004_v35 = vld [vmem:[#allocation16 + $0x128] sm:$0xff]  ;;  %v3002_v3 = vld [vmem:[#allocation16 + $0x118] sm:$0xff] }
 0x8fb   :  { %2476 = vmatmul.mubr.f32.gmra.mrb[24].mxu0 %v7239_v7  ;;  %2589 = vmatmul.mubr.f32.gmra.mrb[24].mxu1 %v7239_v7  ;;  %v7269_v25 = vpack.c.bf16 %v2971_v53, %v2967_v59  ;;  %v3006_v58 = vld [vmem:[#allocation16 + $0x138] sm:$0xff]  ;;  %v3008_v59 = vld [vmem:[#allocation16 + $0x148] sm:$0xff] }
 0x8fc   :  { %2481 = vmatprep.mubr.f32.mxu0 %v6492_v0  ;;  %2594 = vmatprep.mubr.f32.mxu1 %v6492_v0  ;;  %v3012_v53 = vld [vmem:[#allocation16 + $0x168] sm:$0xff] }
 0x8fd   :  { %5252 = vmatpush1.bf16.msra.mxu0 %v5251_v27  ;;  %5282 = vmatprep.subr.bf16.mxu1 %v5281_v29  ;;  %v7271_v27 = vpack.c.bf16 %v2980_v57, %v2976_v22  ;;  %v2975_v29 = vld [vmem:[#allocation16 + $0x40] sm:$0xff]  ;;  %v7328_v22 = vpack.c.bf16 %v3003_v39, %v2999_v42  ;;  %v7330_v57 = vpack.c.bf16 %v3006_v58, %v3002_v3  ;;  %v3025_v39 = vld [vmem:[#allocation16 + $0x1d0] sm:$0xff] }
 0x8fe   :  { %5284 = vmatpush1.bf16.msra.mxu1 %v5283_v60  ;;  %5254 = vmatprep.subr.bf16.mxu0 %v5253_v40  ;;  %v2978_v60 = vld [vmem:[#allocation16 + $0x58] sm:$0xff]  ;;  %v7279_v55 = vpack.c.bf16 %v2979_v36, %v2975_v29  ;;  %v7336_v29 = vpack.c.bf16 %v3012_v53, %v3008_v59  ;;  %v3007_v36 = vld [vmem:[#allocation16 + $0x140] sm:$0xff]  ;;  %v3029_v3 = vld [vmem:[#allocation16 + $0x1f0] sm:$0xff] }
 0x8ff   :  { %2482 = vmatmul.mubr.f32.gmra.mrb[26].mxu0 %v7245_v12  ;;  %2595 = vmatmul.mubr.f32.gmra.mrb[26].mxu1 %v7245_v12  ;;  %v2982_v40 = vld [vmem:[#allocation16 + $0x78] sm:$0xff]  ;;  %v3027_v42 = vld [vmem:[#allocation16 + $0x1e0] sm:$0xff] }
 0x900   :  { %2487 = vmatprep.mubr.f32.mxu0 %v6492_v0  ;;  %2600 = vmatprep.mubr.f32.mxu1 %v6492_v0  ;;  %v7283_v11 = vpack.c.bf16 %v2982_v40, %v2978_v60  ;;  %v3011_v60 = vld [vmem:[#allocation16 + $0x160] sm:$0xff]  ;;  %v3009_v40 = vld [vmem:[#allocation16 + $0x150] sm:$0xff] }
 0x901   :  { %5256 = vmatpush1.bf16.msra.mxu0 %v5255_v14  ;;  %5286 = vmatprep.subr.bf16.mxu1 %v5285_v18  ;;  %v2983_v14 = vld [vmem:[#allocation16 + $0x80] sm:$0xff]  ;;  %v7344_v17 = vpack.c.bf16 %v3011_v60, %v3007_v36 }
 0x902   :  { %5288 = vmatpush1.bf16.msra.mxu1 %v5287_v26  ;;  %5258 = vmatprep.subr.bf16.mxu0 %v5257_v33  ;;  %v2987_v18 = vld [vmem:[#allocation16 + $0xa0] sm:$0xff]  ;;  %v2990_v26 = vld [vmem:[#allocation16 + $0xb8] sm:$0xff]  ;;  %v2985_v33 = vld [vmem:[#allocation16 + $0x90] sm:$0xff] }
 0x903   :  { %2488 = vmatmul.mubr.f32.gmra.mrb[28].mxu0 %v7251_v63  ;;  %2601 = vmatmul.mubr.f32.gmra.mrb[28].mxu1 %v7251_v63  ;;  %v7294_v45 = vpack.c.bf16 %v2987_v18, %v2983_v14  ;;  %v7298_v46 = vpack.c.bf16 %v2990_v26, %v2986_v24  ;;  %v7346_v14 = vpack.c.bf16 %v3014_v19, %v3010_v9  ;;  %v3018_v18 = vld [vmem:[#allocation16 + $0x198] sm:$0xff] }
 0x904   :  { %2493 = vmatprep.mubr.f32.mxu0 %v6492_v0  ;;  %2606 = vmatprep.mubr.f32.mxu1 %v6492_v0  ;;  %v3022_v24 = vld [vmem:[#allocation16 + $0x1b8] sm:$0xff] }
 0x905   :  { %5260 = vmatpush1.bf16.msra.mxu0 %v5259_v1  ;;  %5290 = vmatprep.subr.bf16.mxu1 %v5289_v2  ;;  %v2995_v1 = vld [vmem:[#allocation16 + $0xe0] sm:$0xff]  ;;  %v7304_v2 = vpack.c.bf16 %v2996_v44, %v2992_v38  ;;  %v3017_v38 = vld [vmem:[#allocation16 + $0x190] sm:$0xff]  ;;  %v7362_v15 = vpack.c.bf16 %v3022_v24, %v3018_v18 }
 0x906   :  { %5292 = vmatpush1.bf16.msra.mxu1 %v5291_v21  ;;  %5262 = vmatprep.subr.bf16.mxu0 %v5261_v31  ;;  %v2993_v21 = vld [vmem:[#allocation16 + $0xd0] sm:$0xff]  ;;  %v7312_v37 = vpack.c.bf16 %v2995_v1, %v2991_v50  ;;  %v3024_v50 = vld [vmem:[#allocation16 + $0x1c8] sm:$0xff] }
 0x907   :  { %2494 = vmatmul.mubr.f32.gmra.mrb[30].mxu0 %v7257_v13  ;;  %2607 = vmatmul.mubr.f32.gmra.mrb[30].mxu1 %v7257_v13  ;;  %v2997_v31 = vld [vmem:[#allocation16 + $0xf0] sm:$0xff]  ;;  %v3028_v1 = vld [vmem:[#allocation16 + $0x1e8] sm:$0xff] }
 0x908   :  { %5294 = vmatprep.subr.bf16.mxu1 %v5293_v56  ;;  %2773 = vmatprep.mubr.f32.mxu0 %v6492_v0  ;;  %v7320_v56 = vpack.c.bf16 %v3004_v35, %v3000_v32  ;;  %v3021_v44 = vld [vmem:[#allocation16 + $0x1b0] sm:$0xff]  ;;  %v7368_v32 = vpack.c.bf16 %v3028_v1, %v3024_v50  ;;  %v3023_v35 = vld [vmem:[#allocation16 + $0x1c0] sm:$0xff] }
 0x909   :  { %5264 = vmatpush1.bf16.msra.mxu0 %v5263_v8  ;;  %2886 = vmatprep.mubr.f32.mxu1 %v6492_v0  ;;  %v3001_v8 = vld [vmem:[#allocation16 + $0x110] sm:$0xff] }
 0x90a   :  { %5296 = vmatpush1.bf16.msra.mxu1 %v5295_v49  ;;  %5298 = vmatprep.subr.bf16.mxu0 %v7259_v47  ;;  %v3005_v49 = vld [vmem:[#allocation16 + $0x130] sm:$0xff] }
 0x90b   :  { %5330 = vmatprep.subr.bf16.mxu1 %v7263_v51 }
 0x90f   :  { %2774 = vmatmul.mubr.f32.vlgmr.msra.gmra.mrb[30].mxu0 %v7215_v6  ;;  %2887 = vmatmul.mubr.f32.vlgmr.msra.gmra.mrb[30].mxu1 %v7215_v6  ;;  %v7286_v6 = vpack.c.bf16 %v2988_v52, %v2984_v28  ;;  %v3016_v28 = vld [vmem:[#allocation16 + $0x188] sm:$0xff] }
 0x910   :  { %5300 = vmatpush1.bf16.msra.mxu0 %v7269_v25  ;;  %2779 = vmatprep.mubr.f32.mxu0 %v6492_v0  ;;  %v3020_v52 = vld [vmem:[#allocation16 + $0x1a8] sm:$0xff] }
 0x911   :  { %2892 = vmatprep.mubr.f32.mxu1 %v6492_v0  ;;  %5302 = vmatprep.subr.bf16.mxu0 %v7271_v27  ;;  %v7352_v26 = vpack.c.bf16 %v3020_v52, %v3016_v28 }
 0x912   :  { %5332 = vmatpush1.bf16.msra.mxu1 %v7273_v20 }
 0x913   :  { %2780 = vmatmul.mubr.f32.gmra.mrb[28].mxu0 %v7221_v30  ;;  %2893 = vmatmul.mubr.f32.gmra.mrb[28].mxu1 %v7221_v30  ;;  %v7302_v30 = vpack.c.bf16 %v2989_v34, %v2985_v33  ;;  %v3015_v33 = vld [vmem:[#allocation16 + $0x180] sm:$0xff] }
 0x914   :  { %5304 = vmatpush1.bf16.msra.mxu0 %v7279_v55  ;;  %2785 = vmatprep.mubr.f32.mxu0 %v6492_v0  ;;  %v3019_v34 = vld [vmem:[#allocation16 + $0x1a0] sm:$0xff] }
 0x915   :  { %2898 = vmatprep.mubr.f32.mxu1 %v6492_v0  ;;  %5334 = vmatprep.subr.bf16.mxu1 %v7283_v11  ;;  %v7360_v5 = vpack.c.bf16 %v3019_v34, %v3015_v33 }
 0x916   :  { %5306 = vmatprep.subr.bf16.mxu0 %v7286_v6  ;;  %5336 = vmatpush1.bf16.msra.mxu1 %v7288_v23 }
 0x917   :  { %2786 = vmatmul.mubr.f32.gmra.mrb[26].mxu0 %v7227_v16  ;;  %2899 = vmatmul.mubr.f32.gmra.mrb[26].mxu1 %v7227_v16  ;;  %v7318_v16 = vpack.c.bf16 %v2997_v31, %v2993_v21  ;;  %v3026_v21 = vld [vmem:[#allocation16 + $0x1d8] sm:$0xff] }
 0x918   :  { %5308 = vmatpush1.bf16.msra.mxu0 %v7294_v45  ;;  %2791 = vmatprep.mubr.f32.mxu0 %v6492_v0  ;;  %v3030_v31 = vld [vmem:[#allocation16 + $0x1f8] sm:$0xff] }
 0x919   :  { %2904 = vmatprep.mubr.f32.mxu1 %v6492_v0  ;;  %5338 = vmatprep.subr.bf16.mxu1 %v7298_v46  ;;  %v7374_v58 = vpack.c.bf16 %v3030_v31, %v3026_v21 }
 0x91a   :  { %5340 = vmatpush1.bf16.msra.mxu1 %v7302_v30  ;;  %5310 = vmatprep.subr.bf16.mxu0 %v7304_v2 }
 0x91b   :  { %2792 = vmatmul.mubr.f32.gmra.mrb[24].mxu0 %v7233_v4  ;;  %2905 = vmatmul.mubr.f32.gmra.mrb[24].mxu1 %v7233_v4  ;;  %v7334_v4 = vpack.c.bf16 %v3005_v49, %v3001_v8  ;;  %v7378_v8 = vpack.c.bf16 %v3027_v42, %v3023_v35  ;;  %v7382_v49 = vpack.c.bf16 %v3029_v3, %v3025_v39 }
 0x91c   :  { %2797 = vmatprep.mubr.f32.mxu0 %v6492_v0  ;;  %2910 = vmatprep.mubr.f32.mxu1 %v6492_v0 }
 0x91d   :  { %5312 = vmatpush1.bf16.msra.mxu0 %v7312_v37  ;;  %5342 = vmatprep.subr.bf16.mxu1 %v7314_v41 }
 0x91e   :  { %5344 = vmatpush1.bf16.msra.mxu1 %v7318_v16  ;;  %5314 = vmatprep.subr.bf16.mxu0 %v7320_v56 }
 0x91f   :  { %2798 = vmatmul.mubr.f32.gmra.mrb[22].mxu0 %v7239_v7  ;;  %2911 = vmatmul.mubr.f32.gmra.mrb[22].mxu1 %v7239_v7  ;;  %v7350_v7 = vpack.c.bf16 %v3013_v61, %v3009_v40 }
 0x920   :  { %2803 = vmatprep.mubr.f32.mxu0 %v6492_v0  ;;  %2916 = vmatprep.mubr.f32.mxu1 %v6492_v0 }
 0x921   :  { %5316 = vmatpush1.bf16.msra.mxu0 %v7328_v22  ;;  %5346 = vmatprep.subr.bf16.mxu1 %v7330_v57 }
 0x922   :  { %5348 = vmatpush1.bf16.msra.mxu1 %v7334_v4  ;;  %5318 = vmatprep.subr.bf16.mxu0 %v7336_v29 }
 0x923   :  { %2804 = vmatmul.mubr.f32.gmra.mrb[20].mxu0 %v7245_v12  ;;  %2917 = vmatmul.mubr.f32.gmra.mrb[20].mxu1 %v7245_v12  ;;  %v7366_v12 = vpack.c.bf16 %v3021_v44, %v3017_v38 }
 0x924   :  { %2809 = vmatprep.mubr.f32.mxu0 %v6492_v0  ;;  %2922 = vmatprep.mubr.f32.mxu1 %v6492_v0 }
 0x925   :  { %5320 = vmatpush1.bf16.msra.mxu0 %v7344_v17  ;;  %5350 = vmatprep.subr.bf16.mxu1 %v7346_v14 }
 0x926   :  { %5352 = vmatpush1.bf16.msra.mxu1 %v7350_v7  ;;  %5322 = vmatprep.subr.bf16.mxu0 %v7352_v26 }
 0x927   :  { %2810 = vmatmul.mubr.f32.gmra.mrb[18].mxu0 %v7251_v63  ;;  %2923 = vmatmul.mubr.f32.gmra.mrb[18].mxu1 %v7251_v63  ;;  %v2365_v63 = vld [vmem:[%s7763_s7] sm:$0xf]  ;;  %s6493_s7 = smov [#allocation17]  }
 0x928   :  { %2815 = vmatprep.mubr.f32.mxu0 %v6492_v0  ;;  %2928 = vmatprep.mubr.f32.mxu1 %v6492_v0  ;;  %v7438_v59 = vrot.slane %v2365_v63, %v163_v48  ;;  %v7444_v52 = vrot.slane %v2365_v63, %v171_v54  ;;  %v7449_v48 = vrot.slane %v2365_v63, %v167_v10  ;;  %s4516_s1 = sshll.u32 %s6493_s7, 4  ;;  %s4517_s1 = int_to_ptr.vmem [resolvable:$true] %s4516_s1 }
 0x929   :  { %5324 = vmatpush1.bf16.msra.mxu0 %v7360_v5  ;;  %5354 = vmatprep.subr.bf16.mxu1 %v7362_v15  ;;  %s6425_s20 = scalar_lea.vmem %s4517_s1, 1024  ;;  %p6430_p1 = scmp.lt.s32.totalorder %s4517_s1, %s4517_s1 }
 0x92a   :  { %5356 = vmatpush1.bf16.msra.mxu1 %v7366_v12  ;;  %5326 = vmatprep.subr.bf16.mxu0 %v7368_v32  ;;  %p6426_p0 = scmp.ne.s32.totalorder %s4517_s1, %s6425_s20  ;;  %p6431_p2 = scmp.lt.s32.totalorder %s6425_s20, %s6425_s20 }
 0x92b   :  { %2816 = vmatmul.mubr.f32.gmra.mrb[16].mxu0 %v7257_v13  ;;  %2929 = vmatmul.mubr.f32.gmra.mrb[16].mxu1 %v7257_v13  ;;  %v7434_v13 = vrot.slane %v2365_v63, %v159_v43 }
 0x92c   :  { %5358 = vmatprep.subr.bf16.mxu1 %v7374_v58  ;;  %3107 = vmatprep.mubr.f32.mxu0 %v6492_v0  ;;  %p6432_p3 = por %p6431_p2, %p6430_p1 }
 0x92d   :  { %5328 = vmatpush1.bf16.msra.mxu0 %v7378_v8  ;;  %3178 = vmatprep.mubr.f32.mxu1 %v6492_v0 }
 0x92e   :  { %5360 = vmatpush1.bf16.msra.mxu1 %v7382_v49  ;;  %5362 = vmatprep.subr.bf16.mxu0 %v7259_v47  ;;  %p6433_p4 = pnand %p6432_p3, %p6426_p0 }
 0x92f   :  { %5394 = vmatprep.subr.bf16.mxu1 %v7263_v51 }
 0x933   :  { %3108 = vmatmul.mubr.f32.vlgmr.msra.gmra.mrb[16].mxu0 %v6492_v0  ;;  %3179 = vmatmul.mubr.f32.vlgmr.msra.gmra.mrb[16].mxu1 %v6492_v0 }
 0x934   :  { %5364 = vmatpush1.bf16.msra.mxu0 %v7269_v25  ;;  %5396 = vmatpush1.bf16.msra.mxu1 %v7273_v20 }
 0x935   :  { %5366 = vmatprep.subr.bf16.mxu0 %v7271_v27  ;;  %5398 = vmatprep.subr.bf16.mxu1 %v7283_v11 }
 0x936   :  { %3292 = vmatprep.mubr.f32.mxu0 %v6492_v0  ;;  %3363 = vmatprep.mubr.f32.mxu1 %v6492_v0 }
 0x938   :  { %5368 = vmatpush1.bf16.msra.mxu0 %v7279_v55  ;;  %5400 = vmatpush1.bf16.msra.mxu1 %v7288_v23 }
 0x939   :  { %5370 = vmatprep.subr.bf16.mxu0 %v7286_v6  ;;  %5402 = vmatprep.subr.bf16.mxu1 %v7298_v46 }
 0x93c   :  { %5372 = vmatpush1.bf16.msra.mxu0 %v7294_v45  ;;  %5404 = vmatpush1.bf16.msra.mxu1 %v7302_v30 }
 0x93d   :  { %5374 = vmatprep.subr.bf16.mxu0 %v7304_v2  ;;  %5406 = vmatprep.subr.bf16.mxu1 %v7314_v41 }
 0x940   :  { %5376 = vmatpush1.bf16.msra.mxu0 %v7312_v37  ;;  %5408 = vmatpush1.bf16.msra.mxu1 %v7318_v16 }
 0x941   :  { %5378 = vmatprep.subr.bf16.mxu0 %v7320_v56  ;;  %5410 = vmatprep.subr.bf16.mxu1 %v7330_v57 }
 0x944   :  { %5380 = vmatpush1.bf16.msra.mxu0 %v7328_v22  ;;  %5412 = vmatpush1.bf16.msra.mxu1 %v7334_v4 }
 0x945   :  { %5382 = vmatprep.subr.bf16.mxu0 %v7336_v29  ;;  %5414 = vmatprep.subr.bf16.mxu1 %v7346_v14 }
 0x948   :  { %5384 = vmatpush1.bf16.msra.mxu0 %v7344_v17  ;;  %5416 = vmatpush1.bf16.msra.mxu1 %v7350_v7 }
 0x949   :  { %5386 = vmatprep.subr.bf16.mxu0 %v7352_v26  ;;  %5418 = vmatprep.subr.bf16.mxu1 %v7362_v15 }
 0x94c   :  { %5388 = vmatpush1.bf16.msra.mxu0 %v7360_v5  ;;  %5420 = vmatpush1.bf16.msra.mxu1 %v7366_v12 }
 0x94d   :  { %5390 = vmatprep.subr.bf16.mxu0 %v7368_v32  ;;  %5422 = vmatprep.subr.bf16.mxu1 %v7374_v58 }
 0x950   :  { %5392 = vmatpush1.bf16.msra.mxu0 %v7378_v8  ;;  %5424 = vmatpush1.bf16.msra.mxu1 %v7382_v49 }
 0x951   :  { %5426 = vmatprep.subr.bf16.mxu0 %v7259_v47  ;;  %5458 = vmatprep.subr.bf16.mxu1 %v7263_v51 }
 0xa06   :  { %v3109_v53 = vpop.f32.mrb[16].mxu0  ;;  %v3180_v9 = vpop.f32.mrb[16].mxu1 }
 0xa07   :  { %v5841_v19 = vadd.f32 %v3109_v53, %v7434_v13  ;;  %v3111_v36 = vpop.f32.mrb[17].mxu0  ;;  %v3182_v60 = vpop.f32.mrb[17].mxu1  ;;  %v5857_v24 = vadd.f32 %v3180_v9, %v7449_v48 }
 0xa08   :  { %v5842_v40 = vadd.f32 %v3111_v36, %v7438_v59  ;;  %v5858_v43 = vadd.f32 %v3182_v60, %v7444_v52 }
 0xa09   :  { %v4601_v61 = vmul.f32 -1.442695, %v5841_v19 }
 0xa0a   :  { %v4602_v28 = vmul.f32 -1.442695, %v5842_v40  ;;  %v4603_v18 = vmul.f32 -1.442695, %v5858_v43 }
 0xa0b   :  { %6143 = vpow2.f32 %v4601_v61 }
 0xa0c   :  { %6145 = vpow2.f32 %v4602_v28 }
 0xa0d   :  { %6147 = vpow2.f32 %v4603_v18 }
 0xa0e   :  { %6149 = vtanh.f32 %v5857_v24 }
 0xa15   :  { %v6144_v33 = vpop.eup %6143 }
 0xa16   :  { %v6146_v34 = vpop.eup %6145  ;;  %v3192_v38 = vadd.f32 1.0, %v6144_v33 }
 0xa17   :  { %v3198_v44 = vadd.f32 1.0, %v6146_v34  ;;  %v6148_v54 = vpop.eup %6147 }
 0xa18   :  { %6151 = vrcp.f32 %v3192_v38  ;;  %v6150_v50 = vpop.eup %6149  ;;  %v3205_v35 = vadd.f32 1.0, %v6148_v54 }
 0xa19   :  { %6153 = vrcp.f32 %v3198_v44 }
 0xa1a   :  { %6155 = vrcp.f32 %v3205_v35 }
 0xa22   :  { %v6152_v1 = vpop.eup %6151 }
 0xa23   :  { %v6154_v21 = vpop.eup %6153  ;;  %v3209_v31 = vmul.f32 %v6152_v1, %v6150_v50 }
 0xa24   :  { %v3208_v62 = vmul.f32 0.0, %v6154_v21  ;;  %v6156_v42 = vpop.eup %6155 }
 0xa26   :  { %v7452_v10 = vadd.f32 %v3209_v31, %v3208_v62 }
 0xa28   :  { %6157 = vtanh.f32 %v7452_v10 }
 0xa32   :  { %v6158_v39 = vpop.eup %6157 }
 0xa33   :  { %v3212_v3 = vmul.f32 %v6158_v39, %v6156_v42 }
 0xa35   :  { %3213 = vst.msk [vmem:[#allocation17] sm:$0xff] %vm981_vm1, %v3212_v3  ;;  %3293 = vmatmul.mubr.f32.vlgmr.msra.gmra.mrb[18].mxu0 %v3212_v3  ;;  %3364 = vmatmul.mubr.f32.vlgmr.msra.gmra.mrb[18].mxu1 %v3212_v3 }
 0xa36   :  { %3215 = vst.msk [vmem:[#allocation17 + $0x38] sm:$0xff] %vm984_vm2, %v3212_v3  ;;  %5428 = vmatpush1.bf16.msra.mxu0 %v7269_v25  ;;  %5460 = vmatpush1.bf16.msra.mxu1 %v7273_v20 }
 0xa37   :  { %5430 = vmatprep.subr.bf16.mxu0 %v7271_v27  ;;  %5462 = vmatprep.subr.bf16.mxu1 %v7283_v11 }
 0xa38   :  { %3478 = vmatprep.mubr.f32.mxu0 %v6492_v0  ;;  %3549 = vmatprep.mubr.f32.mxu1 %v6492_v0 }
 0xa3a   :  { %5432 = vmatpush1.bf16.msra.mxu0 %v7279_v55  ;;  %5464 = vmatpush1.bf16.msra.mxu1 %v7288_v23 }
 0xa3b   :  { %5434 = vmatprep.subr.bf16.mxu0 %v7286_v6  ;;  %5466 = vmatprep.subr.bf16.mxu1 %v7298_v46 }
 0xa3e   :  { %5436 = vmatpush1.bf16.msra.mxu0 %v7294_v45  ;;  %5468 = vmatpush1.bf16.msra.mxu1 %v7302_v30 }
 0xa3f   :  { %5438 = vmatprep.subr.bf16.mxu0 %v7304_v2  ;;  %5470 = vmatprep.subr.bf16.mxu1 %v7314_v41 }
 0xa42   :  { %5440 = vmatpush1.bf16.msra.mxu0 %v7312_v37  ;;  %5472 = vmatpush1.bf16.msra.mxu1 %v7318_v16 }
 0xa43   :  { %5442 = vmatprep.subr.bf16.mxu0 %v7320_v56  ;;  %5474 = vmatprep.subr.bf16.mxu1 %v7330_v57 }
 0xa46   :  { %5444 = vmatpush1.bf16.msra.mxu0 %v7328_v22  ;;  %5476 = vmatpush1.bf16.msra.mxu1 %v7334_v4 }
 0xa47   :  { %5446 = vmatprep.subr.bf16.mxu0 %v7336_v29  ;;  %5478 = vmatprep.subr.bf16.mxu1 %v7346_v14 }
 0xa4a   :  { %5448 = vmatpush1.bf16.msra.mxu0 %v7344_v17  ;;  %5480 = vmatpush1.bf16.msra.mxu1 %v7350_v7 }
 0xa4b   :  { %5450 = vmatprep.subr.bf16.mxu0 %v7352_v26  ;;  %5482 = vmatprep.subr.bf16.mxu1 %v7362_v15 }
 0xa4e   :  { %5452 = vmatpush1.bf16.msra.mxu0 %v7360_v5  ;;  %5484 = vmatpush1.bf16.msra.mxu1 %v7366_v12 }
 0xa4f   :  { %5454 = vmatprep.subr.bf16.mxu0 %v7368_v32  ;;  %5486 = vmatprep.subr.bf16.mxu1 %v7374_v58 }
 0xa52   :  { %5456 = vmatpush1.bf16.msra.mxu0 %v7378_v8  ;;  %5488 = vmatpush1.bf16.msra.mxu1 %v7382_v49 }
 0xa53   :  { %5490 = vmatprep.subr.bf16.mxu0 %v7259_v47  ;;  %5522 = vmatprep.subr.bf16.mxu1 %v7263_v51 }
 0xb08   :  { %v3294_v63 = vpop.f32.mrb[18].mxu0  ;;  %v3365_v53 = vpop.f32.mrb[18].mxu1 }
 0xb09   :  { %v5843_v9 = vadd.f32 %v3294_v63, %v7434_v13  ;;  %v3296_v19 = vpop.f32.mrb[19].mxu0  ;;  %v3367_v36 = vpop.f32.mrb[19].mxu1  ;;  %v5859_v18 = vadd.f32 %v3365_v53, %v7449_v48 }
 0xb0a   :  { %v5844_v60 = vadd.f32 %v3296_v19, %v7438_v59  ;;  %v5860_v28 = vadd.f32 %v3367_v36, %v7444_v52 }
 0xb0b   :  { %v4604_v40 = vmul.f32 -1.442695, %v5843_v9 }
 0xb0c   :  { %v4605_v61 = vmul.f32 -1.442695, %v5844_v60  ;;  %v4606_v43 = vmul.f32 -1.442695, %v5860_v28 }
 0xb0d   :  { %6159 = vpow2.f32 %v4604_v40 }
 0xb0e   :  { %6161 = vpow2.f32 %v4605_v61 }
 0xb0f   :  { %6163 = vpow2.f32 %v4606_v43 }
 0xb10   :  { %6165 = vtanh.f32 %v5859_v18 }
 0xb17   :  { %v6160_v24 = vpop.eup %6159 }
 0xb18   :  { %v6162_v33 = vpop.eup %6161  ;;  %v3377_v34 = vadd.f32 1.0, %v6160_v24 }
 0xb19   :  { %v3383_v38 = vadd.f32 1.0, %v6162_v33  ;;  %v6164_v44 = vpop.eup %6163 }
 0xb1a   :  { %6167 = vrcp.f32 %v3377_v34  ;;  %v6166_v54 = vpop.eup %6165  ;;  %v3390_v31 = vadd.f32 1.0, %v6164_v44 }
 0xb1b   :  { %6169 = vrcp.f32 %v3383_v38 }
 0xb1c   :  { %6171 = vrcp.f32 %v3390_v31 }
 0xb24   :  { %v6168_v50 = vpop.eup %6167 }
 0xb25   :  { %v6170_v1 = vpop.eup %6169  ;;  %v3394_v21 = vmul.f32 %v6168_v50, %v6166_v54 }
 0xb26   :  { %v3393_v35 = vmul.f32 %v6170_v1, %v7452_v10  ;;  %v6172_v42 = vpop.eup %6171 }
 0xb28   :  { %v7496_v62 = vadd.f32 %v3394_v21, %v3393_v35 }
 0xb2a   :  { %6173 = vtanh.f32 %v7496_v62 }
 0xb34   :  { %v6174_v39 = vpop.eup %6173 }
 0xb35   :  { %v3397_v3 = vmul.f32 %v6174_v39, %v6172_v42 }
 0xb37   :  { %3399 = vst.msk [vmem:[#allocation17 + $0x8] sm:$0xff] %vm981_vm1, %v3397_v3  ;;  %3479 = vmatmul.mubr.f32.vlgmr.msra.gmra.mrb[20].mxu0 %v3397_v3  ;;  %3550 = vmatmul.mubr.f32.vlgmr.msra.gmra.mrb[20].mxu1 %v3397_v3 }
 0xb38   :  { %3401 = vst.msk [vmem:[#allocation17 + $0x30] sm:$0xff] %vm984_vm2, %v3397_v3  ;;  %5492 = vmatpush1.bf16.msra.mxu0 %v7269_v25  ;;  %5524 = vmatpush1.bf16.msra.mxu1 %v7273_v20 }
 0xb39   :  { %5494 = vmatprep.subr.bf16.mxu0 %v7271_v27  ;;  %5526 = vmatprep.subr.bf16.mxu1 %v7283_v11 }
 0xb3a   :  { %3664 = vmatprep.mubr.f32.mxu0 %v6492_v0  ;;  %3735 = vmatprep.mubr.f32.mxu1 %v6492_v0 }
 0xb3c   :  { %5496 = vmatpush1.bf16.msra.mxu0 %v7279_v55  ;;  %5528 = vmatpush1.bf16.msra.mxu1 %v7288_v23 }
 0xb3d   :  { %5498 = vmatprep.subr.bf16.mxu0 %v7286_v6  ;;  %5530 = vmatprep.subr.bf16.mxu1 %v7298_v46 }
 0xb40   :  { %5500 = vmatpush1.bf16.msra.mxu0 %v7294_v45  ;;  %5532 = vmatpush1.bf16.msra.mxu1 %v7302_v30 }
 0xb41   :  { %5502 = vmatprep.subr.bf16.mxu0 %v7304_v2  ;;  %5534 = vmatprep.subr.bf16.mxu1 %v7314_v41 }
 0xb44   :  { %5504 = vmatpush1.bf16.msra.mxu0 %v7312_v37  ;;  %5536 = vmatpush1.bf16.msra.mxu1 %v7318_v16 }
 0xb45   :  { %5506 = vmatprep.subr.bf16.mxu0 %v7320_v56  ;;  %5538 = vmatprep.subr.bf16.mxu1 %v7330_v57 }
 0xb48   :  { %5508 = vmatpush1.bf16.msra.mxu0 %v7328_v22  ;;  %5540 = vmatpush1.bf16.msra.mxu1 %v7334_v4 }
 0xb49   :  { %5510 = vmatprep.subr.bf16.mxu0 %v7336_v29  ;;  %5542 = vmatprep.subr.bf16.mxu1 %v7346_v14 }
 0xb4c   :  { %5512 = vmatpush1.bf16.msra.mxu0 %v7344_v17  ;;  %5544 = vmatpush1.bf16.msra.mxu1 %v7350_v7 }
 0xb4d   :  { %5514 = vmatprep.subr.bf16.mxu0 %v7352_v26  ;;  %5546 = vmatprep.subr.bf16.mxu1 %v7362_v15 }
 0xb50   :  { %5516 = vmatpush1.bf16.msra.mxu0 %v7360_v5  ;;  %5548 = vmatpush1.bf16.msra.mxu1 %v7366_v12 }
 0xb51   :  { %5518 = vmatprep.subr.bf16.mxu0 %v7368_v32  ;;  %5550 = vmatprep.subr.bf16.mxu1 %v7374_v58 }
 0xb54   :  { %5520 = vmatpush1.bf16.msra.mxu0 %v7378_v8  ;;  %5552 = vmatpush1.bf16.msra.mxu1 %v7382_v49 }
 0xb55   :  { %5554 = vmatprep.subr.bf16.mxu0 %v7259_v47  ;;  %5586 = vmatprep.subr.bf16.mxu1 %v7263_v51 }
 0xc0a   :  { %v3480_v10 = vpop.f32.mrb[20].mxu0  ;;  %v3551_v63 = vpop.f32.mrb[20].mxu1 }
 0xc0b   :  { %v5845_v53 = vadd.f32 %v3480_v10, %v7434_v13  ;;  %v3482_v9 = vpop.f32.mrb[21].mxu0  ;;  %v3553_v19 = vpop.f32.mrb[21].mxu1  ;;  %v5861_v43 = vadd.f32 %v3551_v63, %v7449_v48 }
 0xc0c   :  { %v5846_v36 = vadd.f32 %v3482_v9, %v7438_v59  ;;  %v5862_v61 = vadd.f32 %v3553_v19, %v7444_v52 }
 0xc0d   :  { %v4607_v60 = vmul.f32 -1.442695, %v5845_v53 }
 0xc0e   :  { %v4608_v40 = vmul.f32 -1.442695, %v5846_v36  ;;  %v4609_v28 = vmul.f32 -1.442695, %v5862_v61 }
 0xc0f   :  { %6175 = vpow2.f32 %v4607_v60 }
 0xc10   :  { %6177 = vpow2.f32 %v4608_v40 }
 0xc11   :  { %6179 = vpow2.f32 %v4609_v28 }
 0xc12   :  { %6181 = vtanh.f32 %v5861_v43 }
 0xc19   :  { %v6176_v18 = vpop.eup %6175 }
 0xc1a   :  { %v6178_v24 = vpop.eup %6177  ;;  %v3563_v33 = vadd.f32 1.0, %v6176_v18 }
 0xc1b   :  { %v3569_v34 = vadd.f32 1.0, %v6178_v24  ;;  %v6180_v38 = vpop.eup %6179 }
 0xc1c   :  { %6183 = vrcp.f32 %v3563_v33  ;;  %v6182_v44 = vpop.eup %6181  ;;  %v3576_v21 = vadd.f32 1.0, %v6180_v38 }
 0xc1d   :  { %6185 = vrcp.f32 %v3569_v34 }
 0xc1e   :  { %6187 = vrcp.f32 %v3576_v21 }
 0xc26   :  { %v6184_v54 = vpop.eup %6183 }
 0xc27   :  { %v6186_v50 = vpop.eup %6185  ;;  %v3580_v1 = vmul.f32 %v6184_v54, %v6182_v44 }
 0xc28   :  { %v3579_v31 = vmul.f32 %v6186_v50, %v7496_v62  ;;  %v6188_v42 = vpop.eup %6187 }
 0xc2a   :  { %v7540_v35 = vadd.f32 %v3580_v1, %v3579_v31 }
 0xc2c   :  { %6189 = vtanh.f32 %v7540_v35 }
 0xc36   :  { %v6190_v39 = vpop.eup %6189 }
 0xc37   :  { %v3583_v3 = vmul.f32 %v6190_v39, %v6188_v42 }
 0xc39   :  { %3585 = vst.msk [vmem:[#allocation17 + $0x10] sm:$0xff] %vm981_vm1, %v3583_v3  ;;  %3665 = vmatmul.mubr.f32.vlgmr.msra.gmra.mrb[22].mxu0 %v3583_v3  ;;  %3736 = vmatmul.mubr.f32.vlgmr.msra.gmra.mrb[22].mxu1 %v3583_v3 }
 0xc3a   :  { %3587 = vst.msk [vmem:[#allocation17 + $0x28] sm:$0xff] %vm984_vm2, %v3583_v3  ;;  %5556 = vmatpush1.bf16.msra.mxu0 %v7269_v25  ;;  %5588 = vmatpush1.bf16.msra.mxu1 %v7273_v20 }
 0xc3b   :  { %5558 = vmatprep.subr.bf16.mxu0 %v7271_v27  ;;  %5590 = vmatprep.subr.bf16.mxu1 %v7283_v11 }
 0xc3c   :  { %3850 = vmatprep.mubr.f32.mxu0 %v6492_v0  ;;  %3921 = vmatprep.mubr.f32.mxu1 %v6492_v0 }
 0xc3e   :  { %5560 = vmatpush1.bf16.msra.mxu0 %v7279_v55  ;;  %5592 = vmatpush1.bf16.msra.mxu1 %v7288_v23 }
 0xc3f   :  { %5562 = vmatprep.subr.bf16.mxu0 %v7286_v6  ;;  %5594 = vmatprep.subr.bf16.mxu1 %v7298_v46 }
 0xc42   :  { %5564 = vmatpush1.bf16.msra.mxu0 %v7294_v45  ;;  %5596 = vmatpush1.bf16.msra.mxu1 %v7302_v30 }
 0xc43   :  { %5566 = vmatprep.subr.bf16.mxu0 %v7304_v2  ;;  %5598 = vmatprep.subr.bf16.mxu1 %v7314_v41 }
 0xc46   :  { %5568 = vmatpush1.bf16.msra.mxu0 %v7312_v37  ;;  %5600 = vmatpush1.bf16.msra.mxu1 %v7318_v16 }
 0xc47   :  { %5570 = vmatprep.subr.bf16.mxu0 %v7320_v56  ;;  %5602 = vmatprep.subr.bf16.mxu1 %v7330_v57 }
 0xc4a   :  { %5572 = vmatpush1.bf16.msra.mxu0 %v7328_v22  ;;  %5604 = vmatpush1.bf16.msra.mxu1 %v7334_v4 }
 0xc4b   :  { %5574 = vmatprep.subr.bf16.mxu0 %v7336_v29  ;;  %5606 = vmatprep.subr.bf16.mxu1 %v7346_v14 }
 0xc4e   :  { %5576 = vmatpush1.bf16.msra.mxu0 %v7344_v17  ;;  %5608 = vmatpush1.bf16.msra.mxu1 %v7350_v7 }
 0xc4f   :  { %5578 = vmatprep.subr.bf16.mxu0 %v7352_v26  ;;  %5610 = vmatprep.subr.bf16.mxu1 %v7362_v15 }
 0xc52   :  { %5580 = vmatpush1.bf16.msra.mxu0 %v7360_v5  ;;  %5612 = vmatpush1.bf16.msra.mxu1 %v7366_v12 }
 0xc53   :  { %5582 = vmatprep.subr.bf16.mxu0 %v7368_v32  ;;  %5614 = vmatprep.subr.bf16.mxu1 %v7374_v58 }
 0xc56   :  { %5584 = vmatpush1.bf16.msra.mxu0 %v7378_v8  ;;  %5616 = vmatpush1.bf16.msra.mxu1 %v7382_v49 }
 0xc57   :  { %5618 = vmatprep.subr.bf16.mxu0 %v7259_v47  ;;  %5650 = vmatprep.subr.bf16.mxu1 %v7263_v51 }
 0xd0c   :  { %v3666_v62 = vpop.f32.mrb[22].mxu0  ;;  %v3737_v10 = vpop.f32.mrb[22].mxu1 }
 0xd0d   :  { %v5847_v63 = vadd.f32 %v3666_v62, %v7434_v13  ;;  %v3668_v53 = vpop.f32.mrb[23].mxu0  ;;  %v3739_v9 = vpop.f32.mrb[23].mxu1  ;;  %v5863_v28 = vadd.f32 %v3737_v10, %v7449_v48 }
 0xd0e   :  { %v5848_v19 = vadd.f32 %v3668_v53, %v7438_v59  ;;  %v5864_v40 = vadd.f32 %v3739_v9, %v7444_v52 }
 0xd0f   :  { %v4610_v36 = vmul.f32 -1.442695, %v5847_v63 }
 0xd10   :  { %v4611_v60 = vmul.f32 -1.442695, %v5848_v19  ;;  %v4612_v61 = vmul.f32 -1.442695, %v5864_v40 }
 0xd11   :  { %6191 = vpow2.f32 %v4610_v36 }
 0xd12   :  { %6193 = vpow2.f32 %v4611_v60 }
 0xd13   :  { %6195 = vpow2.f32 %v4612_v61 }
 0xd14   :  { %6197 = vtanh.f32 %v5863_v28 }
 0xd1b   :  { %v6192_v43 = vpop.eup %6191 }
 0xd1c   :  { %v6194_v18 = vpop.eup %6193  ;;  %v3749_v24 = vadd.f32 1.0, %v6192_v43 }
 0xd1d   :  { %v3755_v33 = vadd.f32 1.0, %v6194_v18  ;;  %v6196_v34 = vpop.eup %6195 }
 0xd1e   :  { %6199 = vrcp.f32 %v3749_v24  ;;  %v6198_v38 = vpop.eup %6197  ;;  %v3762_v1 = vadd.f32 1.0, %v6196_v34 }
 0xd1f   :  { %6201 = vrcp.f32 %v3755_v33 }
 0xd20   :  { %6203 = vrcp.f32 %v3762_v1 }
 0xd28   :  { %v6200_v44 = vpop.eup %6199 }
 0xd29   :  { %v6202_v54 = vpop.eup %6201  ;;  %v3766_v50 = vmul.f32 %v6200_v44, %v6198_v38 }
 0xd2a   :  { %v3765_v21 = vmul.f32 %v6202_v54, %v7540_v35  ;;  %v6204_v42 = vpop.eup %6203 }
 0xd2c   :  { %v7584_v31 = vadd.f32 %v3766_v50, %v3765_v21 }
 0xd2e   :  { %6205 = vtanh.f32 %v7584_v31 }
 0xd38   :  { %v6206_v39 = vpop.eup %6205 }
 0xd39   :  { %v3769_v3 = vmul.f32 %v6206_v39, %v6204_v42 }
 0xd3b   :  { %3771 = vst.msk [vmem:[#allocation17 + $0x18] sm:$0xff] %vm981_vm1, %v3769_v3  ;;  %3851 = vmatmul.mubr.f32.vlgmr.msra.gmra.mrb[24].mxu0 %v3769_v3  ;;  %3922 = vmatmul.mubr.f32.vlgmr.msra.gmra.mrb[24].mxu1 %v3769_v3 }
 0xd3c   :  { %3773 = vst.msk [vmem:[#allocation17 + $0x20] sm:$0xff] %vm984_vm2, %v3769_v3  ;;  %5620 = vmatpush1.bf16.msra.mxu0 %v7269_v25  ;;  %5652 = vmatpush1.bf16.msra.mxu1 %v7273_v20 }
 0xd3d   :  { %5622 = vmatprep.subr.bf16.mxu0 %v7271_v27  ;;  %5654 = vmatprep.subr.bf16.mxu1 %v7283_v11 }
 0xd3e   :  { %4034 = vmatprep.mubr.f32.mxu0 %v6492_v0  ;;  %4105 = vmatprep.mubr.f32.mxu1 %v6492_v0 }
 0xd40   :  { %5624 = vmatpush1.bf16.msra.mxu0 %v7279_v55  ;;  %5656 = vmatpush1.bf16.msra.mxu1 %v7288_v23 }
 0xd41   :  { %5626 = vmatprep.subr.bf16.mxu0 %v7286_v6  ;;  %5658 = vmatprep.subr.bf16.mxu1 %v7298_v46 }
 0xd44   :  { %5628 = vmatpush1.bf16.msra.mxu0 %v7294_v45  ;;  %5660 = vmatpush1.bf16.msra.mxu1 %v7302_v30 }
 0xd45   :  { %5630 = vmatprep.subr.bf16.mxu0 %v7304_v2  ;;  %5662 = vmatprep.subr.bf16.mxu1 %v7314_v41 }
 0xd48   :  { %5632 = vmatpush1.bf16.msra.mxu0 %v7312_v37  ;;  %5664 = vmatpush1.bf16.msra.mxu1 %v7318_v16 }
 0xd49   :  { %5634 = vmatprep.subr.bf16.mxu0 %v7320_v56  ;;  %5666 = vmatprep.subr.bf16.mxu1 %v7330_v57 }
 0xd4c   :  { %5636 = vmatpush1.bf16.msra.mxu0 %v7328_v22  ;;  %5668 = vmatpush1.bf16.msra.mxu1 %v7334_v4 }
 0xd4d   :  { %5638 = vmatprep.subr.bf16.mxu0 %v7336_v29  ;;  %5670 = vmatprep.subr.bf16.mxu1 %v7346_v14 }
 0xd50   :  { %5640 = vmatpush1.bf16.msra.mxu0 %v7344_v17  ;;  %5672 = vmatpush1.bf16.msra.mxu1 %v7350_v7 }
 0xd51   :  { %5642 = vmatprep.subr.bf16.mxu0 %v7352_v26  ;;  %5674 = vmatprep.subr.bf16.mxu1 %v7362_v15 }
 0xd54   :  { %5644 = vmatpush1.bf16.msra.mxu0 %v7360_v5  ;;  %5676 = vmatpush1.bf16.msra.mxu1 %v7366_v12 }
 0xd55   :  { %5646 = vmatprep.subr.bf16.mxu0 %v7368_v32  ;;  %5678 = vmatprep.subr.bf16.mxu1 %v7374_v58 }
 0xd58   :  { %5648 = vmatpush1.bf16.msra.mxu0 %v7378_v8  ;;  %5680 = vmatpush1.bf16.msra.mxu1 %v7382_v49 }
 0xd59   :  { %5682 = vmatprep.subr.bf16.mxu0 %v7259_v47  ;;  %5714 = vmatprep.subr.bf16.mxu1 %v7263_v51 }
 0xe0e   :  { %v3852_v35 = vpop.f32.mrb[24].mxu0  ;;  %v3923_v62 = vpop.f32.mrb[24].mxu1 }
 0xe0f   :  { %v5849_v10 = vadd.f32 %v3852_v35, %v7434_v13  ;;  %v3854_v63 = vpop.f32.mrb[25].mxu0  ;;  %v3925_v53 = vpop.f32.mrb[25].mxu1  ;;  %v5865_v61 = vadd.f32 %v3923_v62, %v7449_v48 }
 0xe10   :  { %v5850_v9 = vadd.f32 %v3854_v63, %v7438_v59  ;;  %v5866_v60 = vadd.f32 %v3925_v53, %v7444_v52 }
 0xe11   :  { %v4613_v19 = vmul.f32 -1.442695, %v5849_v10 }
 0xe12   :  { %v4614_v36 = vmul.f32 -1.442695, %v5850_v9  ;;  %v4615_v40 = vmul.f32 -1.442695, %v5866_v60 }
 0xe13   :  { %6207 = vpow2.f32 %v4613_v19 }
 0xe14   :  { %6209 = vpow2.f32 %v4614_v36 }
 0xe15   :  { %6211 = vpow2.f32 %v4615_v40 }
 0xe16   :  { %6213 = vtanh.f32 %v5865_v61 }
 0xe1d   :  { %v6208_v28 = vpop.eup %6207 }
 0xe1e   :  { %v6210_v43 = vpop.eup %6209  ;;  %v3935_v18 = vadd.f32 1.0, %v6208_v28 }
 0xe1f   :  { %v3941_v24 = vadd.f32 1.0, %v6210_v43  ;;  %v6212_v33 = vpop.eup %6211 }
 0xe20   :  { %6215 = vrcp.f32 %v3935_v18  ;;  %v6214_v34 = vpop.eup %6213  ;;  %v3948_v50 = vadd.f32 1.0, %v6212_v33 }
 0xe21   :  { %6217 = vrcp.f32 %v3941_v24 }
 0xe22   :  { %6219 = vrcp.f32 %v3948_v50 }
 0xe2a   :  { %v6216_v38 = vpop.eup %6215 }
 0xe2b   :  { %v6218_v44 = vpop.eup %6217  ;;  %v3952_v54 = vmul.f32 %v6216_v38, %v6214_v34 }
 0xe2c   :  { %v3951_v1 = vmul.f32 %v6218_v44, %v7584_v31  ;;  %v6220_v42 = vpop.eup %6219 }
 0xe2e   :  { %v7628_v21 = vadd.f32 %v3952_v54, %v3951_v1 }
 0xe30   :  { %6221 = vtanh.f32 %v7628_v21 }
 0xe3a   :  { %v6222_v39 = vpop.eup %6221 }
 0xe3b   :  { %v3955_v3 = vmul.f32 %v6222_v39, %v6220_v42 }
 0xe3d   :  { %3956 = vst.msk [vmem:[#allocation17 + $0x20] sm:$0xff] %vm981_vm1, %v3955_v3  ;;  %4035 = vmatmul.mubr.f32.vlgmr.msra.gmra.mrb[26].mxu0 %v3955_v3  ;;  %4106 = vmatmul.mubr.f32.vlgmr.msra.gmra.mrb[26].mxu1 %v3955_v3 }
 0xe3e   :  { %3957 = vst.msk [vmem:[#allocation17 + $0x18] sm:$0xff] %vm984_vm2, %v3955_v3  ;;  %5684 = vmatpush1.bf16.msra.mxu0 %v7269_v25  ;;  %5716 = vmatpush1.bf16.msra.mxu1 %v7273_v20 }
 0xe3f   :  { %5686 = vmatprep.subr.bf16.mxu0 %v7271_v27  ;;  %5718 = vmatprep.subr.bf16.mxu1 %v7283_v11 }
 0xe40   :  { %4218 = vmatprep.mubr.f32.mxu0 %v6492_v0  ;;  %4289 = vmatprep.mubr.f32.mxu1 %v6492_v0 }
 0xe42   :  { %5688 = vmatpush1.bf16.msra.mxu0 %v7279_v55  ;;  %5720 = vmatpush1.bf16.msra.mxu1 %v7288_v23 }
 0xe43   :  { %5690 = vmatprep.subr.bf16.mxu0 %v7286_v6  ;;  %5722 = vmatprep.subr.bf16.mxu1 %v7298_v46 }
 0xe46   :  { %5692 = vmatpush1.bf16.msra.mxu0 %v7294_v45  ;;  %5724 = vmatpush1.bf16.msra.mxu1 %v7302_v30 }
 0xe47   :  { %5694 = vmatprep.subr.bf16.mxu0 %v7304_v2  ;;  %5726 = vmatprep.subr.bf16.mxu1 %v7314_v41 }
 0xe4a   :  { %5696 = vmatpush1.bf16.msra.mxu0 %v7312_v37  ;;  %5728 = vmatpush1.bf16.msra.mxu1 %v7318_v16 }
 0xe4b   :  { %5698 = vmatprep.subr.bf16.mxu0 %v7320_v56  ;;  %5730 = vmatprep.subr.bf16.mxu1 %v7330_v57 }
 0xe4e   :  { %5700 = vmatpush1.bf16.msra.mxu0 %v7328_v22  ;;  %5732 = vmatpush1.bf16.msra.mxu1 %v7334_v4 }
 0xe4f   :  { %5702 = vmatprep.subr.bf16.mxu0 %v7336_v29  ;;  %5734 = vmatprep.subr.bf16.mxu1 %v7346_v14 }
 0xe52   :  { %5704 = vmatpush1.bf16.msra.mxu0 %v7344_v17  ;;  %5736 = vmatpush1.bf16.msra.mxu1 %v7350_v7 }
 0xe53   :  { %5706 = vmatprep.subr.bf16.mxu0 %v7352_v26  ;;  %5738 = vmatprep.subr.bf16.mxu1 %v7362_v15 }
 0xe56   :  { %5708 = vmatpush1.bf16.msra.mxu0 %v7360_v5  ;;  %5740 = vmatpush1.bf16.msra.mxu1 %v7366_v12 }
 0xe57   :  { %5710 = vmatprep.subr.bf16.mxu0 %v7368_v32  ;;  %5742 = vmatprep.subr.bf16.mxu1 %v7374_v58 }
 0xe5a   :  { %5712 = vmatpush1.bf16.msra.mxu0 %v7378_v8  ;;  %5744 = vmatpush1.bf16.msra.mxu1 %v7382_v49 }
 0xe5b   :  { %5746 = vmatprep.subr.bf16.mxu0 %v7259_v47  ;;  %5778 = vmatprep.subr.bf16.mxu1 %v7263_v51 }
 0xf10   :  { %v4036_v31 = vpop.f32.mrb[26].mxu0  ;;  %v4107_v35 = vpop.f32.mrb[26].mxu1 }
 0xf11   :  { %v5851_v62 = vadd.f32 %v4036_v31, %v7434_v13  ;;  %v4038_v10 = vpop.f32.mrb[27].mxu0  ;;  %v4109_v63 = vpop.f32.mrb[27].mxu1  ;;  %v5867_v40 = vadd.f32 %v4107_v35, %v7449_v48 }
 0xf12   :  { %v5852_v53 = vadd.f32 %v4038_v10, %v7438_v59  ;;  %v5868_v36 = vadd.f32 %v4109_v63, %v7444_v52 }
 0xf13   :  { %v4616_v9 = vmul.f32 -1.442695, %v5851_v62 }
 0xf14   :  { %v4617_v19 = vmul.f32 -1.442695, %v5852_v53  ;;  %v4618_v60 = vmul.f32 -1.442695, %v5868_v36 }
 0xf15   :  { %6223 = vpow2.f32 %v4616_v9 }
 0xf16   :  { %6225 = vpow2.f32 %v4617_v19 }
 0xf17   :  { %6227 = vpow2.f32 %v4618_v60 }
 0xf18   :  { %6229 = vtanh.f32 %v5867_v40 }
 0xf1f   :  { %v6224_v47 = vpop.eup %6223 }
 0xf20   :  { %v6226_v61 = vpop.eup %6225  ;;  %v4119_v51 = vadd.f32 1.0, %v6224_v47 }
 0xf21   :  { %v4125_v28 = vadd.f32 1.0, %v6226_v61  ;;  %v6228_v43 = vpop.eup %6227 }
 0xf22   :  { %6231 = vrcp.f32 %v4119_v51  ;;  %v6230_v18 = vpop.eup %6229  ;;  %v4132_v38 = vadd.f32 1.0, %v6228_v43 }
 0xf23   :  { %6233 = vrcp.f32 %v4125_v28 }
 0xf24   :  { %6235 = vrcp.f32 %v4132_v38 }
 0xf2c   :  { %v6232_v24 = vpop.eup %6231 }
 0xf2d   :  { %v6234_v33 = vpop.eup %6233  ;;  %v4136_v34 = vmul.f32 %v6232_v24, %v6230_v18 }
 0xf2e   :  { %v4135_v44 = vmul.f32 %v6234_v33, %v7628_v21  ;;  %v6236_v50 = vpop.eup %6235 }
 0xf30   :  { %v7672_v54 = vadd.f32 %v4136_v34, %v4135_v44 }
 0xf32   :  { %6237 = vtanh.f32 %v7672_v54 }
 0xf3c   :  { %v6238_v1 = vpop.eup %6237 }
 0xf3d   :  { %v4139_v42 = vmul.f32 %v6238_v1, %v6236_v50 }
 0xf3f   :  { %4140 = vst.msk [vmem:[#allocation17 + $0x28] sm:$0xff] %vm981_vm1, %v4139_v42  ;;  %4219 = vmatmul.mubr.f32.vlgmr.msra.gmra.mrb[28].mxu0 %v4139_v42  ;;  %4290 = vmatmul.mubr.f32.vlgmr.msra.gmra.mrb[28].mxu1 %v4139_v42 }
 0xf40   :  { %4141 = vst.msk [vmem:[#allocation17 + $0x10] sm:$0xff] %vm984_vm2, %v4139_v42  ;;  %5748 = vmatpush1.bf16.msra.mxu0 %v7269_v25  ;;  %5780 = vmatpush1.bf16.msra.mxu1 %v7273_v20 }
 0xf41   :  { %5750 = vmatprep.subr.bf16.mxu0 %v7271_v27  ;;  %5782 = vmatprep.subr.bf16.mxu1 %v7283_v11 }
 0xf42   :  { %4402 = vmatprep.mubr.f32.mxu0 %v6492_v0  ;;  %4473 = vmatprep.mubr.f32.mxu1 %v6492_v0 }
 0xf44   :  { %5752 = vmatpush1.bf16.msra.mxu0 %v7279_v55  ;;  %5784 = vmatpush1.bf16.msra.mxu1 %v7288_v23 }
 0xf45   :  { %5754 = vmatprep.subr.bf16.mxu0 %v7286_v6  ;;  %5786 = vmatprep.subr.bf16.mxu1 %v7298_v46 }
 0xf48   :  { %5756 = vmatpush1.bf16.msra.mxu0 %v7294_v45  ;;  %5788 = vmatpush1.bf16.msra.mxu1 %v7302_v30 }
 0xf49   :  { %5758 = vmatprep.subr.bf16.mxu0 %v7304_v2  ;;  %5790 = vmatprep.subr.bf16.mxu1 %v7314_v41 }
 0xf4c   :  { %5760 = vmatpush1.bf16.msra.mxu0 %v7312_v37  ;;  %5792 = vmatpush1.bf16.msra.mxu1 %v7318_v16 }
 0xf4d   :  { %5762 = vmatprep.subr.bf16.mxu0 %v7320_v56  ;;  %5794 = vmatprep.subr.bf16.mxu1 %v7330_v57 }
 0xf50   :  { %5764 = vmatpush1.bf16.msra.mxu0 %v7328_v22  ;;  %5796 = vmatpush1.bf16.msra.mxu1 %v7334_v4 }
 0xf51   :  { %5766 = vmatprep.subr.bf16.mxu0 %v7336_v29  ;;  %5798 = vmatprep.subr.bf16.mxu1 %v7346_v14 }
 0xf54   :  { %5768 = vmatpush1.bf16.msra.mxu0 %v7344_v17  ;;  %5800 = vmatpush1.bf16.msra.mxu1 %v7350_v7 }
 0xf55   :  { %5770 = vmatprep.subr.bf16.mxu0 %v7352_v26  ;;  %5802 = vmatprep.subr.bf16.mxu1 %v7362_v15 }
 0xf58   :  { %5772 = vmatpush1.bf16.msra.mxu0 %v7360_v5  ;;  %5804 = vmatpush1.bf16.msra.mxu1 %v7366_v12 }
 0xf59   :  { %5774 = vmatprep.subr.bf16.mxu0 %v7368_v32  ;;  %5806 = vmatprep.subr.bf16.mxu1 %v7374_v58 }
 0xf5c   :  { %5776 = vmatpush1.bf16.msra.mxu0 %v7378_v8  ;;  %5808 = vmatpush1.bf16.msra.mxu1 %v7382_v49 }
0x1012   :  { %v4220_v0 = vpop.f32.mrb[28].mxu0  ;;  %v4291_v25 = vpop.f32.mrb[28].mxu1 }
0x1013   :  { %v5853_v27 = vadd.f32 %v4220_v0, %v7434_v13  ;;  %v4222_v20 = vpop.f32.mrb[29].mxu0  ;;  %v4293_v55 = vpop.f32.mrb[29].mxu1  ;;  %v5869_v30 = vadd.f32 %v4291_v25, %v7449_v48 }
0x1014   :  { %v5854_v11 = vadd.f32 %v4222_v20, %v7438_v59  ;;  %v5870_v45 = vadd.f32 %v4293_v55, %v7444_v52 }
0x1015   :  { %v4619_v6 = vmul.f32 -1.442695, %v5853_v27 }
0x1016   :  { %v4620_v23 = vmul.f32 -1.442695, %v5854_v11  ;;  %v4621_v46 = vmul.f32 -1.442695, %v5870_v45 }
0x1017   :  { %6239 = vpow2.f32 %v4619_v6 }
0x1018   :  { %6241 = vpow2.f32 %v4620_v23 }
0x1019   :  { %6243 = vpow2.f32 %v4621_v46 }
0x101a   :  { %6245 = vtanh.f32 %v5869_v30 }
0x1021   :  { %v6240_v2 = vpop.eup %6239 }
0x1022   :  { %v6242_v37 = vpop.eup %6241  ;;  %v4303_v41 = vadd.f32 1.0, %v6240_v2 }
0x1023   :  { %v4309_v16 = vadd.f32 1.0, %v6242_v37  ;;  %v6244_v56 = vpop.eup %6243 }
0x1024   :  { %6247 = vrcp.f32 %v4303_v41  ;;  %v6246_v22 = vpop.eup %6245  ;;  %v4316_v17 = vadd.f32 1.0, %v6244_v56 }
0x1025   :  { %6249 = vrcp.f32 %v4309_v16 }
0x1026   :  { %6251 = vrcp.f32 %v4316_v17 }
0x102e   :  { %v6248_v57 = vpop.eup %6247 }
0x102f   :  { %v6250_v4 = vpop.eup %6249  ;;  %v4320_v29 = vmul.f32 %v6248_v57, %v6246_v22 }
0x1030   :  { %v4319_v14 = vmul.f32 %v6250_v4, %v7672_v54  ;;  %v6252_v26 = vpop.eup %6251 }
0x1032   :  { %v4321_v7 = vadd.f32 %v4320_v29, %v4319_v14 }
0x1034   :  { %6253 = vtanh.f32 %v4321_v7 }
0x103e   :  { %v6254_v5 = vpop.eup %6253 }
0x103f   :  { %v4323_v15 = vmul.f32 %v6254_v5, %v6252_v26 }
0x1041   :  { %4324 = vst.msk [vmem:[#allocation17 + $0x30] sm:$0xff] %vm981_vm1, %v4323_v15  ;;  %4403 = vmatmul.mubr.f32.vlgmr.msra.gmra.mrb[30].mxu0 %v4323_v15  ;;  %4474 = vmatmul.mubr.f32.vlgmr.msra.gmra.mrb[30].mxu1 %v4323_v15 }
0x1042   :  { %4325 = vst.msk [vmem:[#allocation17 + $0x8] sm:$0xff] %vm984_vm2, %v4323_v15 }
0x1114   :  { %v4404_v12 = vpop.f32.mrb[30].mxu0  ;;  %v4475_v32 = vpop.f32.mrb[30].mxu1 }
0x1115   :  { %v5855_v58 = vadd.f32 %v4404_v12, %v7434_v13  ;;  %v4406_v8 = vpop.f32.mrb[31].mxu0  ;;  %v4477_v49 = vpop.f32.mrb[31].mxu1  ;;  %v5871_v62 = vadd.f32 %v4475_v32, %v7449_v48 }
0x1116   :  { %v5856_v21 = vadd.f32 %v4406_v8, %v7438_v59  ;;  %v5872_v31 = vadd.f32 %v4477_v49, %v7444_v52 }
0x1117   :  { %v4622_v39 = vmul.f32 -1.442695, %v5855_v58 }
0x1118   :  { %v4623_v3 = vmul.f32 -1.442695, %v5856_v21  ;;  %v4624_v35 = vmul.f32 -1.442695, %v5872_v31 }
0x1119   :  { %6255 = vpow2.f32 %v4622_v39 }
0x111a   :  { %6257 = vpow2.f32 %v4623_v3 }
0x111b   :  { %6259 = vpow2.f32 %v4624_v35 }
0x111c   :  { %6261 = vtanh.f32 %v5871_v62 }
0x1123   :  { %v6256_v10 = vpop.eup %6255 }
0x1124   :  { %v6258_v63 = vpop.eup %6257  ;;  %v4487_v53 = vadd.f32 1.0, %v6256_v10 }
0x1125   :  { %v4493_v9 = vadd.f32 1.0, %v6258_v63  ;;  %v6260_v13 = vpop.eup %6259 }
0x1126   :  { %6263 = vrcp.f32 %v4487_v53  ;;  %v6262_v19 = vpop.eup %6261  ;;  %v4500_v40 = vadd.f32 1.0, %v6260_v13 }
0x1127   :  { %6265 = vrcp.f32 %v4493_v9 }
0x1128   :  { %6267 = vrcp.f32 %v4500_v40 }
0x1130   :  { %v6264_v59 = vpop.eup %6263 }
0x1131   :  { %v6266_v36 = vpop.eup %6265  ;;  %v4504_v60 = vmul.f32 %v6264_v59, %v6262_v19 }
0x1132   :  { %v4503_v47 = vmul.f32 %v6266_v36, %v4321_v7  ;;  %v6268_v52 = vpop.eup %6267 }
0x1134   :  { %v4505_v61 = vadd.f32 %v4504_v60, %v4503_v47 }
0x1136   :  { %6269 = vtanh.f32 %v4505_v61 }
0x1140   :  { %v6270_v48 = vpop.eup %6269 }
0x1141   :  { %v4507_v51 = vmul.f32 %v6270_v48, %v6268_v52 }
0x1143   :  { %4508 = vst.msk [vmem:[#allocation17 + $0x38] sm:$0xff] %vm981_vm1, %v4507_v51  ;;  %4510 = vst [vmem:[#allocation18] sm:$0xff] %v4507_v51 }
0x1144   :  { %4509 = vst.msk [vmem:[#allocation17] sm:$0xff] %vm984_vm2, %v4507_v51 }
0x1145   :  { %6436 = shalt.err (!%p6433_p4)
}
0x1146   :  { %s6437_s25 = scalar_lea.hbm %s7765_s9, 1024 }
0x1147   :  { %p6438_p5 = scmp.ne.s32.totalorder %s7765_s9, %s6437_s25  ;;  %p6441_p6 = scmp.lt.u32.totalorder %s6437_s25, %s7765_s9 }
0x1149   :  { %p6443_p7 = pnand %p6441_p6, %p6438_p5 }
0x114b   :  { %6446 = shalt.err (!%p6443_p7)
}
0x114c   :  { %4522 = dma.vmem_to_hbm [thread:$0]  %s4517_s1, 1024, %s7765_s9, [#allocation7], %s6487_s6, %s6487_s6, %s6488_s30  }
0x114d   :  { %s6447_s12 = scalar_lea.vmem %s7720_s19, 128  ;;  %p6452_p9 = scmp.lt.s32.totalorder %s7720_s19, %s7720_s19 }
0x114e   :  { %p6448_p8 = scmp.ne.s32.totalorder %s7720_s19, %s6447_s12  ;;  %p6453_p10 = scmp.lt.s32.totalorder %s6447_s12, %s6447_s12 }
0x1150   :  { %p6454_p11 = por %p6453_p10, %p6452_p9 }
0x1152   :  { %p6455_p12 = pnand %p6454_p11, %p6448_p8 }
0x1154   :  { %6458 = shalt.err (!%p6455_p12)
}
0x1155   :  { %s6459_s17 = scalar_lea.hbm %s7766_s10, 128 }
0x1156   :  { %p6460_p13 = scmp.ne.s32.totalorder %s7766_s10, %s6459_s17  ;;  %p6463_p0 = scmp.lt.u32.totalorder %s6459_s17, %s7766_s10 }
0x1158   :  { %p6465_p1 = pnand %p6463_p0, %p6460_p13 }
0x115a   :  { %6468 = shalt.err (!%p6465_p1)
}
0x115b   :  { %4532 = dma.vmem_to_hbm [thread:$0]  %s7720_s19, 128, %s7766_s10, [#allocation19]  }
0x115c   :  { %6477 = dma.done.wait [#allocation7], 1024  }
0x115d   :  { %6478 = vsyncadd [#allocation7], 4294966272 }
0x115e   :  { %6479 = dma.done.wait [#allocation19], 128  }
0x115f   :  { %6480 = vsyncadd [#allocation19], 4294967168 }
0x1160   :  { %4539 = vsyncpa [#allocation6], 1 }
0x1161   :  { %4540 = vsyncpa [#allocation9], 1 }
0x1162   :  { %4541 = vsyncpa [#allocation12], 1 }
0x1163   :  { %4542 = vsyncpa [#allocation15], 1 }
0x1164   :  { %4543 = vsyncpa [#allocation7], 1 }
0x1165   :  { %4544 = vsyncpa [#allocation19], 1 }

</bundles_post_ra>
